<compile_context>
chip_gen: v5e
topology: v5e:2x2
jax: 0.10.0
libtpu: 0.0.40
codegen_flags: <defaults>
</compile_context>

<pallas_src>
import functools
import math

import jax
import jax.numpy as jnp
from jax.experimental import pallas as pl
from jax.experimental.pallas import tpu as pltpu


_DEFAULT_VMEM_BYTES = 64 * 1024 * 1024  # conservative fallback (v7x per-TC physical VMEM)


def _vmem_capacity_bytes():
    """Per-core VMEM capacity; falls back to a conservative default if unavailable."""
    try:
        return int(pltpu.get_tpu_info().vmem_capacity_bytes)
    except Exception:
        return _DEFAULT_VMEM_BYTES


def _step_vmem_bytes(N, TB, C, itemsize, io_buffers=2, weight_buffers=1):
    """Rough per-grid-step VMEM footprint for the kernel below."""
    m = N * TB
    io = (3 + 1) * io_buffers * N * TB * C * itemsize        # 3 input blocks + 1 output block
    weights = weight_buffers * (4 * C * C * 4 + C * 4)       # f32 W_Q/W_K/W_V/W_O + bias
    inter = 9 * m * C * 4 + 2 * TB * N * N * 4               # swapped slabs, q/k/v, ctx, scores
    return io + weights + inter


def _pick_time_block(T, N, C, itemsize, budget_bytes, batch, io_buffers=2):
    """Largest TB dividing T with a legal block shape (TB % 8 == 0 or TB == T) whose
    estimated per-step footprint fits the VMEM budget.  Prefers m = TB*N aligned to the
    MXU (256, then 128) when that costs at most 2x in tile size, and keeps at least two
    parallel grid steps when possible (v7x has 2 TensorCores)."""
    legal = [tb for tb in range(T, 0, -1) if T % tb == 0 and (tb % 8 == 0 or tb == T)]
    feasible = [tb for tb in legal
                if _step_vmem_bytes(N, tb, C, itemsize, io_buffers) <= budget_bytes]
    if not feasible:
        # TODO(synk): for huge N*T*C no legal block fits VMEM; an N-tiled (flash-style
        # over nodes) fallback would be needed -- not implemented here.
        return legal[-1]
    best = feasible[0]  # largest feasible
    for align in (256, 128):
        found = False
        for tb in feasible:
            if (tb * N) % align == 0 and 2 * tb >= best:
                best = tb
                found = True
                break
        if found:
            break
    # Keep >= 2 parallel grid steps when possible (so a 2-TC part never idles a core).
    if batch * (T // best) < 2:
        for tb in feasible:
            if batch * (T // tb) >= 2:
                best = tb
                break
    return best


def _smha_kernel(xq_ref, xk_ref, xv_ref,
                 wq_ref, wk_ref, wv_ref, wo_ref, bo_ref,
                 out_ref, *, heads, head_dim, use_bf16, exact_softmax):
    # xq/xk/xv/out blocks: [N, TB, C] (native module layout, lane dim = C)
    # wq/wk/wv/wo:         [C, C] (in x out);  bo: [1, C]
    n, tb, c = xq_ref.shape
    m = tb * n
    scale = 1.0 / math.sqrt(head_dim)
    mm_dtype = jnp.bfloat16 if use_bf16 else jnp.float32

    def load_time_major(ref):
        # [N, TB, C] -> [TB, N, C]: one lane-preserving sublane/major swap (XLU),
        # then a free leading-dim merge to time-major rows (t, n) for the MXU.
        x = pltpu.einshape("ntc->tnc", ref[...])
        return x.reshape(m, c).astype(mm_dtype)

    xq = load_time_major(xq_ref)
    xk = load_time_major(xk_ref)
    xv = load_time_major(xv_ref)

    # Q/K/V projections as full-depth [TB*N, C] x [C, C] matmuls (f32 accumulation);
    # the 1/sqrt(d_k) scale is folded into q once right after the projection.
    q = jnp.dot(xq, wq_ref[...].astype(mm_dtype),
                preferred_element_type=jnp.float32) * scale
    k = jnp.dot(xk, wk_ref[...].astype(mm_dtype),
                preferred_element_type=jnp.float32)
    v = jnp.dot(xv, wv_ref[...].astype(mm_dtype),
                preferred_element_type=jnp.float32)

    q3 = q.reshape(tb, n, c)
    k3 = k.reshape(tb, n, c)
    v3 = v.reshape(tb, n, c).astype(mm_dtype)

    # Per-head attention over the spatial axis N, batched over the TB timesteps.
    # heads is a small static int; per-head contexts are stacked along the lane axis so
    # the output projection below is a single full-depth (K = C) matmul.
    ctx_heads = []
    for h in range(heads):
        sl = slice(h * head_dim, (h + 1) * head_dim)
        q_h = q3[:, :, sl].astype(mm_dtype)
        k_h = k3[:, :, sl].astype(mm_dtype)
        s = jnp.einsum('bnd,bmd->bnm', q_h, k_h,
                       preferred_element_type=jnp.float32)            # [TB, N, N]
        s = s - jnp.max(s, axis=-1, keepdims=True)
        p = jnp.exp(s)                                                 # softmax math in f32
        denom = jnp.sum(p, axis=-1, keepdims=True)
        inv = (1.0 / denom) if exact_softmax else pl.reciprocal(denom, approx=True)
        ctx = jnp.einsum('bnm,bmd->bnd', p.astype(mm_dtype), v3[:, :, sl],
                         preferred_element_type=jnp.float32) * inv     # [TB, N, Dk]
        ctx_heads.append(ctx)

    ctx_all = jnp.concatenate(ctx_heads, axis=-1).reshape(m, c)        # [TB*N, C]

    # Single fc_out matmul with full contraction depth C, plus bias.
    out_tm = jnp.dot(ctx_all.astype(mm_dtype), wo_ref[...].astype(mm_dtype),
                     preferred_element_type=jnp.float32) + bo_ref[...]

    # One swap back to the module's node-major layout for a clean block store.
    out_ref[...] = pltpu.einshape("tnc->ntc",
                                  out_tm.reshape(tb, n, c)).astype(out_ref.dtype)


def smha_forward(input_Q, input_K, input_V, params, heads, *,
                 use_bf16=False, exact_softmax=False, input_buffer_count=2):
    """input_*: [B, N, T, C] (same layout as the PyTorch module).  Returns [B, N, T, C]."""
    B, N, T, C = input_Q.shape
    head_dim = C // heads
    assert head_dim * heads == C, "embed size must be divisible by heads"

    itemsize = jnp.dtype(input_Q.dtype).itemsize
    vmem_phys = _vmem_capacity_bytes()
    budget = int(vmem_phys * 0.6)                 # leave headroom for compiler scratch
    TB = _pick_time_block(T, N, C, itemsize, budget, B, io_buffers=input_buffer_count)
    grid = (B, T // TB)
    m = TB * N

    est_step = _step_vmem_bytes(N, TB, C, itemsize, io_buffers=input_buffer_count)
    vmem_limit = int(min(int(vmem_phys * 0.9), max(2 * est_step, 32 * 1024 * 1024)))

    # PyTorch Linear weights are [out, in]; the kernel wants [in, out].
    wq_t = params["W_Q"].T
    wk_t = params["W_K"].T
    wv_t = params["W_V"].T
    wo_t = params["fc_out_w"].T
    bo = params["fc_out_b"].reshape(1, C)

    if input_buffer_count != 2:
        x_spec = pl.BlockSpec((None, N, TB, C), lambda b, t: (b, 0, t, 0),
                              pipeline_mode=pl.Buffered(input_buffer_count))
    else:
        x_spec = pl.BlockSpec((None, N, TB, C), lambda b, t: (b, 0, t, 0))
    # Constant-index weight/bias blocks: single-buffer them (DMA'd once anyway).
    w_spec = pl.BlockSpec((C, C), lambda b, t: (0, 0), pipeline_mode=pl.Buffered(1))
    b_spec = pl.BlockSpec((1, C), lambda b, t: (0, 0), pipeline_mode=pl.Buffered(1))
    o_spec = pl.BlockSpec((None, N, TB, C), lambda b, t: (b, 0, t, 0))

    steps = B * (T // TB)
    flops = steps * (8 * m * C * C + 4 * TB * N * N * C)          # 4 GEMMs + scores/ctx
    transcendentals = steps * heads * TB * N * N                   # exp in the softmax
    bytes_accessed = 4 * B * N * T * C * itemsize + 4 * C * C * 4 + C * 4

    kernel = functools.partial(_smha_kernel, heads=heads, head_dim=head_dim,
                               use_bf16=use_bf16, exact_softmax=exact_softmax)
    out = pl.pallas_call(
        kernel,
        out_shape=jax.ShapeDtypeStruct((B, N, T, C), input_Q.dtype),
        grid=grid,
        in_specs=[x_spec, x_spec, x_spec, w_spec, w_spec, w_spec, w_spec, b_spec],
        out_specs=o_spec,
        compiler_params=pltpu.CompilerParams(
            dimension_semantics=("parallel", "parallel"),
            vmem_limit_bytes=vmem_limit),
        cost_estimate=pl.CostEstimate(flops=flops,
                                      transcendentals=transcendentals,
                                      bytes_accessed=bytes_accessed),
    )(input_Q, input_K, input_V, wq_t, wk_t, wv_t, wo_t, bo)
    return out


def smha_reference(input_Q, input_K, input_V, params, heads):
    """Pure-JAX replica of the PyTorch forward for correctness checking."""
    B, N, T, C = input_Q.shape
    d_k = C // heads

    def split(x, W):
        y = x @ W.T                                           # [B, N, T, C]
        y = y.reshape(B, N, T, heads, d_k)
        return jnp.transpose(y, (0, 3, 2, 1, 4))              # [B, H, T, N, Dk]

    Q = split(input_Q, params["W_Q"])
    K = split(input_K, params["W_K"])
    V = split(input_V, params["W_V"])
    scores = jnp.einsum("bhtnd,bhtmd->bhtnm", Q, K) / jnp.sqrt(jnp.float32(d_k))
    attn = jax.nn.softmax(scores, axis=-1)
    ctx = jnp.einsum("bhtnm,bhtmd->bhtnd", attn, V)
    ctx = jnp.transpose(ctx, (0, 3, 2, 1, 4)).reshape(B, N, T, heads * d_k)
    return ctx @ params["fc_out_w"].T + params["fc_out_b"]


if __name__ == "__main__":
    # Small shapes consistent with the module: [B, N, T, C], embed_size=C, heads | C
    B, N, T, C = 2, 16, 8, 32
    heads = 4

    key = jax.random.PRNGKey(0)
    kq, kk, kv, kwq, kwk, kwv, kwo, kbo = jax.random.split(key, 8)

    input_Q = jax.random.normal(kq, (B, N, T, C), dtype=jnp.float32)
    input_K = jax.random.normal(kk, (B, N, T, C), dtype=jnp.float32)
    input_V = jax.random.normal(kv, (B, N, T, C), dtype=jnp.float32)

    # Deterministic synthetic parameters (PyTorch Linear convention: [out, in])
    params = {
        "W_Q": 0.1 * jax.random.normal(kwq, (C, C), dtype=jnp.float32),
        "W_K": 0.1 * jax.random.normal(kwk, (C, C), dtype=jnp.float32),
        "W_V": 0.1 * jax.random.normal(kwv, (C, C), dtype=jnp.float32),
        "fc_out_w": 0.1 * jax.random.normal(kwo, (C, C), dtype=jnp.float32),
        "fc_out_b": 0.1 * jax.random.normal(kbo, (C,), dtype=jnp.float32),
    }

    out = smha_forward(input_Q, input_K, input_V, params, heads)
    out = jax.block_until_ready(out)

    ref = smha_reference(input_Q, input_K, input_V, params, heads)
    assert out.shape == (B, N, T, C)
    assert jnp.allclose(out, ref, rtol=2e-3, atol=2e-3), (
        f"max abs err = {jnp.max(jnp.abs(out - ref))}")

    print("KERNEL_OK")
</pallas_src>

<mosaic_0001>
module attributes {stable_mosaic.version = 11 : i64} {
  func.func @_smha_kernel(%arg0: i32, %arg1: i32, %arg2: memref<1x16x8x32xf32, #tpu.memory_space<vmem>>, %arg3: memref<1x16x8x32xf32, #tpu.memory_space<vmem>>, %arg4: memref<1x16x8x32xf32, #tpu.memory_space<vmem>>, %arg5: memref<32x32xf32, #tpu.memory_space<vmem>>, %arg6: memref<32x32xf32, #tpu.memory_space<vmem>>, %arg7: memref<32x32xf32, #tpu.memory_space<vmem>>, %arg8: memref<32x32xf32, #tpu.memory_space<vmem>>, %arg9: memref<1x32xf32, #tpu.memory_space<vmem>>, %arg10: memref<1x16x8x32xf32, #tpu.memory_space<vmem>>) attributes {dimension_semantics = [#tpu.dimension_semantics<parallel>, #tpu.dimension_semantics<parallel>], iteration_bounds = array<i64: 2, 1>, scalar_prefetch = 0 : i64, scratch_operands = 0 : i64, tpu.core_type = #tpu.core_type<tc>, window_params = [{transform_indices = @transform_0, window_bounds = array<i64: 1, 16, 8, 32>}, {transform_indices = @transform_1, window_bounds = array<i64: 1, 16, 8, 32>}, {transform_indices = @transform_2, window_bounds = array<i64: 1, 16, 8, 32>}, {pipeline_mode = #tpu.pipeline_mode<synchronous>, transform_indices = @transform_3, window_bounds = array<i64: 32, 32>}, {pipeline_mode = #tpu.pipeline_mode<synchronous>, transform_indices = @transform_4, window_bounds = array<i64: 32, 32>}, {pipeline_mode = #tpu.pipeline_mode<synchronous>, transform_indices = @transform_5, window_bounds = array<i64: 32, 32>}, {pipeline_mode = #tpu.pipeline_mode<synchronous>, transform_indices = @transform_6, window_bounds = array<i64: 32, 32>}, {pipeline_mode = #tpu.pipeline_mode<synchronous>, transform_indices = @transform_7, window_bounds = array<i64: 1, 32>}, {transform_indices = @transform_8, window_bounds = array<i64: 1, 16, 8, 32>}]} {
    %c0 = arith.constant 0 : index
    %c0_0 = arith.constant 0 : index
    %c0_1 = arith.constant 0 : index
    %c0_2 = arith.constant 0 : index
    %0 = vector.load %arg2[%c0, %c0_0, %c0_1, %c0_2] : memref<1x16x8x32xf32, #tpu.memory_space<vmem>>, vector<1x16x8x32xf32>
    %1 = vector.shape_cast %0 : vector<1x16x8x32xf32> to vector<16x8x32xf32>
    %2 = tpu.transpose %1, [1, 0, 2] : vector<16x8x32xf32> -> vector<8x16x32xf32>
    %3 = vector.shape_cast %2 : vector<8x16x32xf32> to vector<128x32xf32>
    %c0_3 = arith.constant 0 : index
    %c0_4 = arith.constant 0 : index
    %c0_5 = arith.constant 0 : index
    %c0_6 = arith.constant 0 : index
    %4 = vector.load %arg3[%c0_3, %c0_4, %c0_5, %c0_6] : memref<1x16x8x32xf32, #tpu.memory_space<vmem>>, vector<1x16x8x32xf32>
    %5 = vector.shape_cast %4 : vector<1x16x8x32xf32> to vector<16x8x32xf32>
    %6 = tpu.transpose %5, [1, 0, 2] : vector<16x8x32xf32> -> vector<8x16x32xf32>
    %7 = vector.shape_cast %6 : vector<8x16x32xf32> to vector<128x32xf32>
    %c0_7 = arith.constant 0 : index
    %c0_8 = arith.constant 0 : index
    %c0_9 = arith.constant 0 : index
    %c0_10 = arith.constant 0 : index
    %8 = vector.load %arg4[%c0_7, %c0_8, %c0_9, %c0_10] : memref<1x16x8x32xf32, #tpu.memory_space<vmem>>, vector<1x16x8x32xf32>
    %9 = vector.shape_cast %8 : vector<1x16x8x32xf32> to vector<16x8x32xf32>
    %10 = tpu.transpose %9, [1, 0, 2] : vector<16x8x32xf32> -> vector<8x16x32xf32>
    %11 = vector.shape_cast %10 : vector<8x16x32xf32> to vector<128x32xf32>
    %c0_11 = arith.constant 0 : index
    %c0_12 = arith.constant 0 : index
    %12 = vector.load %arg5[%c0_11, %c0_12] : memref<32x32xf32, #tpu.memory_space<vmem>>, vector<32x32xf32>
    %cst = arith.constant dense<0.000000e+00> : vector<128x32xf32>
    %13 = tpu.matmul %3, %12, %cst {dimension_numbers = #tpu.dot_dimension_numbers<[1], [0], [0], [1], [0, 0, 1, 1], [], []>} : vector<128x32xf32>, vector<32x32xf32>, vector<128x32xf32> -> vector<128x32xf32>
    %cst_13 = arith.constant 0.353553385 : f32
    %14 = vector.broadcast %cst_13 : f32 to vector<128x32xf32>
    %15 = arith.mulf %13, %14 : vector<128x32xf32>
    %c0_14 = arith.constant 0 : index
    %c0_15 = arith.constant 0 : index
    %16 = vector.load %arg6[%c0_14, %c0_15] : memref<32x32xf32, #tpu.memory_space<vmem>>, vector<32x32xf32>
    %cst_16 = arith.constant dense<0.000000e+00> : vector<128x32xf32>
    %17 = tpu.matmul %7, %16, %cst_16 {dimension_numbers = #tpu.dot_dimension_numbers<[1], [0], [0], [1], [0, 0, 1, 1], [], []>} : vector<128x32xf32>, vector<32x32xf32>, vector<128x32xf32> -> vector<128x32xf32>
    %c0_17 = arith.constant 0 : index
    %c0_18 = arith.constant 0 : index
    %18 = vector.load %arg7[%c0_17, %c0_18] : memref<32x32xf32, #tpu.memory_space<vmem>>, vector<32x32xf32>
    %cst_19 = arith.constant dense<0.000000e+00> : vector<128x32xf32>
    %19 = tpu.matmul %11, %18, %cst_19 {dimension_numbers = #tpu.dot_dimension_numbers<[1], [0], [0], [1], [0, 0, 1, 1], [], []>} : vector<128x32xf32>, vector<32x32xf32>, vector<128x32xf32> -> vector<128x32xf32>
    %20 = vector.shape_cast %15 : vector<128x32xf32> to vector<8x16x32xf32>
    %21 = vector.shape_cast %17 : vector<128x32xf32> to vector<8x16x32xf32>
    %22 = vector.shape_cast %19 : vector<128x32xf32> to vector<8x16x32xf32>
    %23 = vector.extract_strided_slice %20 {offsets = [0, 0, 0], sizes = [8, 16, 8], strides = [1, 1, 1]} : vector<8x16x32xf32> to vector<8x16x8xf32>
    %24 = vector.extract_strided_slice %21 {offsets = [0, 0, 0], sizes = [8, 16, 8], strides = [1, 1, 1]} : vector<8x16x32xf32> to vector<8x16x8xf32>
    "tpu.trace_start"() <{level = 10 : i32, message = "bnd,bmd->bnm"}> : () -> ()
    %cst_20 = arith.constant dense<0.000000e+00> : vector<8x16x16xf32>
    %25 = tpu.matmul %23, %24, %cst_20 {dimension_numbers = #tpu.dot_dimension_numbers<[2], [2], [1], [1], [0, 0, 0, 1, 1, 1], [0], [0]>} : vector<8x16x8xf32>, vector<8x16x8xf32>, vector<8x16x16xf32> -> vector<8x16x16xf32>
    "tpu.trace_stop"() : () -> ()
    %cst_21 = arith.constant dense<0xFF800000> : vector<8x16xf32>
    %26 = vector.multi_reduction <maximumf>, %25, %cst_21 [2] : vector<8x16x16xf32> to vector<8x16xf32>
    %27 = vector.shape_cast %26 : vector<8x16xf32> to vector<8x16x1xf32>
    %28 = vector.broadcast %27 : vector<8x16x1xf32> to vector<8x16x16xf32>
    %29 = arith.subf %25, %28 : vector<8x16x16xf32>
    %30 = math.exp %29 : vector<8x16x16xf32>
    %cst_22 = arith.constant dense<0.000000e+00> : vector<8x16xf32>
    %31 = vector.multi_reduction <add>, %30, %cst_22 [2] : vector<8x16x16xf32> to vector<8x16xf32>
    %32 = vector.shape_cast %31 : vector<8x16xf32> to vector<8x16x1xf32>
    %33 = tpu.reciprocal %32 {approx = true} : vector<8x16x1xf32> -> vector<8x16x1xf32>
    %34 = vector.extract_strided_slice %22 {offsets = [0, 0, 0], sizes = [8, 16, 8], strides = [1, 1, 1]} : vector<8x16x32xf32> to vector<8x16x8xf32>
    "tpu.trace_start"() <{level = 10 : i32, message = "bnm,bmd->bnd"}> : () -> ()
    %cst_23 = arith.constant dense<0.000000e+00> : vector<8x16x8xf32>
    %35 = tpu.matmul %30, %34, %cst_23 {dimension_numbers = #tpu.dot_dimension_numbers<[2], [1], [1], [2], [0, 0, 0, 1, 1, 2], [0], [0]>} : vector<8x16x16xf32>, vector<8x16x8xf32>, vector<8x16x8xf32> -> vector<8x16x8xf32>
    "tpu.trace_stop"() : () -> ()
    %36 = vector.broadcast %33 : vector<8x16x1xf32> to vector<8x16x8xf32>
    %37 = arith.mulf %35, %36 : vector<8x16x8xf32>
    %38 = vector.extract_strided_slice %20 {offsets = [0, 0, 8], sizes = [8, 16, 8], strides = [1, 1, 1]} : vector<8x16x32xf32> to vector<8x16x8xf32>
    %39 = vector.extract_strided_slice %21 {offsets = [0, 0, 8], sizes = [8, 16, 8], strides = [1, 1, 1]} : vector<8x16x32xf32> to vector<8x16x8xf32>
    "tpu.trace_start"() <{level = 10 : i32, message = "bnd,bmd->bnm"}> : () -> ()
    %cst_24 = arith.constant dense<0.000000e+00> : vector<8x16x16xf32>
    %40 = tpu.matmul %38, %39, %cst_24 {dimension_numbers = #tpu.dot_dimension_numbers<[2], [2], [1], [1], [0, 0, 0, 1, 1, 1], [0], [0]>} : vector<8x16x8xf32>, vector<8x16x8xf32>, vector<8x16x16xf32> -> vector<8x16x16xf32>
    "tpu.trace_stop"() : () -> ()
    %cst_25 = arith.constant dense<0xFF800000> : vector<8x16xf32>
    %41 = vector.multi_reduction <maximumf>, %40, %cst_25 [2] : vector<8x16x16xf32> to vector<8x16xf32>
    %42 = vector.shape_cast %41 : vector<8x16xf32> to vector<8x16x1xf32>
    %43 = vector.broadcast %42 : vector<8x16x1xf32> to vector<8x16x16xf32>
    %44 = arith.subf %40, %43 : vector<8x16x16xf32>
    %45 = math.exp %44 : vector<8x16x16xf32>
    %cst_26 = arith.constant dense<0.000000e+00> : vector<8x16xf32>
    %46 = vector.multi_reduction <add>, %45, %cst_26 [2] : vector<8x16x16xf32> to vector<8x16xf32>
    %47 = vector.shape_cast %46 : vector<8x16xf32> to vector<8x16x1xf32>
    %48 = tpu.reciprocal %47 {approx = true} : vector<8x16x1xf32> -> vector<8x16x1xf32>
    %49 = vector.extract_strided_slice %22 {offsets = [0, 0, 8], sizes = [8, 16, 8], strides = [1, 1, 1]} : vector<8x16x32xf32> to vector<8x16x8xf32>
    "tpu.trace_start"() <{level = 10 : i32, message = "bnm,bmd->bnd"}> : () -> ()
    %cst_27 = arith.constant dense<0.000000e+00> : vector<8x16x8xf32>
    %50 = tpu.matmul %45, %49, %cst_27 {dimension_numbers = #tpu.dot_dimension_numbers<[2], [1], [1], [2], [0, 0, 0, 1, 1, 2], [0], [0]>} : vector<8x16x16xf32>, vector<8x16x8xf32>, vector<8x16x8xf32> -> vector<8x16x8xf32>
    "tpu.trace_stop"() : () -> ()
    %51 = vector.broadcast %48 : vector<8x16x1xf32> to vector<8x16x8xf32>
    %52 = arith.mulf %50, %51 : vector<8x16x8xf32>
    %53 = vector.extract_strided_slice %20 {offsets = [0, 0, 16], sizes = [8, 16, 8], strides = [1, 1, 1]} : vector<8x16x32xf32> to vector<8x16x8xf32>
    %54 = vector.extract_strided_slice %21 {offsets = [0, 0, 16], sizes = [8, 16, 8], strides = [1, 1, 1]} : vector<8x16x32xf32> to vector<8x16x8xf32>
    "tpu.trace_start"() <{level = 10 : i32, message = "bnd,bmd->bnm"}> : () -> ()
    %cst_28 = arith.constant dense<0.000000e+00> : vector<8x16x16xf32>
    %55 = tpu.matmul %53, %54, %cst_28 {dimension_numbers = #tpu.dot_dimension_numbers<[2], [2], [1], [1], [0, 0, 0, 1, 1, 1], [0], [0]>} : vector<8x16x8xf32>, vector<8x16x8xf32>, vector<8x16x16xf32> -> vector<8x16x16xf32>
    "tpu.trace_stop"() : () -> ()
    %cst_29 = arith.constant dense<0xFF800000> : vector<8x16xf32>
    %56 = vector.multi_reduction <maximumf>, %55, %cst_29 [2] : vector<8x16x16xf32> to vector<8x16xf32>
    %57 = vector.shape_cast %56 : vector<8x16xf32> to vector<8x16x1xf32>
    %58 = vector.broadcast %57 : vector<8x16x1xf32> to vector<8x16x16xf32>
    %59 = arith.subf %55, %58 : vector<8x16x16xf32>
    %60 = math.exp %59 : vector<8x16x16xf32>
    %cst_30 = arith.constant dense<0.000000e+00> : vector<8x16xf32>
    %61 = vector.multi_reduction <add>, %60, %cst_30 [2] : vector<8x16x16xf32> to vector<8x16xf32>
    %62 = vector.shape_cast %61 : vector<8x16xf32> to vector<8x16x1xf32>
    %63 = tpu.reciprocal %62 {approx = true} : vector<8x16x1xf32> -> vector<8x16x1xf32>
    %64 = vector.extract_strided_slice %22 {offsets = [0, 0, 16], sizes = [8, 16, 8], strides = [1, 1, 1]} : vector<8x16x32xf32> to vector<8x16x8xf32>
    "tpu.trace_start"() <{level = 10 : i32, message = "bnm,bmd->bnd"}> : () -> ()
    %cst_31 = arith.constant dense<0.000000e+00> : vector<8x16x8xf32>
    %65 = tpu.matmul %60, %64, %cst_31 {dimension_numbers = #tpu.dot_dimension_numbers<[2], [1], [1], [2], [0, 0, 0, 1, 1, 2], [0], [0]>} : vector<8x16x16xf32>, vector<8x16x8xf32>, vector<8x16x8xf32> -> vector<8x16x8xf32>
    "tpu.trace_stop"() : () -> ()
    %66 = vector.broadcast %63 : vector<8x16x1xf32> to vector<8x16x8xf32>
    %67 = arith.mulf %65, %66 : vector<8x16x8xf32>
    %68 = vector.extract_strided_slice %20 {offsets = [0, 0, 24], sizes = [8, 16, 8], strides = [1, 1, 1]} : vector<8x16x32xf32> to vector<8x16x8xf32>
    %69 = vector.extract_strided_slice %21 {offsets = [0, 0, 24], sizes = [8, 16, 8], strides = [1, 1, 1]} : vector<8x16x32xf32> to vector<8x16x8xf32>
    "tpu.trace_start"() <{level = 10 : i32, message = "bnd,bmd->bnm"}> : () -> ()
    %cst_32 = arith.constant dense<0.000000e+00> : vector<8x16x16xf32>
    %70 = tpu.matmul %68, %69, %cst_32 {dimension_numbers = #tpu.dot_dimension_numbers<[2], [2], [1], [1], [0, 0, 0, 1, 1, 1], [0], [0]>} : vector<8x16x8xf32>, vector<8x16x8xf32>, vector<8x16x16xf32> -> vector<8x16x16xf32>
    "tpu.trace_stop"() : () -> ()
    %cst_33 = arith.constant dense<0xFF800000> : vector<8x16xf32>
    %71 = vector.multi_reduction <maximumf>, %70, %cst_33 [2] : vector<8x16x16xf32> to vector<8x16xf32>
    %72 = vector.shape_cast %71 : vector<8x16xf32> to vector<8x16x1xf32>
    %73 = vector.broadcast %72 : vector<8x16x1xf32> to vector<8x16x16xf32>
    %74 = arith.subf %70, %73 : vector<8x16x16xf32>
    %75 = math.exp %74 : vector<8x16x16xf32>
    %cst_34 = arith.constant dense<0.000000e+00> : vector<8x16xf32>
    %76 = vector.multi_reduction <add>, %75, %cst_34 [2] : vector<8x16x16xf32> to vector<8x16xf32>
    %77 = vector.shape_cast %76 : vector<8x16xf32> to vector<8x16x1xf32>
    %78 = tpu.reciprocal %77 {approx = true} : vector<8x16x1xf32> -> vector<8x16x1xf32>
    %79 = vector.extract_strided_slice %22 {offsets = [0, 0, 24], sizes = [8, 16, 8], strides = [1, 1, 1]} : vector<8x16x32xf32> to vector<8x16x8xf32>
    "tpu.trace_start"() <{level = 10 : i32, message = "bnm,bmd->bnd"}> : () -> ()
    %cst_35 = arith.constant dense<0.000000e+00> : vector<8x16x8xf32>
    %80 = tpu.matmul %75, %79, %cst_35 {dimension_numbers = #tpu.dot_dimension_numbers<[2], [1], [1], [2], [0, 0, 0, 1, 1, 2], [0], [0]>} : vector<8x16x16xf32>, vector<8x16x8xf32>, vector<8x16x8xf32> -> vector<8x16x8xf32>
    "tpu.trace_stop"() : () -> ()
    %81 = vector.broadcast %78 : vector<8x16x1xf32> to vector<8x16x8xf32>
    %82 = arith.mulf %80, %81 : vector<8x16x8xf32>
    %83 = tpu.concatenate %37, %52, %67, %82 in 2 : vector<8x16x8xf32>, vector<8x16x8xf32>, vector<8x16x8xf32>, vector<8x16x8xf32> -> vector<8x16x32xf32>
    %84 = vector.shape_cast %83 : vector<8x16x32xf32> to vector<128x32xf32>
    %c0_36 = arith.constant 0 : index
    %c0_37 = arith.constant 0 : index
    %85 = vector.load %arg8[%c0_36, %c0_37] : memref<32x32xf32, #tpu.memory_space<vmem>>, vector<32x32xf32>
    %cst_38 = arith.constant dense<0.000000e+00> : vector<128x32xf32>
    %86 = tpu.matmul %84, %85, %cst_38 {dimension_numbers = #tpu.dot_dimension_numbers<[1], [0], [0], [1], [0, 0, 1, 1], [], []>} : vector<128x32xf32>, vector<32x32xf32>, vector<128x32xf32> -> vector<128x32xf32>
    %c0_39 = arith.constant 0 : index
    %c0_40 = arith.constant 0 : index
    %87 = vector.load %arg9[%c0_39, %c0_40] : memref<1x32xf32, #tpu.memory_space<vmem>>, vector<1x32xf32>
    %88 = vector.broadcast %87 : vector<1x32xf32> to vector<128x32xf32>
    %89 = arith.addf %86, %88 : vector<128x32xf32>
    %90 = vector.shape_cast %89 : vector<128x32xf32> to vector<8x16x32xf32>
    %91 = tpu.transpose %90, [1, 0, 2] : vector<8x16x32xf32> -> vector<16x8x32xf32>
    %c0_41 = arith.constant 0 : index
    %c0_42 = arith.constant 0 : index
    %c0_43 = arith.constant 0 : index
    %c0_44 = arith.constant 0 : index
    %92 = vector.load %arg10[%c0_41, %c0_42, %c0_43, %c0_44] : memref<1x16x8x32xf32, #tpu.memory_space<vmem>>, vector<1x16x8x32xf32>
    %93 = vector.shape_cast %92 : vector<1x16x8x32xf32> to vector<16x8x32xf32>
    %94 = vector.shape_cast %91 : vector<16x8x32xf32> to vector<1x16x8x32xf32>
    tpu.vector_store %arg10[%c0_41, %c0_42, %c0_43, %c0_44], %94 {strides = array<i32>} : memref<1x16x8x32xf32, #tpu.memory_space<vmem>>, vector<1x16x8x32xf32>,
    return
  }
  func.func @transform_0(%arg0: i32, %arg1: i32) -> (i32, i32, i32, i32) {
    %c0_i32 = arith.constant 0 : i32
    %c0_i32_0 = arith.constant 0 : i32
    %c0_i32_1 = arith.constant 0 : i32
    return %arg0, %c0_i32, %arg1, %c0_i32_0 : i32, i32, i32, i32
  }
  func.func @transform_1(%arg0: i32, %arg1: i32) -> (i32, i32, i32, i32) {
    %c0_i32 = arith.constant 0 : i32
    %c0_i32_0 = arith.constant 0 : i32
    %c0_i32_1 = arith.constant 0 : i32
    return %arg0, %c0_i32, %arg1, %c0_i32_0 : i32, i32, i32, i32
  }
  func.func @transform_2(%arg0: i32, %arg1: i32) -> (i32, i32, i32, i32) {
    %c0_i32 = arith.constant 0 : i32
    %c0_i32_0 = arith.constant 0 : i32
    %c0_i32_1 = arith.constant 0 : i32
    return %arg0, %c0_i32, %arg1, %c0_i32_0 : i32, i32, i32, i32
  }
  func.func @transform_3(%arg0: i32, %arg1: i32) -> (i32, i32) {
    %c0_i32 = arith.constant 0 : i32
    %c0_i32_0 = arith.constant 0 : i32
    %c0_i32_1 = arith.constant 0 : i32
    return %c0_i32, %c0_i32_0 : i32, i32
  }
  func.func @transform_4(%arg0: i32, %arg1: i32) -> (i32, i32) {
    %c0_i32 = arith.constant 0 : i32
    %c0_i32_0 = arith.constant 0 : i32
    %c0_i32_1 = arith.constant 0 : i32
    return %c0_i32, %c0_i32_0 : i32, i32
  }
  func.func @transform_5(%arg0: i32, %arg1: i32) -> (i32, i32) {
    %c0_i32 = arith.constant 0 : i32
    %c0_i32_0 = arith.constant 0 : i32
    %c0_i32_1 = arith.constant 0 : i32
    return %c0_i32, %c0_i32_0 : i32, i32
  }
  func.func @transform_6(%arg0: i32, %arg1: i32) -> (i32, i32) {
    %c0_i32 = arith.constant 0 : i32
    %c0_i32_0 = arith.constant 0 : i32
    %c0_i32_1 = arith.constant 0 : i32
    return %c0_i32, %c0_i32_0 : i32, i32
  }
  func.func @transform_7(%arg0: i32, %arg1: i32) -> (i32, i32) {
    %c0_i32 = arith.constant 0 : i32
    %c0_i32_0 = arith.constant 0 : i32
    %c0_i32_1 = arith.constant 0 : i32
    return %c0_i32, %c0_i32_0 : i32, i32
  }
  func.func @transform_8(%arg0: i32, %arg1: i32) -> (i32, i32, i32, i32) {
    %c0_i32 = arith.constant 0 : i32
    %c0_i32_0 = arith.constant 0 : i32
    %c0_i32_1 = arith.constant 0 : i32
    return %arg0, %c0_i32, %arg1, %c0_i32_0 : i32, i32, i32, i32
  }
}

</mosaic_0001>

<bundles_post_ra>
// kernel: tpu_custom_call.1
= control target key start
LH: loop header
LB: loop body
LE: loop exit
PB: predicated region body
PF: predicated region fallthrough
CT: control target
= control target key end

     0   :  { %s9602_s0 = inlined_call_operand.hbm [shape: f32[2,16,8,32], index: 0, kind: input, shape index: {}]   ;;  %s9603_s1 = inlined_call_operand.hbm [shape: f32[2,16,8,32], index: 1, kind: input, shape index: {}]   ;;  %s9604_s2 = inlined_call_operand.hbm [shape: f32[2,16,8,32], index: 2, kind: input, shape index: {}]   ;;  %s9605_s3 = inlined_call_operand.hbm [shape: f32[32,32], index: 3, kind: input, shape index: {}]   ;;  %s9606_s4 = inlined_call_operand.hbm [shape: f32[32,32], index: 4, kind: input, shape index: {}]   ;;  %s9607_s5 = inlined_call_operand.hbm [shape: f32[32,32], index: 5, kind: input, shape index: {}]   ;;  %s9608_s6 = inlined_call_operand.hbm [shape: f32[32,32], index: 6, kind: input, shape index: {}]   ;;  %s9609_s7 = inlined_call_operand.vmem [shape: f32[1,32], index: 7, kind: input, shape index: {}]   ;;  %s9610_s8 = inlined_call_operand.hbm [shape: f32[2,16,8,32], index: 8, kind: output, shape index: {}]  }
   0x1   :  { %9671 = sst [smem:[#allocation102_spill]] %s9602_s0 }
   0x2   :  { %9672 = sst [smem:[#allocation103_spill]] %s9603_s1 }
   0x3   :  { %9673 = sst [smem:[#allocation104_spill]] %s9605_s3 }
   0x4   :  { %9674 = sst [smem:[#allocation105_spill]] %s9606_s4 }
   0x5   :  { %9675 = sst [smem:[#allocation106_spill]] %s9607_s5 }
   0x6   :  { %13 = vsyncpa [#allocation3], 0 }
   0x7   :  { %15 = vsyncpa [#allocation3 + $0x1], 0 }
   0x8   :  { %16 = vsyncpa [#allocation6], 0 }
   0x9   :  { %18 = vsyncpa [#allocation6 + $0x1], 0 }
   0xa   :  { %19 = vsyncpa [#allocation9], 0 }
   0xb   :  { %20 = vsyncpa [#allocation12], 0 }
   0xc   :  { %21 = vsyncpa [#allocation4], 0 }
   0xd   :  { %23 = vsyncpa [#allocation4 + $0x1], 0  ;;  %s6554_s27 = smov 0   ;;  %s6556_s28 = smov 0  }
   0xe   :  { %s6558_s29 = smov 0   ;;  %s6560_s30 = smov 0  }
   0xf   :  { %s6562_s9 = smov 0   ;;  %s6564_s10 = smov 0  }
  0x10 LB: > { %9676 = sst [smem:[#allocation20_spill]] %s6472_s27  ;;  %s6585_s11 = sadd.s32 4294967295, %s6492_s10   ;;  %s6492_s10 = sphi %s6564_s10, %s29_s10   ;;  %s6488_s9 = sphi %s6562_s9, %s9962_s9   ;;  %s6484_s30 = sphi %s6560_s30, %s9961_s30   ;;  %s6480_s29 = sphi %s6558_s29, %s9965_s29   ;;  %s6476_s28 = sphi %s6556_s28, %s9964_s28   ;;  %s6472_s27 = sphi %s6554_s27, %s9963_s27  }
  0x11   : > { %9677 = sst [smem:[#allocation21_spill]] %s6488_s9  ;;  %s5385_s12 = sadd.s32 4294967294, %s6492_s10  }
  0x12   : > { %9678 = sst [smem:[#allocation22_spill]] %s6492_s10  ;;  %p63_p0 = scmp.ne.s32.totalorder %s6476_s28, %s6472_s27 }
  0x13   : > { %p64_p1 = scmp.eq.s32.totalorder %s6585_s11, 0  ;;  %p250_p2 = scmp.eq.s32.totalorder %s6585_s11, 1 }
  0x14   : > { %p256_p3 = scmp.eq.s32.totalorder %s5385_s12, 1  ;;  %p5386_p5 = scmp.ge.s32.totalorder %s6492_s10, 1 }
  0x15   : > { %p6594_p4 = por %p64_p1, %p63_p0  ;;  %p263_p7 = scmp.lt.s32.totalorder %s6492_s10, 3 }
  0x16   : > { %p6599_p6 = por %p256_p3, %p63_p0  ;;  %s9682_s3 = sld [smem:[#allocation104_spill]] }
  0x17   : > { %p6607_p8 = pnand %p5386_p5, %p263_p7  ;;  %s6494_s19 = smov [#allocation8]  }
  0x18   : > { %s9680_s14 = scalar_select %p6599_p6, 1, 0 }
  0x19   : > { %p5711_p9 = pneg %p6607_p8  ;;  %s276_s20 = sshll.u32 %s6494_s19, 4  ;;  %s277_s20 = int_to_ptr.vmem [resolvable:$true] %s276_s20 }
  0x1a   : > { %9681 = sst [smem:[#allocation23_spill]] %s9680_s14  ;;  %s9611_s25 = smov 128  }
  0x1b   : > { %p6615_p10 = pnand %p5711_p9, %p64_p1  ;;  %s9685_s5 = sld [smem:[#allocation106_spill]] }
  0x1c   : > { %s274_s17 = sshll.u32 %s9682_s3, 4  ;;  %s9613_s26 = smov 8   ;;  %s275_s17 = int_to_ptr.hbm [resolvable:$true] %s274_s17 }
  0x1d   : > { %5714 = dma.hbm_to_vmem [thread:$0]  (!%p6615_p10), %s275_s17, 512, %s277_s20, [#allocation9], %s9611_s25, %s9611_s25, %s9613_s26  }
  0x1e   : > { %s6497_s12 = smov [#allocation11]   ;;  %s41_s16 = sadd.s32 1, %s6488_s9 }
  0x1f   : > { %s304_s15 = sshll.u32 %s6497_s12, 4  ;;  %s50_s19 = sadd.s32 1, %s6480_s29  ;;  %s305_s15 = int_to_ptr.vmem [resolvable:$true] %s304_s15 }
  0x20   : > { %p43_p12 = scmp.ge.s32.totalorder %s41_s16, 2  ;;  %p57_p13 = scmp.ne.s32.totalorder %s6480_s29, %s6476_s28 }
  0x21   : > { %s302_s24 = sshll.u32 %s9685_s5, 4  ;;  %p58_p0 = scmp.eq.s32.totalorder %s6492_s10, 0  ;;  %s303_s24 = int_to_ptr.hbm [resolvable:$true] %s302_s24 }
  0x22   : > { %5720 = dma.hbm_to_vmem [thread:$0]  (!%p6615_p10), %s303_s24, 512, %s305_s15, [#allocation12], %s9611_s25, %s9611_s25, %s9613_s26  }
  0x23   : > { %p5742_p3 = scmp.lt.s32.totalorder %s6492_s10, 2  ;;  %s9967_s16 = smov (%p43_p12, %s41_s16), 0 }
  0x24   : > { %9686 = sst [smem:[#allocation24_spill]] %s9967_s16  ;;  %p59_p5 = por %p58_p0, %p57_p13 }
  0x25   : > { %p6643_p7 = por %p250_p2, %p57_p13  ;;  %s45_s20 = ssub.s32 %s6488_s9, %s9967_s16 }
  0x26   : > { %s9615_s22 = sand.u32 1, %s6480_s29   ;;  %p48_p9 = scmp.eq.s32.totalorder %s45_s20, 0 }
  0x27   : > { %s6652_s23 = sshll.u32 %s9615_s22, 7  ;;  %s6655_s24 = sshll.u32 %s6488_s9, 7 }
  0x28   : > { %p6657_p11 = pnand %p5742_p3, %p59_p5  ;;  %s358_s25 = sand.u32 1, %s6492_s10  }
  0x29   : > { %s6662_s15 = scalar_select %p48_p9, %s6480_s29, %s50_s19  }
  0x2a   : > { %s9690_s1 = sld [smem:[#allocation103_spill]]  ;;  %s362_s5 = scalar_lea.vmem [#allocation5], %s6652_s23 }
  0x2b   : > { %9689 = sst [smem:[#allocation25_spill]] %s6662_s15  ;;  %s371_s22 = sshll.u32 %s362_s5, 4  ;;  %s372_s22 = int_to_ptr.vmem [resolvable:$true] %s371_s22 }
  0x2c   : > { %s9691_s4 = sld [smem:[#allocation105_spill]]  ;;  %s6673_s19 = scalar_lea.sflag [#allocation6], %s358_s25 }
  0x2d   : > { %s9692_s15 = smov 8   ;;  %s9693_s10 = smov 128  }
  0x2e   : > { %s6498_s3 = smov [#allocation10]   ;;  %s6499_s9 = smov [#allocation13]  }
  0x2f   : > { %s290_s5 = sshll.u32 %s6498_s3, 4  ;;  %s318_s14 = sshll.u32 %s6499_s9, 4  ;;  %s291_s5 = int_to_ptr.vmem [resolvable:$true] %s290_s5  ;;  %s319_s14 = int_to_ptr.vmem [resolvable:$true] %s318_s14 }
  0x30   : > { %s368_s20 = scalar_lea.hbm %s9690_s1, %s6655_s24  ;;  %s316_s1 = sshll.u32 %s9608_s6, 4  ;;  %s317_s1 = int_to_ptr.hbm [resolvable:$true] %s316_s1 }
  0x31   : > { %s369_s16 = sshll.u32 %s368_s20, 4  ;;  %s9694_s0 = sld [smem:[#allocation102_spill]]  ;;  %s370_s16 = int_to_ptr.hbm [resolvable:$true] %s369_s16 }
  0x32   : > { %s288_s27 = sshll.u32 %s9691_s4, 4  ;;  %s339_s26 = scalar_lea.vmem [#allocation2], %s6652_s23  ;;  %s289_s27 = int_to_ptr.hbm [resolvable:$true] %s288_s27 }
  0x33   : > { %5730 = dma.hbm_to_vmem [thread:$0]  (!%p6657_p11), %s370_s16, 2048, %s372_s22, %s6673_s19, %s9693_s10, %s9693_s10, %s9692_s15  }
  0x34   : > { %5717 = dma.hbm_to_vmem [thread:$0]  (!%p6615_p10), %s289_s27, 512, %s291_s5, [#allocation9], %s9693_s10, %s9693_s10, %s9692_s15  }
  0x35   : > { %5723 = dma.hbm_to_vmem [thread:$0]  (!%p6615_p10), %s317_s1, 512, %s319_s14, [#allocation12], %s9693_s10, %s9693_s10, %s9692_s15  }
  0x36   : > { %s348_s20 = sshll.u32 %s339_s26, 4  ;;  %s9695_s27 = sand.u32 1, %s6480_s29   ;;  %s349_s20 = int_to_ptr.vmem [resolvable:$true] %s348_s20 }
  0x37   : > { %s345_s22 = scalar_lea.hbm %s9694_s0, %s6655_s24  ;;  %s336_s5 = scalar_lea.sflag [#allocation3], %s9695_s27 }
  0x38   : > { %s346_s3 = sshll.u32 %s345_s22, 4  ;;  %s391_s21 = scalar_lea.hbm %s9604_s2, %s6655_s24  ;;  %s347_s3 = int_to_ptr.hbm [resolvable:$true] %s346_s3 }
  0x39   : > { %5727 = dma.hbm_to_vmem [thread:$0]  (!%p6657_p11), %s347_s3, 2048, %s349_s20, %s336_s5, %s9693_s10, %s9693_s10, %s9692_s15  }
  0x3a   : > { %s392_s16 = sshll.u32 %s391_s21, 4  ;;  %s385_s0 = scalar_lea.vmem [#allocation7], %s6652_s23  ;;  %s393_s16 = int_to_ptr.hbm [resolvable:$true] %s392_s16 }
  0x3b   : > { %s394_s4 = sshll.u32 %s385_s0, 4  ;;  %406 = sbr.rel (%p6607_p8) target bundleno = 2275 (0x8e3), region = 52  ;;  %s395_s4 = int_to_ptr.vmem [resolvable:$true] %s394_s4 }
  0x3c   : > { %5733 = dma.hbm_to_vmem [thread:$0]  (!%p6657_p11), %s393_s16, 2048, %s395_s4, %s6673_s19, %s9693_s10, %s9693_s10, %s9692_s15  }
  0x40   : > { %s6720_s1 = sand.u32 1, %s6476_s28  }
  0x41   : > { %s6723_s24 = sshll.u32 %s6720_s1, 7  ;;  %s409_s0 = scalar_lea.sflag [#allocation3], %s6720_s1 }
  0x42   : > { %s6727_s23 = scalar_lea.vmem [#allocation2], %s6723_s24 }
  0x43   : > { %6451 = dma.done.wait (%p6594_p4), %s409_s0, 2048  }
  0x44   : > { %6453 = vsyncadd (%p6594_p4), %s409_s0, 4294965248  ;;  %s418_s4 = sand.u32 1, %s6585_s11   ;;  %s6735_s18 = scalar_lea.vmem [#allocation5], %s6723_s24 }
  0x45   : > { %s419_s10 = scalar_lea.sflag [#allocation6], %s418_s4 }
  0x46   : > { %6455 = dma.done.wait (%p6594_p4), %s419_s10, 4096  }
  0x47   : > { %6457 = vsyncadd (%p6594_p4), %s419_s10, 4294963200  ;;  %s6742_s12 = scalar_lea.vmem [#allocation7], %s6723_s24 }
  0x48   : > { %6459 = dma.done.wait (%p64_p1), [#allocation9], 1024  }
  0x49   : > { %6461 = vsyncadd (%p64_p1), [#allocation9], 4294966272 }
  0x4a   : > { %6463 = dma.done.wait (%p64_p1), [#allocation12], 1024  }
  0x4b   : > { %6465 = vsyncadd (%p64_p1), [#allocation12], 4294966272  ;;  %v6500_v0 = vmov 1983009808   ;;  %v6501_v2 = vmov 1934713408  }
  0x4c   : > { %v518_v1 = vunpack.c.l.s4 %v6500_v0  ;;  %v566_v3 = vunpack.c.l.s4 %v6501_v2  ;;  %v1220_v4 = vld [vmem:[#allocation8 + $0x18] sm:$0xff]  ;;  %v1219_v5 = vld [vmem:[#allocation8 + $0x10] sm:$0xff]  ;;  %v1218_v6 = vld [vmem:[#allocation8 + $0x8] sm:$0xff]  ;;  %vm513_vm0 = vcmask 1047556   ;;  %vm1221_vm1 = vcmask 261120   ;;  %s6502_s11 = smov 120  }
  0x4d   : > { %1282 = vmatpush.msra.mxu0 %v1220_v4  ;;  %5675 = vmatpush.msra.mxu1 %v1220_v4  ;;  %v496_v7 = vld [vmem:[%s6727_s23] sm:$0xff]  ;;  %v497_v8 = vld [vmem:[%s6727_s23 + $0x8] sm:$0xff]  ;;  %v498_v9 = vld [vmem:[%s6727_s23 + $0x10] sm:$0xff]  ;;  %s6503_s13 = smov 112   ;;  %vm1585_vm2 = vcmask 64512   ;;  %s6504_s15 = smov 104  }
  0x4e   : > { %5676 = vmatpush.msra.mxu2 %v1220_v4  ;;  %v499_v10 = vld [vmem:[%s6727_s23 + $0x18] sm:$0xff]  ;;  %v500_v11 = vld [vmem:[%s6727_s23 + $0x20] sm:$0xff]  ;;  %v515_v12 = vrot.slane %v496_v7, 4  ;;  %v6757_v13 = vunpack.c.0.s8 %v518_v1  ;;  %v527_v14 = vrot.slane %v497_v8, 4  ;;  %5677 = vmatpush.msra.mxu3 %v1220_v4  ;;  %v501_v15 = vld [vmem:[%s6727_s23 + $0x28] sm:$0xff]  ;;  %v512_v18 = vrot.slane %v498_v9, 4 }
  0x4f   : > { %1283 = vmatpush.msra.mxu0 %v1219_v5  ;;  %5678 = vmatpush.msra.mxu1 %v1219_v5  ;;  %v502_v16 = vld [vmem:[%s6727_s23 + $0x30] sm:$0xff]  ;;  %v503_v17 = vld [vmem:[%s6727_s23 + $0x38] sm:$0xff]  ;;  %v525_v19 = vrot.slane %v499_v10, 4  ;;  %v539_v20 = vrot.slane %v500_v11, 4  ;;  %v6762_v21 = vunpack.c.0.s8 %v566_v3  ;;  %v1217_v22 = vld [vmem:[#allocation8] sm:$0xff]  ;;  %v551_v25 = vrot.slane %v501_v15, 4 }
  0x50   : > { %9696 = vst [vmem:[#allocation26_spill] sm:$0xff] %v6757_v13  ;;  %5679 = vmatpush.msra.mxu2 %v1219_v5  ;;  %v537_v23 = vrot.slane %v502_v16, 4  ;;  %v549_v24 = vrot.slane %v503_v17, 4  ;;  %v516_v26 = vsel %vm513_vm0, %v498_v9, %v515_v12  ;;  %5680 = vmatpush.msra.mxu3 %v1219_v5  ;;  %v6766_v27 = vld [vmem:[%s6727_s23 + $0x50] sm:$0xff]  ;;  %v514_v28 = vsel %vm513_vm0, %v512_v18, %v496_v7  ;;  %v6774_v31 = vld [vmem:[%s6727_s23 + $0x58] sm:$0xff]  ;;  %v504_v53 = vld [vmem:[%s6727_s23 + $0x40] sm:$0xff] }
  0x51   : > { %9697 = vst [vmem:[#allocation27_spill] sm:$0xff] %v6762_v21  ;;  %1284 = vmatpush.msra.mxu0 %v1218_v6  ;;  %5681 = vmatpush.msra.mxu1 %v1218_v6  ;;  %v526_v29 = vsel %vm513_vm0, %v525_v19, %v497_v8  ;;  %v6771_v30 = vperm.slane %v516_v26, %v6757_v13  ;;  %v625_v32 = vrot.slane %v6766_v27, 4  ;;  %v637_v40 = vrot.slane %v6774_v31, 4  ;;  %v505_v54 = vld [vmem:[%s6727_s23 + $0x48] sm:$0xff]  ;;  %v510_v63 = vld [vmem:[%s6727_s23 + $0x70] sm:$0xff]  ;;  %v511_v0 = vld [vmem:[%s6727_s23 + $0x78] sm:$0xff] }
  0x52   : > { %5682 = vmatpush.msra.mxu2 %v1218_v6  ;;  %v520_v33 = vperm.slane %v514_v28, %v6757_v13  ;;  %v532_v34 = vperm.slane %v526_v29, %v6757_v13  ;;  %v538_v35 = vsel %vm513_vm0, %v537_v23, %v500_v11  ;;  %v550_v36 = vsel %vm513_vm0, %v549_v24, %v501_v15  ;;  %v509_v2 = vld [vmem:[%s6727_s23 + $0x68] sm:$0xff]  ;;  %v508_v9 = vld [vmem:[%s6727_s23 + $0x60] sm:$0xff]  ;;  %v1353_v18 = vld [vmem:[#allocation10 + $0x10] sm:$0xff]  ;;  %s6505_s19 = smov 8   ;;  %s6506_s14 = smov 16  }
  0x53   : > { %1285 = vmatpush.msra.mxu0 %v1217_v22  ;;  %5684 = vmatpush.msra.mxu1 %v1217_v22  ;;  %v544_v37 = vperm.slane %v538_v35, %v6757_v13  ;;  %v556_v38 = vperm.slane %v550_v36, %v6757_v13  ;;  %v528_v39 = vsel %vm513_vm0, %v499_v10, %v527_v14  ;;  %v639_v5 = vrot.slane %v505_v54, 4  ;;  %v1470_v24 = vld [vmem:[#allocation11 + $0x10] sm:$0xff]  ;;  %v1469_v36 = vld [vmem:[#allocation11 + $0x8] sm:$0xff]  ;;  %s6507_s22 = smov 24   ;;  %s9483_s20 = scalar_lea.vmem [#allocation14], %s6723_s24 }
  0x54   : > { %5685 = vmatpush.msra.mxu2 %v1217_v22  ;;  %v561_v41 = vrot.slane %v532_v34, 4  ;;  %v563_v42 = vrot.slane %v520_v33, 4  ;;  %v6786_v43 = vperm.slane %v528_v39, %v6757_v13  ;;  %v540_v44 = vsel %vm513_vm0, %v502_v16, %v539_v20  ;;  %5683 = vmatpush.msra.mxu3 %v1218_v6  ;;  %v1354_v16 = vld [vmem:[#allocation10 + $0x18] sm:$0xff]  ;;  %s5674_s27 = sshll.u32 %s6484_s30, 7  ;;  %s5211_s25 = sshll.u32 %s9483_s20, 4  ;;  %s5212_s25 = int_to_ptr.vmem [resolvable:$true] %s5211_s25 }
  0x55   : > { %v585_v45 = vrot.slane %v556_v38, 4  ;;  %v587_v46 = vrot.slane %v544_v37, 4  ;;  %v6790_v47 = vperm.slane %v540_v44, %v6757_v13  ;;  %v552_v48 = vsel %vm513_vm0, %v503_v17, %v551_v25  ;;  %v1471_v17 = vld [vmem:[#allocation11 + $0x18] sm:$0xff]  ;;  %1415 = vmatpush.msrb.mxu1 %v1354_v16  ;;  %s5210_s9 = scalar_lea.hbm %s9610_s8, %s5674_s27  ;;  %s5198_s16 = scalar_lea.sflag [#allocation4], %s6720_s1 }
  0x56   : > { %v562_v49 = vsel %vm513_vm0, %v561_v41, %v520_v33  ;;  %v564_v50 = vsel %vm513_vm0, %v532_v34, %v563_v42  ;;  %v6796_v51 = vperm.slane %v552_v48, %v6757_v13  ;;  %v573_v52 = vrot.slane %v6786_v43, 4  ;;  %5686 = vmatpush.msra.mxu3 %v1217_v22  ;;  %1532 = vmatpush.msrb.mxu2 %v1471_v17  ;;  %v1351_v41 = vld [vmem:[#allocation10] sm:$0xff]  ;;  %s5213_s21 = sshll.u32 %s5210_s9, 4  ;;  %s6418_s10 = scalar_lea.hbm %s9610_s8, 256  ;;  %s5214_s21 = int_to_ptr.hbm [resolvable:$true] %s5213_s21 }
  0x57   : > { %v6802_v55 = vperm.slane %v562_v49, %v6762_v21  ;;  %v586_v56 = vsel %vm513_vm0, %v585_v45, %v544_v37  ;;  %v6806_v57 = vperm.slane %v564_v50, %v6762_v21  ;;  %v588_v58 = vsel %vm513_vm0, %v556_v38, %v587_v46  ;;  %1416 = vmatpush.msrb.mxu1 %v1353_v18  ;;  %v1468_v46 = vld [vmem:[#allocation11] sm:$0xff]  ;;  %v6930_v18 = vld [vmem:[%s6735_s18 + $0x8] sm:$0xff]  ;;  %s6412_s24 = sshra.s32 %s5214_s21, 4  ;;  %s6413_s24 = int_to_ptr.hbm [resolvable:$true] %s6412_s24 }
  0x58   : > { %v6810_v59 = vperm.slane %v586_v56, %v6762_v21  ;;  %v6813_v60 = vperm.slane %v588_v58, %v6762_v21  ;;  %v574_v61 = vsel %vm513_vm0, %v573_v52, %v6771_v30  ;;  %v597_v62 = vrot.slane %v6796_v51, 4  ;;  %1533 = vmatpush.msrb.mxu2 %v1470_v24  ;;  %v6927_v17 = vld [vmem:[%s6735_s18] sm:$0xff]  ;;  %v6943_v24 = vld [vmem:[%s6742_s12 + $0x10] sm:$0xff]  ;;  %s6414_s0 = scalar_lea.hbm %s6413_s24, 128  ;;  %p6419_p8 = scmp.lt.s32.totalorder %s6413_s24, %s9610_s8 }
  0x59   : > { %v6821_v1 = vperm.slane %v574_v61, %v6762_v21  ;;  %v626_v3 = vsel %vm513_vm0, %v625_v32, %v504_v53  ;;  %v638_v4 = vsel %vm513_vm0, %v637_v40, %v505_v54  ;;  %v649_v14 = vrot.slane %v510_v63, 4  ;;  %v1352_v32 = vld [vmem:[#allocation10 + $0x8] sm:$0xff]  ;;  %9698 = vst [vmem:[#allocation28_spill] sm:$0xff] %v6943_v24  ;;  %p6415_p1 = scmp.ne.s32.totalorder %s6413_s24, %s6414_s0  ;;  %p6420_p10 = scmp.lt.s32.totalorder %s6418_s10, %s6414_s0 }
  0x5a   : > { %v609_v6 = vrot.slane %v6810_v59, 4  ;;  %v613_v7 = vrot.slane %v6813_v60, 4  ;;  %v598_v8 = vsel %vm513_vm0, %v597_v62, %v6790_v47  ;;  %v6832_v10 = vperm.slane %v626_v3, %v6757_v13  ;;  %1417 = vmatpush.msrb.mxu1 %v1352_v32  ;;  %1534 = vmatpush.msrb.mxu2 %v1469_v36 }
  0x5b   : > { %v6835_v11 = vperm.slane %v598_v8, %v6762_v21  ;;  %v6838_v12 = vperm.slane %v638_v4, %v6757_v13  ;;  %v661_v15 = vrot.slane %v511_v0, 4  ;;  %v663_v22 = vrot.slane %v509_v2, 4  ;;  %p6416_p2 = pnand %p6415_p1, %p6643_p7  ;;  %p6421_p11 = por %p6420_p10, %p6419_p8 }
  0x5c   : > { %v610_v19 = vsel %vm513_vm0, %v609_v6, %v6802_v55  ;;  %v614_v20 = vsel %vm513_vm0, %v613_v7, %v6806_v57  ;;  %v675_v23 = vrot.slane %v6832_v10, 4  ;;  %v650_v26 = vsel %vm513_vm0, %v649_v14, %v508_v9  ;;  %1418 = vmatpush.msrb.mxu1 %v1351_v41  ;;  %1535 = vmatpush.msrb.mxu2 %v1468_v46  ;;  %v6913_v6 = vld [vmem:[%s6735_s18 + $0x18] sm:$0xff]  ;;  %v6992_v46 = vld [vmem:[%s6742_s12 + $0x20] sm:$0xff] }
  0x5d   : > { %5410 = vmatmul.msk.f32.vlgmr.msra.gmra.mxu0 %vm1221_vm1, %v610_v19  ;;  %5414 = vmatmul.msk.f32.vlgmr.msra.gmra.mxu1 %vm1221_vm1, %v614_v20  ;;  %v617_v25 = vrot.slane %v6835_v11, 4  ;;  %v662_v28 = vsel %vm513_vm0, %v661_v15, %v509_v2  ;;  %v627_v29 = vrot.slane %v504_v53, 4  ;;  %v656_v33 = vperm.slane %v650_v26, %v6757_v13  ;;  %v6920_v15 = vld [vmem:[%s6735_s18 + $0x38] sm:$0xff]  ;;  %v6933_v19 = vld [vmem:[%s6735_s18 + $0x30] sm:$0xff]  ;;  %p6417_p4 = pneg %p6416_p2 }
  0x5e   : > { %v668_v34 = vperm.slane %v662_v28, %v6757_v13  ;;  %v640_v35 = vsel %vm513_vm0, %v6774_v31, %v639_v5  ;;  %v676_v38 = vsel %vm513_vm0, %v6838_v12, %v675_v23  ;;  %v651_v44 = vrot.slane %v508_v9, 4  ;;  %v6949_v26 = vld [vmem:[%s6742_s12 + $0x38] sm:$0xff] }
  0x5f   : > { %v618_v37 = vsel %vm513_vm0, %v617_v25, %v6821_v1  ;;  %v628_v39 = vsel %vm513_vm0, %v6766_v27, %v627_v29  ;;  %v6861_v40 = vperm.slane %v640_v35, %v6757_v13  ;;  %v699_v42 = vrot.slane %v656_v33, 4  ;;  %v6946_v25 = vld [vmem:[%s6742_s12 + $0x18] sm:$0xff]  ;;  %v6969_v35 = vld [vmem:[%s6742_s12 + $0x30] sm:$0xff]  ;;  %p6422_p12 = pnand %p6421_p11, %p6417_p4 }
  0x60   : > { %5418 = vmatmul.msk.f32.vlgmr.msra.gmra.mxu2 %vm1221_vm1, %v618_v37  ;;  %v6865_v31 = vperm.slane %v628_v39, %v6757_v13  ;;  %v664_v45 = vsel %vm513_vm0, %v511_v0, %v663_v22  ;;  %v575_v49 = vrot.slane %v6771_v30, 4  ;;  %v599_v50 = vrot.slane %v6790_v47, 4  ;;  %9699 = vst [vmem:[#allocation29_spill] sm:$0xff] %v6969_v35  ;;  %v6979_v39 = vld [vmem:[%s6742_s12 + $0x28] sm:$0xff] }
  0x61   : > { %v6869_v48 = vperm.slane %v664_v45, %v6757_v13  ;;  %v685_v27 = vrot.slane %v6861_v40, 4  ;;  %v6875_v52 = vperm.slane %v676_v38, %v6762_v21  ;;  %v700_v53 = vsel %vm513_vm0, %v668_v34, %v699_v42  ;;  %v6989_v45 = vld [vmem:[%s6742_s12 + $0x8] sm:$0xff] }
  0x62   : > { %v652_v54 = vsel %vm513_vm0, %v510_v63, %v651_v44  ;;  %v6880_v56 = vperm.slane %v700_v53, %v6762_v21  ;;  %v576_v61 = vsel %vm513_vm0, %v6786_v43, %v575_v49  ;;  %v600_v62 = vsel %vm513_vm0, %v6796_v51, %v599_v50  ;;  %v6903_v43 = vld [vmem:[%s6735_s18 + $0x10] sm:$0xff]  ;;  %v6986_v44 = vld [vmem:[%s6742_s12] sm:$0xff] }
  0x63   : > { %v6883_v58 = vperm.slane %v652_v54, %v6757_v13  ;;  %v686_v30 = vsel %vm513_vm0, %v685_v27, %v6865_v31  ;;  %v709_v47 = vrot.slane %v6869_v48, 4  ;;  %v615_v63 = vrot.slane %v6806_v57, 4 }
  0x64   : > { %v725_v0 = vrot.slane %v6880_v56, 4  ;;  %v6897_v3 = vperm.slane %v576_v61, %v6762_v21  ;;  %v6900_v4 = vperm.slane %v600_v62, %v6762_v21  ;;  %v6906_v51 = vperm.slane %v686_v30, %v6762_v21 }
  0x65   : > { %v710_v2 = vsel %vm513_vm0, %v709_v47, %v6883_v58  ;;  %v619_v5 = vrot.slane %v6821_v1, 4  ;;  %v673_v9 = vrot.slane %v6838_v12, 4  ;;  %v697_v14 = vrot.slane %v668_v34, 4  ;;  %v6966_v34 = vld [vmem:[%s6735_s18 + $0x28] sm:$0xff] }
  0x66   : > { %v6909_v57 = vperm.slane %v710_v2, %v6762_v21  ;;  %v726_v7 = vsel %vm513_vm0, %v725_v0, %v6875_v52  ;;  %v621_v8 = vrot.slane %v6900_v4, 4  ;;  %v616_v1 = vsel %vm513_vm0, %v6813_v60, %v615_v63 }
  0x67   : > { %5415 = vmatmul.msk.f32.gmra.mxu1 %vm1221_vm1, %v726_v7  ;;  %v753_v12 = vrot.slane %v6903_v43, 4  ;;  %v674_v22 = vsel %vm513_vm0, %v673_v9, %v6832_v10  ;;  %v698_v23 = vsel %vm513_vm0, %v697_v14, %v656_v33  ;;  %v765_v60 = vrot.slane %v6913_v6, 4  ;;  %v6963_v33 = vld [vmem:[%s6735_s18 + $0x20] sm:$0xff] }
  0x68   : > { %v729_v16 = vrot.slane %v6909_v57, 4  ;;  %v622_v20 = vsel %vm513_vm0, %v621_v8, %v6897_v3  ;;  %v620_v10 = vsel %vm513_vm0, %v6835_v11, %v619_v5  ;;  %v6957_v29 = vperm.slane %v674_v22, %v6762_v21 }
  0x69   : > { %5422 = vmatmul.msk.f32.vlgmr.msra.gmra.mxu3 %vm1221_vm1, %v622_v20  ;;  %v6960_v32 = vperm.slane %v698_v23, %v6762_v21  ;;  %v754_v36 = vsel %vm513_vm0, %v753_v12, %v6927_v17  ;;  %v766_v11 = vsel %vm513_vm0, %v765_v60, %v6930_v18  ;;  %v777_v37 = vrot.slane %v6933_v19, 4 }
  0x6a   : > { %v730_v28 = vsel %vm513_vm0, %v729_v16, %v6906_v51  ;;  %v789_v38 = vrot.slane %v6920_v15, 4  ;;  %v6983_v42 = vperm.slane %v766_v11, %v6757_v13  ;;  %v993_v27 = vrot.slane %v6943_v24, 4  ;;  %v7030_v16 = vld [vmem:[%s6735_s18 + $0x50] sm:$0xff] }
  0x6b   : > { %5419 = vmatmul.msk.f32.gmra.mxu2 %vm1221_vm1, %v730_v28  ;;  %v721_v41 = vrot.slane %v6960_v32, 4  ;;  %v1005_v49 = vrot.slane %v6946_v25, 4  ;;  %v778_v50 = vsel %vm513_vm0, %v777_v37, %v6963_v33  ;;  %v1017_v54 = vrot.slane %v6969_v35, 4  ;;  %9700 = vst [vmem:[#allocation30_spill] sm:$0xff] %v7030_v16 }
  0x6c   : > { %v790_v53 = vsel %vm513_vm0, %v789_v38, %v6966_v34  ;;  %v1029_v30 = vrot.slane %v6949_v26, 4  ;;  %v727_v47 = vrot.slane %v6875_v52, 4  ;;  %v7006_v62 = vperm.slane %v778_v50, %v6757_v13  ;;  %v7052_v38 = vld [vmem:[%s6735_s18 + $0x58] sm:$0xff] }
  0x6d   : > { %v722_v61 = vsel %vm513_vm0, %v721_v41, %v6957_v29  ;;  %v7009_v63 = vperm.slane %v790_v53, %v6757_v13  ;;  %v994_v0 = vsel %vm513_vm0, %v993_v27, %v6986_v44  ;;  %v1006_v2 = vsel %vm513_vm0, %v1005_v49, %v6989_v45  ;;  %9701 = vst [vmem:[#allocation31_spill] sm:$0xff] %v7052_v38  ;;  %v7068_v27 = vld [vmem:[%s6735_s18 + $0x70] sm:$0xff] }
  0x6e   : > { %5411 = vmatmul.msk.f32.gmra.mxu0 %vm1221_vm1, %v722_v61  ;;  %v1018_v52 = vsel %vm513_vm0, %v1017_v54, %v6992_v46  ;;  %v1030_v5 = vsel %vm513_vm0, %v1029_v30, %v6979_v39  ;;  %v7022_v7 = vperm.slane %v754_v36, %v6757_v13  ;;  %v801_v8 = vrot.slane %v6983_v42, 4  ;;  %9702 = vst [vmem:[#allocation32_spill] sm:$0xff] %v7068_v27  ;;  %v7081_v54 = vld [vmem:[%s6735_s18 + $0x48] sm:$0xff]  ;;  %v7092_v61 = vld [vmem:[%s6735_s18 + $0x60] sm:$0xff] }
  0x6f   : > { %5416 = vmatmul.msk.f32.gmra.mxu1 %vm1221_vm1, %v616_v1  ;;  %v825_v9 = vrot.slane %v7009_v63, 4  ;;  %v7027_v14 = vperm.slane %v1006_v2, %v6757_v13  ;;  %v7033_v12 = vperm.slane %v994_v0, %v6757_v13  ;;  %v7036_v20 = vperm.slane %v1018_v52, %v6757_v13  ;;  %v7096_v2 = vld [vmem:[%s6742_s12 + $0x50] sm:$0xff] }
  0x70   : > { %v7039_v1 = vperm.slane %v1030_v5, %v6757_v13  ;;  %v687_v22 = vrot.slane %v6865_v31, 4  ;;  %v731_v23 = vrot.slane %v6906_v51, 4  ;;  %v711_v36 = vrot.slane %v6883_v58, 4  ;;  %9704 = vst [vmem:[#allocation34_spill] sm:$0xff] %v7096_v2 }
  0x71   : > { %v826_v60 = vsel %vm513_vm0, %v825_v9, %v7006_v62  ;;  %v1041_v28 = vrot.slane %v7027_v14, 4  ;;  %v865_v31 = vrot.slane %v7030_v16, 4  ;;  %v728_v51 = vsel %vm513_vm0, %v6880_v56, %v727_v47  ;;  %v7161_v16 = vld [vmem:[%s6742_s12 + $0x68] sm:$0xff] }
  0x72   : > { %v1065_v11 = vrot.slane %v7039_v1, 4  ;;  %v688_v37 = vsel %vm513_vm0, %v6861_v40, %v687_v22  ;;  %v802_v58 = vsel %vm513_vm0, %v801_v8, %v7022_v7  ;;  %v712_v41 = vsel %vm513_vm0, %v6869_v48, %v711_v36  ;;  %v7065_v40 = vld [vmem:[%s6735_s18 + $0x40] sm:$0xff]  ;;  %v7084_v48 = vld [vmem:[%s6735_s18 + $0x78] sm:$0xff]  ;;  %v7103_v8 = vld [vmem:[%s6735_s18 + $0x68] sm:$0xff] }
  0x73   : > { %5420 = vmatmul.msk.f32.gmra.mxu2 %vm1221_vm1, %v620_v10  ;;  %v7060_v10 = vperm.slane %v826_v60, %v6762_v21  ;;  %v1042_v49 = vsel %vm513_vm0, %v1041_v28, %v7033_v12  ;;  %v7075_v50 = vperm.slane %v688_v37, %v6762_v21  ;;  %v7078_v53 = vperm.slane %v712_v41, %v6762_v21  ;;  %v7117_v36 = vld [vmem:[%s6742_s12 + $0x40] sm:$0xff] }
  0x74   : > { %v1066_v56 = vsel %vm513_vm0, %v1065_v11, %v7036_v20  ;;  %9703 = vst [vmem:[#allocation33_spill] sm:$0xff] %v7084_v48  ;;  %v732_v30 = vsel %vm513_vm0, %v6909_v57, %v731_v23  ;;  %v877_v0 = vrot.slane %v7052_v38, 4  ;;  %v7099_v52 = vperm.slane %v802_v58, %v6762_v21  ;;  %v7120_v11 = vld [vmem:[%s6742_s12 + $0x58] sm:$0xff]  ;;  %v7130_v58 = vld [vmem:[%s6742_s12 + $0x70] sm:$0xff] }
  0x75   : > { %v7089_v47 = vperm.slane %v1066_v56, %v6762_v21  ;;  %v733_v5 = vrot.slane %v7078_v53, 4  ;;  %v866_v57 = vsel %vm513_vm0, %v865_v31, %v7065_v40  ;;  %v889_v9 = vrot.slane %v7068_v27, 4  ;;  %9705 = vst [vmem:[#allocation35_spill] sm:$0xff] %v7120_v11  ;;  %v7155_v27 = vld [vmem:[%s6742_s12 + $0x60] sm:$0xff] }
  0x76   : > { %v849_v22 = vrot.slane %v7060_v10, 4  ;;  %v7111_v23 = vperm.slane %v1042_v49, %v6762_v21  ;;  %v878_v60 = vsel %vm513_vm0, %v877_v0, %v7081_v54  ;;  %v901_v28 = vrot.slane %v7084_v48, 4  ;;  %9706 = vst [vmem:[#allocation36_spill] sm:$0xff] %v7130_v58 }
  0x77   : > { %5417 = vmatmul.msk.f32.gmra.mxu1 %vm1221_vm1, %v728_v51  ;;  %v734_v37 = vsel %vm513_vm0, %v733_v5, %v7075_v50  ;;  %v7125_v31 = vperm.slane %v878_v60, %v6757_v13  ;;  %v890_v51 = vsel %vm513_vm0, %v889_v9, %v7092_v61  ;;  %v1105_v41 = vrot.slane %v7096_v2, 4  ;;  %v7144_v60 = vld [vmem:[%s6742_s12 + $0x48] sm:$0xff]  ;;  %v7147_v9 = vld [vmem:[%s6742_s12 + $0x78] sm:$0xff] }
  0x78   : > { %v1089_v49 = vrot.slane %v7089_v47, 4  ;;  %5423 = vmatmul.msk.f32.gmra.mxu3 %vm1221_vm1, %v734_v37  ;;  %v7136_v56 = vperm.slane %v866_v57, %v6757_v13  ;;  %v7139_v0 = vperm.slane %v890_v51, %v6757_v13  ;;  %v902_v5 = vsel %vm513_vm0, %v901_v28, %v7103_v8  ;;  %9707 = vst [vmem:[#allocation37_spill] sm:$0xff] %v7147_v9 }
  0x79   : > { %v7151_v2 = vperm.slane %v902_v5, %v6757_v13  ;;  %v913_v37 = vrot.slane %v7125_v31, 4  ;;  %v1106_v57 = vsel %vm513_vm0, %v1105_v41, %v7117_v36  ;;  %v1117_v51 = vrot.slane %v7120_v11, 4 }
  0x7a   : > { %v1129_v28 = vrot.slane %v7130_v58, 4  ;;  %v850_v38 = vsel %vm513_vm0, %v849_v22, %v7099_v52  ;;  %v1141_v48 = vrot.slane %v7147_v9, 4  ;;  %v7173_v41 = vperm.slane %v1106_v57, %v6757_v13 }
  0x7b   : > { %5421 = vmatmul.msk.f32.gmra.mxu2 %vm1221_vm1, %v732_v30  ;;  %v937_v30 = vrot.slane %v7151_v2, 4  ;;  %v1118_v5 = vsel %vm513_vm0, %v1117_v51, %v7144_v60  ;;  %v914_v24 = vsel %vm513_vm0, %v913_v37, %v7136_v56  ;;  %v1090_v22 = vsel %vm513_vm0, %v1089_v49, %v7111_v23 }
  0x7c   : > { %v7176_v11 = vperm.slane %v1118_v5, %v6757_v13  ;;  %v1130_v58 = vsel %vm513_vm0, %v1129_v28, %v7155_v27  ;;  %v1142_v9 = vsel %vm513_vm0, %v1141_v48, %v7161_v16  ;;  %v611_v37 = vrot.slane %v6802_v55, 4 }
  0x7d   : > { %v938_v51 = vsel %vm513_vm0, %v937_v30, %v7139_v0  ;;  %v7192_v5 = vperm.slane %v1130_v58, %v6757_v13  ;;  %v7195_v28 = vperm.slane %v1142_v9, %v6757_v13  ;;  %v920_v30 = vperm.slane %v914_v24, %v6762_v21 }
  0x7e   : > { %v7189_v57 = vperm.slane %v938_v51, %v6762_v21  ;;  %v1153_v49 = vrot.slane %v7176_v11, 4  ;;  %v612_v48 = vsel %vm513_vm0, %v6810_v59, %v611_v37  ;;  %v623_v55 = vrot.slane %v6897_v3, 4 }
  0x7f   : > { %5426 = vmatmul.msk.f32.vlgmr.msrb.gmra.mxu1 %vm1221_vm1, %v850_v38  ;;  %v1177_v58 = vrot.slane %v7195_v28, 4  ;;  %5412 = vmatmul.msk.f32.gmra.mxu0 %vm1221_vm1, %v612_v48  ;;  %v723_v48 = vrot.slane %v6957_v29, 4  ;;  %v1043_v29 = vrot.slane %v7033_v12, 4  ;;  %vm1866_vm3 = vcmask 130048  }
  0x80   : > { %v961_v38 = vrot.slane %v7189_v57, 4  ;;  %v1154_v51 = vsel %vm513_vm0, %v1153_v49, %v7173_v41  ;;  %v624_v9 = vsel %vm513_vm0, %v6900_v4, %v623_v55  ;;  %v735_v49 = vrot.slane %v7075_v50, 4 }
  0x81   : > { %v1178_v24 = vsel %vm513_vm0, %v1177_v58, %v7192_v5  ;;  %5424 = vmatmul.msk.f32.gmra.mxu3 %vm1221_vm1, %v624_v9  ;;  %v1160_v3 = vperm.slane %v1154_v51, %v6762_v21  ;;  %v827_v4 = vrot.slane %v7006_v62, 4  ;;  %v724_v55 = vsel %vm513_vm0, %v6960_v32, %v723_v48 }
  0x82   : > { %v962_v59 = vsel %vm513_vm0, %v961_v38, %v920_v30  ;;  %v1184_v37 = vperm.slane %v1178_v24, %v6762_v21  ;;  %v851_v51 = vrot.slane %v7099_v52, 4  ;;  %v736_v58 = vsel %vm513_vm0, %v7078_v53, %v735_v49 }
  0x83   : > { %5442 = vmatmul.msk.f32.vlgmr.msrb.gmra.mxu2 %vm1221_vm1, %v1090_v22  ;;  %v1067_v22 = vrot.slane %v7036_v20, 4  ;;  %v803_v50 = vrot.slane %v7022_v7, 4  ;;  %v1091_v62 = vrot.slane %v7111_v23, 4  ;;  %v828_v32 = vsel %vm513_vm0, %v7009_v63, %v827_v4 }
  0x84   : > { %v1201_v35 = vrot.slane %v1184_v37, 4  ;;  %v852_v20 = vsel %vm513_vm0, %v7060_v10, %v851_v51  ;;  %v7242_v53 = vperm.slane %v828_v32, %v6762_v21  ;;  %v1044_v12 = vsel %vm513_vm0, %v7027_v14, %v1043_v29 }
  0x85   : > { %v804_v7 = vsel %vm513_vm0, %v6983_v42, %v803_v50  ;;  %v939_v63 = vrot.slane %v7139_v0, 4  ;;  %v915_v10 = vrot.slane %v7136_v56, 4  ;;  %v867_v42 = vrot.slane %v7065_v40, 4 }
  0x86   : > { %v1202_v38 = vsel %vm513_vm0, %v1201_v35, %v1160_v3  ;;  %v1068_v35 = vsel %vm513_vm0, %v7039_v1, %v1067_v22  ;;  %v1092_v1 = vsel %vm513_vm0, %v7089_v47, %v1091_v62  ;;  %v879_v23 = vrot.slane %v7081_v54, 4 }
  0x87   : > { %5427 = vmatmul.msk.f32.gmra.mxu1 %vm1221_vm1, %v962_v59  ;;  %5413 = vmatmul.msk.f32.gmra.mxu0 %vm1221_vm1, %v724_v55  ;;  %v7247_v52 = vperm.slane %v1068_v35, %v6762_v21  ;;  %v963_v9 = vrot.slane %v920_v30, 4  ;;  %v1179_v24 = vrot.slane %v7192_v5, 4  ;;  %v891_v14 = vrot.slane %v7092_v61, 4  ;;  %v9716_v61 = vld [vmem:[#allocation35_spill] sm:$0xff] }
  0x88   : > { %v1203_v59 = vrot.slane %v1160_v3, 4  ;;  %v7259_v49 = vperm.slane %v804_v7, %v6762_v21  ;;  %v7262_v0 = vperm.slane %v1044_v12, %v6762_v21  ;;  %v853_v47 = vrot.slane %v7242_v53, 4  ;;  %v9708_v12 = vld [vmem:[#allocation29_spill] sm:$0xff] }
  0x89   : > { %5425 = vmatmul.msk.f32.gmra.mxu3 %vm1221_vm1, %v736_v58  ;;  %v1093_v56 = vrot.slane %v7247_v52, 4  ;;  %v940_v30 = vsel %vm513_vm0, %v7151_v2, %v939_v63  ;;  %v1155_v5 = vrot.slane %v7173_v41, 4  ;;  %v903_v48 = vrot.slane %v7103_v8, 4 }
  0x8a   : > { %v1107_v3 = vrot.slane %v7117_v36, 4  ;;  %v1119_v4 = vrot.slane %v7144_v60, 4  ;;  %v916_v22 = vsel %vm513_vm0, %v7125_v31, %v915_v10  ;;  %v1131_v55 = vrot.slane %v7155_v27, 4 }
  0x8b   : > { %5443 = vmatmul.msk.f32.gmra.mxu2 %vm1221_vm1, %v1202_v38  ;;  %v1143_v38 = vrot.slane %v7161_v16, 4  ;;  %v964_v51 = vsel %vm513_vm0, %v7189_v57, %v963_v9  ;;  %v1180_v2 = vsel %vm513_vm0, %v7195_v28, %v1179_v24  ;;  %v1204_v41 = vsel %vm513_vm0, %v1184_v37, %v1203_v59  ;;  %v9709_v9 = vld [vmem:[#allocation28_spill] sm:$0xff] }
  0x8c   : > { %v7283_v8 = vperm.slane %v940_v30, %v6762_v21  ;;  %v791_v58 = vrot.slane %v6966_v34, 4  ;;  %v1031_v50 = vrot.slane %v6979_v39, 4  ;;  %v854_v31 = vsel %vm513_vm0, %v853_v47, %v7259_v49 }
  0x8d   : > { %v1094_v16 = vsel %vm513_vm0, %v1093_v56, %v7262_v0  ;;  %v7292_v57 = vperm.slane %v916_v22, %v6762_v21  ;;  %v1156_v28 = vsel %vm513_vm0, %v7176_v11, %v1155_v5  ;;  %v7298_v37 = vperm.slane %v1180_v2, %v6762_v21 }
  0x8e   : > { %v767_v34 = vrot.slane %v6930_v18, 4  ;;  %v779_v39 = vrot.slane %v6963_v33, 4  ;;  %v792_v29 = vsel %vm513_vm0, %v6920_v15, %v791_v58  ;;  %v1007_v32 = vrot.slane %v6989_v45, 4  ;;  %v9710_v58 = vld [vmem:[#allocation33_spill] sm:$0xff] }
  0x8f   : > { %5428 = vmatmul.msk.f32.gmra.mxu1 %vm1221_vm1, %v852_v20  ;;  %v7305_v62 = vperm.slane %v792_v29, %v6757_v13  ;;  %v1019_v35 = vrot.slane %v6992_v46, 4  ;;  %v1032_v11 = vsel %vm513_vm0, %v6949_v26, %v1031_v50  ;;  %v965_v20 = vrot.slane %v7283_v8, 4  ;;  %v9711_v29 = vld [vmem:[#allocation37_spill] sm:$0xff] }
  0x90   : > { %v755_v7 = vrot.slane %v6927_v17, 4  ;;  %v768_v18 = vsel %vm513_vm0, %v6913_v6, %v767_v34  ;;  %v780_v15 = vsel %vm513_vm0, %v6933_v19, %v779_v39  ;;  %v995_v46 = vrot.slane %v6986_v44, 4 }
  0x91   : > { %v7319_v33 = vperm.slane %v768_v18, %v6757_v13  ;;  %v7322_v45 = vperm.slane %v780_v15, %v6757_v13  ;;  %v837_v26 = vrot.slane %v7305_v62, 4  ;;  %v1008_v6 = vsel %vm513_vm0, %v6946_v25, %v1007_v32 }
  0x92   : > { %v756_v17 = vsel %vm513_vm0, %v6903_v43, %v755_v7  ;;  %v1020_v19 = vsel %vm513_vm0, %v9708_v12, %v1019_v35  ;;  %v7333_v63 = vperm.slane %v1032_v11, %v6757_v13  ;;  %v996_v43 = vsel %vm513_vm0, %v9709_v9, %v995_v46  ;;  %v9712_v11 = vld [vmem:[#allocation31_spill] sm:$0xff]  ;;  %v9717_v12 = vld [vmem:[#allocation36_spill] sm:$0xff] }
  0x93   : > { %5444 = vmatmul.msk.f32.gmra.mxu2 %vm1221_vm1, %v1092_v1  ;;  %v7336_v1 = vperm.slane %v756_v17, %v6757_v13  ;;  %v813_v10 = vrot.slane %v7319_v33, 4  ;;  %v838_v44 = vsel %vm513_vm0, %v837_v26, %v7322_v45  ;;  %v7345_v25 = vperm.slane %v996_v43, %v6757_v13  ;;  %v9714_v26 = vld [vmem:[#allocation32_spill] sm:$0xff] }
  0x94   : > { %v844_v24 = vperm.slane %v838_v44, %v6762_v21  ;;  %v7348_v59 = vperm.slane %v1008_v6, %v6757_v13  ;;  %v7351_v47 = vperm.slane %v1020_v19, %v6757_v13  ;;  %v7354_v56 = vperm.slane %v1156_v28, %v6762_v21 }
  0x95   : > { %v1205_v30 = vrot.slane %v7298_v37, 4  ;;  %v814_v5 = vsel %vm513_vm0, %v813_v10, %v7336_v1  ;;  %v1077_v22 = vrot.slane %v7333_v63, 4  ;;  %v904_v50 = vsel %vm513_vm0, %v9710_v58, %v903_v48 }
  0x96   : > { %v857_v2 = vrot.slane %v844_v24, 4  ;;  %v966_v28 = vsel %vm513_vm0, %v965_v20, %v7292_v57  ;;  %v7370_v39 = vperm.slane %v904_v50, %v6757_v13  ;;  %v880_v20 = vsel %vm513_vm0, %v9712_v11, %v879_v23 }
  0x97   : > { %5429 = vmatmul.msk.f32.gmra.mxu1 %vm1221_vm1, %v964_v51  ;;  %v820_v51 = vperm.slane %v814_v5, %v6762_v21  ;;  %v1078_v34 = vsel %vm513_vm0, %v1077_v22, %v7351_v47  ;;  %v7391_v15 = vperm.slane %v880_v20, %v6757_v13  ;;  %v892_v54 = vsel %vm513_vm0, %v9714_v26, %v891_v14 }
  0x98   : > { %v1084_v48 = vperm.slane %v1078_v34, %v6762_v21  ;;  %v949_v17 = vrot.slane %v7370_v39, 4  ;;  %v1120_v14 = vsel %vm513_vm0, %v9716_v61, %v1119_v4  ;;  %v1132_v19 = vsel %vm513_vm0, %v9717_v12, %v1131_v55 }
  0x99   : > { %v7375_v32 = vsel %vm513_vm0, %v857_v2, %v820_v51  ;;  %v925_v40 = vrot.slane %v7391_v15, 4  ;;  %v7421_v36 = vperm.slane %v1120_v14, %v6757_v13  ;;  %v7427_v27 = vperm.slane %v1132_v19, %v6757_v13 }
  0x9a   : > { %v1097_v46 = vrot.slane %v1084_v48, 4  ;;  %v1206_v55 = vsel %vm513_vm0, %v1205_v30, %v7354_v56  ;;  %v855_v22 = vrot.slane %v7259_v49, 4  ;;  %v859_v30 = vrot.slane %v820_v51, 4 }
  0x9b   : > { %5445 = vmatmul.msk.f32.gmra.mxu2 %vm1221_vm1, %v1204_v41  ;;  %v1053_v41 = vrot.slane %v7348_v59, 4  ;;  %v1165_v5 = vrot.slane %v7421_v36, 4  ;;  %v1095_v34 = vrot.slane %v7262_v0, 4  ;;  %v967_v0 = vrot.slane %v7292_v57, 4 }
  0x9c   : > { %vm4819_vm4 = vcmask 195584  }
  0x9d   : > { %v1054_v35 = vsel %vm513_vm0, %v1053_v41, %v7345_v25  ;;  %v1096_v20 = vsel %vm513_vm0, %v7247_v52, %v1095_v34 }
  0x9e   : > { %v1060_v7 = vperm.slane %v1054_v35, %v6762_v21  ;;  %v860_v35 = vsel %vm513_vm0, %v844_v24, %v859_v30  ;;  %v968_v24 = vsel %vm513_vm0, %v7283_v8, %v967_v0 }
  0x9f   : > { %5430 = vmatmul.msk.f32.gmra.mxu1 %vm1221_vm1, %v854_v31  ;;  %v1144_v31 = vsel %vm513_vm0, %v9711_v29, %v1143_v38  ;;  %v9713_v38 = vld [vmem:[#allocation30_spill] sm:$0xff] }
  0xa0   : > { %v868_v18 = vsel %vm513_vm0, %v9713_v38, %v867_v42  ;;  %v9715_v42 = vld [vmem:[#allocation34_spill] sm:$0xff]  ;;  %v1098_v10 = vsel %vm513_vm0, %v1097_v46, %v1060_v7  ;;  %v7430_v4 = vperm.slane %v1144_v31, %v6757_v13  ;;  %v856_v31 = vsel %vm513_vm0, %v7242_v53, %v855_v22 }
  0xa1   : > { %v7398_v23 = vperm.slane %v868_v18, %v6757_v13  ;;  %v1108_v6 = vsel %vm513_vm0, %v9715_v42, %v1107_v3  ;;  %v1099_v51 = vrot.slane %v1060_v7, 4  ;;  %v1207_v53 = vrot.slane %v7354_v56, 4 }
  0xa2   : > { %v7418_v9 = vperm.slane %v1108_v6, %v6757_v13  ;;  %v1189_v41 = vrot.slane %v7430_v4, 4  ;;  %v839_v46 = vrot.slane %v7322_v45, 4 }
  0xa3   : > { %5446 = vmatmul.msk.f32.gmra.mxu2 %vm1221_vm1, %v1094_v16  ;;  %v900_v16 = vperm.slane %v892_v54, %v6757_v13  ;;  %v926_v60 = vsel %vm513_vm0, %v925_v40, %v7398_v23  ;;  %v1100_v18 = vsel %vm513_vm0, %v1084_v48, %v1099_v51  ;;  %v1208_v52 = vsel %vm513_vm0, %v7298_v37, %v1207_v53 }
  0xa4   : > { %v932_v43 = vperm.slane %v926_v60, %v6762_v21  ;;  %v1166_v58 = vsel %vm513_vm0, %v1165_v5, %v7418_v9  ;;  %v815_v48 = vrot.slane %v7336_v1, 4  ;;  %v840_v8 = vsel %vm513_vm0, %v7305_v62, %v839_v46 }
  0xa5   : > { %v950_v44 = vsel %vm513_vm0, %v949_v17, %v900_v16  ;;  %v1172_v29 = vperm.slane %v1166_v58, %v6762_v21  ;;  %v848_v40 = vperm.slane %v840_v8, %v6762_v21  ;;  %v951_v1 = vrot.slane %v900_v16, 4 }
  0xa6   : > { %v956_v3 = vperm.slane %v950_v44, %v6762_v21  ;;  %v971_v26 = vrot.slane %v932_v43, 4  ;;  %v816_v56 = vsel %vm513_vm0, %v7319_v33, %v815_v48  ;;  %v927_v45 = vrot.slane %v7398_v23, 4 }
  0xa7   : > { %5431 = vmatmul.msk.f32.gmra.mxu1 %vm1221_vm1, %v966_v28  ;;  %v1190_v28 = vsel %vm513_vm0, %v1189_v41, %v7427_v27  ;;  %v1211_v7 = vrot.slane %v1172_v29, 4  ;;  %v824_v17 = vperm.slane %v816_v56, %v6762_v21  ;;  %v861_v37 = vrot.slane %v848_v40, 4 }
  0xa8   : > { %v969_v2 = vrot.slane %v956_v3, 4  ;;  %v1196_v49 = vperm.slane %v1190_v28, %v6762_v21  ;;  %v972_v54 = vsel %vm513_vm0, %v956_v3, %v971_v26  ;;  %v952_v33 = vsel %vm513_vm0, %v7370_v39, %v951_v1 }
  0xa9   : > { %v862_v42 = vsel %vm513_vm0, %v861_v37, %v824_v17  ;;  %v960_v62 = vperm.slane %v952_v33, %v6762_v21  ;;  %v928_v6 = vsel %vm513_vm0, %v7391_v15, %v927_v45  ;;  %v1079_v16 = vrot.slane %v7351_v47, 4 }
  0xaa   : > { %v970_v50 = vsel %vm513_vm0, %v969_v2, %v932_v43  ;;  %v1209_v11 = vrot.slane %v1196_v49, 4  ;;  %v1212_v57 = vsel %vm513_vm0, %v1196_v49, %v1211_v7  ;;  %v863_v23 = vrot.slane %v824_v17, 4 }
  0xab   : > { %5447 = vmatmul.msk.f32.gmra.mxu2 %vm1221_vm1, %v1206_v55  ;;  %v973_v61 = vrot.slane %v960_v62, 4  ;;  %v1055_v39 = vrot.slane %v7345_v25, 4  ;;  %v1080_v12 = vsel %vm513_vm0, %v7333_v63, %v1079_v16  ;;  %v1191_v63 = vrot.slane %v7427_v27, 4 }
  0xac   : > { %v1210_v38 = vsel %vm513_vm0, %v1209_v11, %v1172_v29  ;;  %v864_v15 = vsel %vm513_vm0, %v848_v40, %v863_v23  ;;  %v7496_v19 = vperm.slane %v1080_v12, %v6762_v21  ;;  %v1167_v55 = vrot.slane %v7418_v9, 4 }
  0xae   : > { %v1101_v44 = vrot.slane %v7496_v19, 4  ;;  %v1168_v27 = vsel %vm513_vm0, %v7421_v36, %v1167_v55 }
  0xaf   : > { %5432 = vmatmul.msk.f32.gmra.mxu1 %vm1221_vm1, %v856_v31  ;;  %v7524_v58 = vperm.slane %v1168_v27, %v6762_v21 }
  0xb3   : > { %5448 = vmatmul.msk.f32.gmra.mxu2 %vm1221_vm1, %v1096_v20 }
  0xb7   : > { %5433 = vmatmul.msk.f32.gmra.mxu1 %vm1221_vm1, %v968_v24 }
  0xbb   : > { %5449 = vmatmul.msk.f32.gmra.mxu2 %vm1221_vm1, %v1208_v52 }
  0xbf   : > { %5434 = vmatmul.msk.f32.gmra.mxu1 %vm1221_vm1, %v7375_v32  ;;  %v936_v32 = vperm.slane %v928_v6, %v6762_v21 }
  0xc1   : > { %v974_v14 = vsel %vm513_vm0, %v973_v61, %v936_v32  ;;  %v975_v60 = vrot.slane %v936_v32, 4  ;;  %v1215_v61 = vrot.slane %v7524_v58, 4 }
  0xc3   : > { %5450 = vmatmul.msk.f32.gmra.mxu2 %vm1221_vm1, %v1098_v10  ;;  %v1056_v10 = vsel %vm513_vm0, %v7348_v59, %v1055_v39  ;;  %v976_v3 = vsel %vm513_vm0, %v960_v62, %v975_v60  ;;  %v1192_v59 = vsel %vm513_vm0, %v7430_v4, %v1191_v63 }
  0xc4   : > { %v7502_v47 = vperm.slane %v1056_v10, %v6762_v21  ;;  %v7514_v22 = vperm.slane %v1192_v59, %v6762_v21 }
  0xc6   : > { %v1102_v25 = vsel %vm513_vm0, %v1101_v44, %v7502_v47  ;;  %v1213_v9 = vrot.slane %v7514_v22, 4  ;;  %v1103_v37 = vrot.slane %v7502_v47, 4 }
  0xc7   : > { %5435 = vmatmul.msk.f32.gmra.mxu1 %vm1221_vm1, %v970_v50 }
  0xc8   : > { %v1214_v4 = vsel %vm513_vm0, %v1213_v9, %v7524_v58 }
  0xcb   : > { %5451 = vmatmul.msk.f32.gmra.mxu2 %vm1221_vm1, %v1210_v38 }
  0xcf   : > { %5436 = vmatmul.msk.f32.gmra.mxu1 %vm1221_vm1, %v860_v35 }
  0xd3   : > { %5452 = vmatmul.msk.f32.gmra.mxu2 %vm1221_vm1, %v1100_v18 }
  0xd7   : > { %5437 = vmatmul.msk.f32.gmra.mxu1 %vm1221_vm1, %v972_v54 }
  0xda   : > { %v1287_v43 = vpop.f32.mrf.mxu0  ;;  %v1299_v5 = vpop.f32.mrf.mxu1 }
  0xdb   : > { %5453 = vmatmul.msk.f32.gmra.mxu2 %vm1221_vm1, %v1212_v57  ;;  %v7517_v2 = vmul.f32 0.35355338, %v1287_v43  ;;  %v7519_v41 = vmul.f32 0.35355338, %v1299_v5 }
  0xdd   : > { %2353 = vrot.lane.b32.xlu1 %v7519_v41, %s6502_s11  ;;  %2275 = vrot.lane.b32.xlu0 %v7517_v2, %s6502_s11 }
  0xdf   : > { %5438 = vmatmul.msk.f32.gmra.mxu1 %vm1221_vm1, %v862_v42  ;;  %v1104_v42 = vsel %vm513_vm0, %v7496_v19, %v1103_v37 }
  0xe3   : > { %5454 = vmatmul.msk.f32.gmra.mxu2 %vm1221_vm1, %v1102_v25  ;;  %v1311_v36 = vpop.f32.mrf.mxu2 }
  0xe4   : > { %v1302_v50 = vpop.f32.mrf.mxu1  ;;  %v7540_v28 = vmul.f32 0.35355338, %v1311_v36 }
  0xe5   : > { %3137 = vrot.lane.b32.xlu1 %v7519_v41, %s6503_s13  ;;  %3059 = vrot.lane.b32.xlu0 %v7517_v2, %s6503_s13  ;;  %v7552_v31 = vmul.f32 0.35355338, %v1302_v50 }
  0xe7   : > { %5439 = vmatmul.msk.f32.gmra.mxu1 %vm1221_vm1, %v974_v14  ;;  %v1216_v14 = vsel %vm513_vm0, %v7514_v22, %v1215_v61 }
  0xeb   : > { %5455 = vmatmul.msk.f32.gmra.mxu2 %vm1221_vm1, %v1214_v4  ;;  %v1290_v20 = vpop.f32.mrf.mxu0 }
  0xec   : > { %v1305_v30 = vpop.f32.mrf.mxu1  ;;  %v1323_v34 = vpop.f32.mrf.mxu3  ;;  %v7563_v38 = vmul.f32 0.35355338, %v1290_v20 }
  0xed   : > { %2431 = vrot.lane.b32.xlu0 %v7540_v28, %s6502_s11  ;;  %v7545_v49 = vmul.f32 0.35355338, %v1323_v34  ;;  %v7579_v24 = vmul.f32 0.35355338, %v1305_v30 }
  0xee   : > { %v1314_v29 = vpop.f32.mrf.mxu2 }
  0xef   : > { %3293 = vrot.lane.b32.xlu2 %v7545_v49, %s6503_s13  ;;  %5440 = vmatmul.msk.f32.gmra.mxu1 %vm1221_vm1, %v864_v15  ;;  %v7565_v51 = vmul.f32 0.35355338, %v1314_v29  ;;  %9718 = vst [vmem:[#allocation29_spill] sm:$0xff] %v7579_v24 }
  0xf0   : > { %2509 = vrot.lane.b32.xlu1 %v7545_v49, %s6502_s11 }
  0xf3   : > { %5456 = vmatmul.msk.f32.gmra.mxu2 %vm1221_vm1, %v1104_v42 }
  0xf4   : > { %v7554_v35 = vpop.f32.mrf.mxu1 }
  0xf5   : > { %3215 = vrot.lane.b32.xlu0 %v7540_v28, %s6503_s13  ;;  %v7652_v23 = vmul.f32 0.35355338, %v7554_v35 }
  0xf6   : > { %v1317_v11 = vpop.f32.mrf.mxu2 }
  0xf7   : > { %5441 = vmatmul.msk.f32.gmra.mxu1 %vm1221_vm1, %v976_v3  ;;  %3139 = vrot.lane.b32.xlu2 %v7552_v31, %s6503_s13  ;;  %v7593_v57 = vmul.f32 0.35355338, %v1317_v11 }
  0xf8   : > { %2355 = vrot.lane.b32.xlu1 %v7552_v31, %s6502_s11 }
  0xf9   : > { %9719 = vst [vmem:[#allocation28_spill] sm:$0xff] %v7593_v57 }
  0xfb   : > { %v1326_v26 = vpop.f32.mrf.mxu3  ;;  %5457 = vmatmul.msk.f32.gmra.mxu2 %vm1221_vm1, %v1216_v14 }
  0xfc   : > { %v7567_v0 = vpop.f32.mrf.mxu1  ;;  %v7577_v53 = vmul.f32 0.35355338, %v1326_v26  ;;  %v1293_v7 = vpop.f32.mrf.mxu0 }
  0xfd   : > { %2277 = vrot.lane.b32.xlu0 %v7563_v38, %s6502_s11  ;;  %v7595_v48 = vmul.f32 0.35355338, %v1293_v7 }
  0xfe   : > { %v7571_v18 = vpop.f32.mrf.mxu2 }
  0xff   : > { %3217 = vrot.lane.b32.xlu2 %v7565_v51, %s6503_s13  ;;  %v7682_v10 = vmul.f32 0.35355338, %v7571_v18 }
 0x100   : > { %3061 = vrot.lane.b32.xlu1 %v7563_v38, %s6503_s13 }
 0x101   : > { %9720 = vst [vmem:[#allocation33_spill] sm:$0xff] %v7682_v10 }
 0x104   : > { %v7581_v54 = vpop.f32.mrf.mxu1  ;;  %v1329_v8 = vpop.f32.mrf.mxu3 }
 0x105   : > { %2433 = vrot.lane.b32.xlu0 %v7565_v51, %s6502_s11  ;;  %5458 = vmatpush.xpose.msk.msrb.mxu3 %vm1585_vm2, %v7581_v54  ;;  %v7629_v33 = vmul.f32 0.35355338, %v1329_v8  ;;  %v1296_v32 = vpop.f32.mrf.mxu0 }
 0x106   : > { %v1537_v52 = vpop.f32.mrf.mxu2  ;;  %v7647_v16 = vmul.f32 0.35355338, %v1296_v32 }
 0x107   : > { %3295 = vrot.lane.b32.xlu2 %v7577_v53, %s6503_s13 }
 0x108   : > { %2392 = vrot.lane.b32.xlu1 %v7579_v24, %s6502_s11 }
 0x109   : > { %5459 = vmatpush.xpose.msk.msrb.mxu3 %vm1585_vm2, %v7567_v0 }
 0x10c   : > { %v7597_v46 = vpop.f32.mrf.mxu1  ;;  %5460 = vmatmul.msk.f32.vlgmr.msrb.gmra.mxu3 %vm1585_vm2, %v7517_v2  ;;  %v1332_v1 = vpop.f32.mrf.mxu3 }
 0x10d   : > { %2511 = vrot.lane.b32.xlu0 %v7577_v53, %s6502_s11  ;;  %v7627_v45 = vmul.f32 0.35355338, %v1332_v1 }
 0x10e   : > { %v1540_v56 = vpop.f32.mrf.mxu2 }
 0x10f   : > { %2047 = vmatpush.msrb.mxu0 %v1540_v56  ;;  %2470 = vrot.lane.b32.xlu2 %v7593_v57, %s6502_s11  ;;  %v7687_v47 = vpack.i.bf16 %v1537_v52, %v1540_v56 }
 0x110   : > { %3098 = vrot.lane.b32.xlu1 %v7595_v48, %s6503_s13 }
 0x111   : > { %2048 = vmatpush.msrb.mxu0 %v1537_v52 }
 0x114   : > { %v7607_v17 = vpop.f32.mrf.mxu1  ;;  %5461 = vmatmul.msk.f32.gmra.mxu3 %vm1585_vm2, %v7563_v38 }
 0x115   : > { %2314 = vrot.lane.b32.xlu0 %v7595_v48, %s6502_s11  ;;  %5462 = vmatpush.xpose.msk.msra.mxu3 %vm1585_vm2, %v7607_v17 }
 0x116   : > { %v7613_v40 = vpop.f32.mrf.mxu2 }
 0x117   : > { %2279 = vrot.lane.b32.xlu2 %v7567_v0, %s6502_s11 }
 0x118   : > { %3176 = vrot.lane.b32.xlu1 %v7579_v24, %s6503_s13 }
 0x119   : > { %5463 = vmatpush.xpose.msk.msra.mxu3 %vm1585_vm2, %v7597_v46 }
 0x11c   : > { %v7631_v62 = vpop.f32.mrf.mxu1  ;;  %5464 = vmatmul.msk.f32.vlgmr.msra.gmra.mxu3 %vm1585_vm2, %v7595_v48 }
 0x11d   : > { %3254 = vrot.lane.b32.xlu0 %v7593_v57, %s6503_s13 }
 0x11e   : > { %v7637_v6 = vpop.f32.mrf.mxu2 }
 0x11f   : > { %2076 = vmatpush.msra.mxu1 %v7637_v6  ;;  %2550 = vrot.lane.b32.xlu2 %v7627_v45, %s6502_s11 }
 0x120   : > { %2548 = vrot.lane.b32.xlu1 %v7629_v33, %s6502_s11 }
 0x121   : > { %2077 = vmatpush.msra.mxu1 %v7613_v40 }
 0x124   : > { %v7654_v39 = vpop.f32.mrf.mxu1  ;;  %5465 = vmatmul.msk.f32.gmra.mxu3 %vm1585_vm2, %v7647_v16 }
 0x125   : > { %3332 = vrot.lane.b32.xlu0 %v7629_v33, %s6503_s13  ;;  %5466 = vmatpush.xpose.msk.msrb.mxu3 %vm1585_vm2, %v7654_v39 }
 0x126   : > { %v7660_v12 = vpop.f32.mrf.mxu2 }
 0x127   : > { %3063 = vrot.lane.b32.xlu2 %v7567_v0, %s6503_s13 }
 0x128   : > { %2394 = vrot.lane.b32.xlu1 %v7652_v23, %s6502_s11 }
 0x129   : > { %5467 = vmatpush.xpose.msk.msrb.mxu3 %vm1585_vm2, %v7631_v62 }
 0x12c   : > { %v7670_v15 = vpop.f32.mrf.mxu1  ;;  %5468 = vmatmul.msk.f32.vlgmr.msrb.gmra.mxu3 %vm1585_vm2, %v7519_v41 }
 0x12d   : > { %2316 = vrot.lane.b32.xlu0 %v7647_v16, %s6502_s11 }
 0x12e   : > { %v7676_v19 = vpop.f32.mrf.mxu2 }
 0x12f   : > { %2105 = vmatpush.msra.mxu2 %v7676_v19  ;;  %3065 = vrot.lane.b32.xlu2 %v7581_v54, %s6503_s13  ;;  %v5816_v3 = vpack.i.bf16 %v7637_v6, %v7676_v19 }
 0x130   : > { %3100 = vrot.lane.b32.xlu1 %v7647_v16, %s6503_s13 }
 0x131   : > { %2106 = vmatpush.msra.mxu2 %v7660_v12 }
 0x134   : > { %v7689_v44 = vpop.f32.mrf.mxu1  ;;  %5469 = vmatmul.msk.f32.gmra.mxu3 %vm1585_vm2, %v7552_v31 }
 0x135   : > { %2472 = vrot.lane.b32.xlu0 %v7682_v10, %s6502_s11  ;;  %5470 = vmatpush.xpose.msk.msra.mxu3 %vm1585_vm2, %v7689_v44 }
 0x136   : > { %v7695_v25 = vpop.f32.mrf.mxu2 }
 0x137   : > { %5812 = vrot.lane.b32.xlu2 %v7687_v47, %s6502_s11 }
 0x138   : > { %3178 = vrot.lane.b32.xlu1 %v7652_v23, %s6503_s13 }
 0x139   : > { %5471 = vmatpush.xpose.msk.msra.mxu3 %vm1585_vm2, %v7670_v15 }
 0x13c   : > { %v7705_v60 = vpop.f32.mrf.mxu1  ;;  %5472 = vmatmul.msk.f32.vlgmr.msra.gmra.mxu3 %vm1585_vm2, %v7579_v24 }
 0x13d   : > { %9721 = vst [vmem:[#allocation37_spill] sm:$0xff] %v7705_v60  ;;  %2318 = vrot.lane.b32.xlu0 %v7597_v46, %s6502_s11 }
 0x13e   : > { %v7711_v63 = vpop.f32.mrf.mxu2 }
 0x13f   : > { %9722 = vst [vmem:[#allocation31_spill] sm:$0xff] %v7711_v63  ;;  %3102 = vrot.lane.b32.xlu2 %v7597_v46, %s6503_s13 }
 0x140   : > { %3256 = vrot.lane.b32.xlu1 %v7682_v10, %s6503_s13 }
 0x144   : > { %v7719_v55 = vpop.f32.mrf.mxu1  ;;  %5473 = vmatmul.msk.f32.gmra.mxu3 %vm1585_vm2, %v7652_v23 }
 0x145   : > { %2320 = vrot.lane.b32.xlu0 %v7607_v17, %s6502_s11  ;;  %5474 = vmatpush.xpose.msk.msrb.mxu3 %vm1585_vm2, %v7719_v55 }
 0x146   : > { %v7725_v59 = vpop.f32.mrf.mxu2 }
 0x147   : > { %9723 = vst [vmem:[#allocation30_spill] sm:$0xff] %v7725_v59  ;;  %5817 = vrot.lane.b32.xlu2 %v5816_v3, %s6502_s11  ;;  %v5821_v20 = vpack.i.bf16 %v7725_v59, %v7613_v40 }
 0x148   : > { %3334 = vrot.lane.b32.xlu1 %v7627_v45, %s6503_s13 }
 0x149   : > { %5475 = vmatpush.xpose.msk.msrb.mxu3 %vm1585_vm2, %v7705_v60  ;;  %v7787_v35 = vpop.permute.xlu2 %3293 }
 0x14a   : > { %9729 = vst [vmem:[#allocation39_spill] sm:$0xff] %v7787_v35 }
 0x14c   : > { %v7734_v43 = vpop.f32.mrf.mxu1  ;;  %5476 = vmatmul.msk.f32.vlgmr.msrb.gmra.mxu3 %vm1585_vm2, %v7540_v28 }
 0x14d   : > { %3104 = vrot.lane.b32.xlu0 %v7607_v17, %s6503_s13 }
 0x14e   : > { %v7740_v5 = vpop.f32.mrf.mxu2 }
 0x14f   : > { %9724 = vst [vmem:[#allocation32_spill] sm:$0xff] %v7740_v5  ;;  %v7742_v22 = vpop.permute.xlu1 %2353  ;;  %v7744_v27 = vpop.permute.xlu0 %2275  ;;  %2163 = vmatpush.msra.mxu0 %v7740_v5 }
 0x150   : > { %9725 = vst [vmem:[#allocation34_spill] sm:$0xff] %v7742_v22  ;;  %2281 = vrot.lane.b32.xlu1 %v7581_v54, %s6502_s11 }
 0x151   : > { %2164 = vmatpush.msra.mxu0 %v7725_v59  ;;  %v7812_v56 = vpop.permute.xlu2 %3139 }
 0x152   : > { %9733 = vst [vmem:[#allocation43_spill] sm:$0xff] %v7812_v56 }
 0x154   : > { %v7750_v58 = vpop.f32.mrf.mxu1  ;;  %5477 = vmatmul.msk.f32.gmra.mxu3 %vm1585_vm2, %v7565_v51 }
 0x155   : > { %9726 = vst [vmem:[#allocation35_spill] sm:$0xff] %v7750_v58  ;;  %3143 = vrot.lane.b32.xlu0 %v7654_v39, %s6503_s13  ;;  %2476 = vrot.lane.b32.xlu2 %v7750_v58, %s6502_s11 }
 0x156   : > { %v7756_v9 = vpop.f32.mrf.mxu2  ;;  %5478 = vmatpush.xpose.msk.msra.mxu3 %vm1585_vm2, %v7750_v58 }
 0x157   : > { %v7762_v4 = vpop.permute.xlu0 %3059  ;;  %v7766_v36 = vpop.permute.xlu1 %3137 }
 0x158   : > { %9727 = vst [vmem:[#allocation36_spill] sm:$0xff] %v7762_v4  ;;  %2357 = vrot.lane.b32.xlu1 %v7631_v62, %s6502_s11 }
 0x159   : > { %9728 = vst [vmem:[#allocation38_spill] sm:$0xff] %v7766_v36  ;;  %v7832_v32 = vpop.permute.xlu2 %3217 }
 0x15a   : > { %5479 = vmatpush.xpose.msk.msra.mxu3 %vm1585_vm2, %v7734_v43  ;;  %9737 = vst [vmem:[#allocation47_spill] sm:$0xff] %v7832_v32 }
 0x15c   : > { %v7770_v50 = vpop.f32.mrf.mxu1 }
 0x15d   : > { %5480 = vmatmul.msk.f32.vlgmr.msra.gmra.mxu3 %vm1585_vm2, %v7593_v57  ;;  %2396 = vrot.lane.b32.xlu0 %v7670_v15, %s6502_s11 }
 0x15e   : > { %v7776_v30 = vpop.f32.mrf.mxu2 }
 0x15f   : > { %v5831_v34 = vpack.i.bf16 %v7776_v30, %v7695_v25  ;;  %v7780_v29 = vpop.permute.xlu0 %2431  ;;  %2192 = vmatpush.msrb.mxu1 %v7776_v30 }
 0x160   : > { %3141 = vrot.lane.b32.xlu1 %v7631_v62, %s6503_s13 }
 0x161   : > { %5832 = vrot.lane.b32.xlu2 %v5831_v34, %s6502_s11  ;;  %2193 = vmatpush.msrb.mxu1 %v7756_v9  ;;  %v7858_v34 = vpop.permute.xlu2 %3295 }
 0x162   : > { %v7789_v11 = vpop.permute.xlu1 %2509  ;;  %9739 = vst [vmem:[#allocation49_spill] sm:$0xff] %v7858_v34 }
 0x163   : > { %9730 = vst [vmem:[#allocation40_spill] sm:$0xff] %v7789_v11  ;;  %v5826_v11 = vpack.i.bf16 %v7740_v5, %v7660_v12 }
 0x164   : > { %v7793_v18 = vpop.f32.mrf.mxu1 }
 0x165   : > { %5481 = vmatmul.msk.f32.gmra.mxu3 %vm1585_vm2, %v7682_v10  ;;  %5822 = vrot.lane.b32.xlu0 %v5821_v20, %s6502_s11 }
 0x166   : > { %5482 = vmatpush.xpose.msk.msrb.mxu3 %vm1585_vm2, %v7793_v18  ;;  %v7800_v26 = vpop.f32.mrf.mxu2 }
 0x167   : > { %v7802_v52 = vpop.permute.xlu0 %3215 }
 0x168   : > { %9731 = vst [vmem:[#allocation41_spill] sm:$0xff] %v7802_v52  ;;  %2359 = vrot.lane.b32.xlu1 %v7654_v39, %s6502_s11 }
 0x169   : > { %3297 = vrot.lane.b32.xlu2 %v7770_v50, %s6503_s13  ;;  %v7873_v56 = vpop.permute.xlu2 %2470 }
 0x16a   : > { %5483 = vmatpush.xpose.msk.msrb.mxu3 %vm1585_vm2, %v7770_v50  ;;  %v7810_v7 = vpop.permute.xlu1 %2355  ;;  %9742 = vst [vmem:[#allocation52_spill] sm:$0xff] %v7873_v56 }
 0x16b   : > { %9732 = vst [vmem:[#allocation42_spill] sm:$0xff] %v7810_v7 }
 0x16c   : > { %v7814_v8 = vpop.f32.mrf.mxu1 }
 0x16d   : > { %9734 = vst [vmem:[#allocation44_spill] sm:$0xff] %v7814_v8  ;;  %5484 = vmatmul.msk.f32.vlgmr.msrb.gmra.mxu3 %vm1585_vm2, %v7545_v49  ;;  %2474 = vrot.lane.b32.xlu0 %v7734_v43, %s6502_s11 }
 0x16e   : > { %v7820_v37 = vpop.f32.mrf.mxu2 }
 0x16f   : > { %9735 = vst [vmem:[#allocation45_spill] sm:$0xff] %v7820_v37  ;;  %v7822_v42 = vpop.permute.xlu0 %2277  ;;  %2221 = vmatpush.msrb.mxu2 %v7820_v37  ;;  %v5846_v35 = vpack.i.bf16 %v7820_v37, %v7711_v63 }
 0x170   : > { %3180 = vrot.lane.b32.xlu1 %v7670_v15, %s6503_s13 }
 0x171   : > { %2515 = vrot.lane.b32.xlu2 %v7793_v18, %s6502_s11  ;;  %2222 = vmatpush.msrb.mxu2 %v7800_v26  ;;  %v7890_v32 = vpop.permute.xlu2 %2279 }
 0x172   : > { %v7830_v1 = vpop.permute.xlu1 %3061 }
 0x173   : > { %9736 = vst [vmem:[#allocation46_spill] sm:$0xff] %v7830_v1  ;;  %v7896_v1 = vpack.i.bf16 %v7660_v12, %v7676_v19 }
 0x174   : > { %v7834_v61 = vpop.f32.mrf.mxu1 }
 0x175   : > { %5485 = vmatmul.msk.f32.gmra.mxu3 %vm1585_vm2, %v7577_v53  ;;  %3258 = vrot.lane.b32.xlu0 %v7734_v43, %s6503_s13  ;;  %9746 = vst [vmem:[#allocation56_spill] sm:$0xff] %v7896_v1 }
 0x176   : > { %5486 = vmatpush.xpose.msk.msra.mxu3 %vm1585_vm2, %v7834_v61  ;;  %v1579_v59 = vpop.f32.mrf.mxu2 }
 0x177   : > { %v7842_v14 = vpop.permute.xlu0 %2433 }
 0x178   : > { %2398 = vrot.lane.b32.xlu1 %v7689_v44, %s6502_s11 }
 0x179   : > { %3299 = vrot.lane.b32.xlu2 %v7793_v18, %s6503_s13  ;;  %v7910_v37 = vpop.permute.xlu2 %2550 }
 0x17a   : > { %5487 = vmatpush.xpose.msk.msra.mxu3 %vm1585_vm2, %v7814_v8  ;;  %v7850_v3 = vpop.permute.xlu1 %2392  ;;  %9749 = vst [vmem:[#allocation59_spill] sm:$0xff] %v7910_v37 }
 0x17b   : > { %9738 = vst [vmem:[#allocation48_spill] sm:$0xff] %v7850_v3  ;;  %v5836_v3 = vpack.i.bf16 %v7756_v9, %v7800_v26 }
 0x17d   : > { %5488 = vmatmul.msk.f32.vlgmr.msra.gmra.mxu3 %vm1585_vm2, %v7629_v33  ;;  %3260 = vrot.lane.b32.xlu0 %v7750_v58, %s6503_s13 }
 0x17e   : > { %2134 = vmatpush.msrb.mxu3 %v7711_v63 }
 0x17f   : > { %v7860_v21 = vpop.permute.xlu0 %2511 }
 0x180   : > { %2135 = vmatpush.msrb.mxu3 %v7695_v25  ;;  %9740 = vst [vmem:[#allocation50_spill] sm:$0xff] %v7860_v21  ;;  %3182 = vrot.lane.b32.xlu1 %v7689_v44, %s6503_s13 }
 0x181   : > { %2552 = vrot.lane.b32.xlu2 %v7814_v8, %s6502_s11  ;;  %v7922_v21 = vpop.permute.xlu2 %3063 }
 0x182   : > { %v7866_v13 = vpop.permute.xlu1 %3098  ;;  %9752 = vst [vmem:[#allocation62_spill] sm:$0xff] %v7922_v21 }
 0x183   : > { %9741 = vst [vmem:[#allocation51_spill] sm:$0xff] %v7866_v13 }
 0x185   : > { %5489 = vmatmul.msk.f32.gmra.mxu3 %vm1585_vm2, %v7627_v45  ;;  %5847 = vrot.lane.b32.xlu0 %v5846_v35, %s6502_s11 }
 0x187   : > { %v7879_v34 = vpop.permute.xlu0 %2314 }
 0x188   : > { %2435 = vrot.lane.b32.xlu1 %v7705_v60, %s6502_s11  ;;  %9743 = vst [vmem:[#allocation53_spill] sm:$0xff] %v7879_v34 }
 0x189   : > { %3336 = vrot.lane.b32.xlu2 %v7814_v8, %s6503_s13 }
 0x18a   : > { %v7881_v36 = vpop.permute.xlu1 %3176 }
 0x18b   : > { %9744 = vst [vmem:[#allocation54_spill] sm:$0xff] %v7881_v36 }
 0x18d   : > { %3338 = vrot.lane.b32.xlu0 %v7834_v61, %s6503_s13 }
 0x18f   : > { %v7885_v13 = vpop.f32.mrf.mxu3  ;;  %v7898_v4 = vpop.permute.xlu0 %3254 }
 0x190   : > { %3219 = vrot.lane.b32.xlu1 %v7705_v60, %s6503_s13  ;;  %9747 = vst [vmem:[#allocation57_spill] sm:$0xff] %v7898_v4 }
 0x191   : > { %5862 = vrot.lane.b32.xlu2 %v5821_v20, %s6503_s13 }
 0x192   : > { %v7892_v52 = vpop.permute.xlu1 %2548 }
 0x193   : > { %9745 = vst [vmem:[#allocation55_spill] sm:$0xff] %v7892_v52 }
 0x195   : > { %5867 = vrot.lane.b32.xlu0 %v7896_v1, %s6503_s13 }
 0x197   : > { %v7902_v36 = vpop.f32.mrf.mxu3  ;;  %v7912_v19 = vpop.permute.xlu0 %3332 }
 0x198   : > { %2437 = vrot.lane.b32.xlu1 %v7719_v55, %s6502_s11  ;;  %9750 = vst [vmem:[#allocation60_spill] sm:$0xff] %v7912_v19 }
 0x199   : > { %3831 = vrot.lane.b32.xlu2 %v7567_v0, %s6504_s15  ;;  %v1582_v0 = vpop.f32.mrf.mxu2 }
 0x19a   : > { %v7908_v20 = vpop.permute.xlu1 %2394  ;;  %2250 = vmatpush.msra.mxu3 %v1582_v0  ;;  %v7977_v10 = vpack.i.bf16 %v1579_v59, %v1582_v0 }
 0x19b   : > { %9748 = vst [vmem:[#allocation58_spill] sm:$0xff] %v7908_v20 }
 0x19c   : > { %2251 = vmatpush.msra.mxu3 %v1579_v59 }
 0x19f   : > { %v7914_v4 = vpop.f32.mrf.mxu3  ;;  %v7926_v37 = vpop.permute.xlu0 %2316 }
 0x1a0   : > { %3221 = vrot.lane.b32.xlu1 %v7719_v55, %s6503_s13  ;;  %9753 = vst [vmem:[#allocation63_spill] sm:$0xff] %v7926_v37  ;;  %v1873_v63 = vsel %vm1866_vm3, %v7914_v4, -inf }
 0x1a1   : > { %3827 = vrot.lane.b32.xlu2 %v7517_v2, %s6504_s15 }
 0x1a2   : > { %v7920_v52 = vpop.permute.xlu1 %3100 }
 0x1a3   : > { %9751 = vst [vmem:[#allocation61_spill] sm:$0xff] %v7920_v52  ;;  %v7936_v52 = vpop.permute.xlu2 %3065 }
 0x1a4   : > { %9755 = vst [vmem:[#allocation65_spill] sm:$0xff] %v7936_v52  ;;  %v1867_v52 = vsel %vm1866_vm3, %v7885_v13, -inf }
 0x1a7   : > { %v7928_v19 = vpop.f32.mrf.mxu3  ;;  %v7940_v21 = vpop.permute.xlu0 %2472 }
 0x1a8   : > { %5827 = vrot.lane.b32.xlu1 %v5826_v11, %s6502_s11  ;;  %9756 = vst [vmem:[#allocation66_spill] sm:$0xff] %v7940_v21 }
 0x1a9   : > { %5877 = vrot.lane.b32.xlu2 %v5846_v35, %s6503_s13 }
 0x1aa   : > { %v7932_v2 = vpop.permute.xlu1 %3178 }
 0x1ab   : > { %9754 = vst [vmem:[#allocation64_spill] sm:$0xff] %v7932_v2  ;;  %v7949_v35 = vpop.permute.xlu2 %5812 }
 0x1af   : > { %v7934_v20 = vpop.f32.mrf.mxu3  ;;  %v7953_v2 = vpop.permute.xlu0 %2318 }
 0x1b0   : > { %2513 = vrot.lane.b32.xlu1 %v7770_v50, %s6502_s11 }
 0x1b2   : > { %v7942_v12 = vpop.permute.xlu1 %3256 }
 0x1b3   : > { %9757 = vst [vmem:[#allocation67_spill] sm:$0xff] %v7942_v12  ;;  %v7963_v1 = vpop.permute.xlu2 %3102 }
 0x1b4   : > { %9760 = vst [vmem:[#allocation70_spill] sm:$0xff] %v7963_v1 }
 0x1b7   : > { %v7946_v7 = vpop.f32.mrf.mxu3 }
 0x1b8   : > { %9758 = vst [vmem:[#allocation68_spill] sm:$0xff] %v7946_v7  ;;  %5837 = vrot.lane.b32.xlu1 %v5836_v3, %s6502_s11  ;;  %v7965_v3 = vpop.permute.xlu0 %2320  ;;  %v1882_v57 = vsel %vm1866_vm3, %v7946_v7, -inf }
 0x1ba   : > { %v7951_v11 = vpop.permute.xlu1 %3334 }
 0x1bb   : > { %9759 = vst [vmem:[#allocation69_spill] sm:$0xff] %v7951_v11  ;;  %v1870_v11 = vsel %vm1866_vm3, %v7902_v36, -inf  ;;  %v7975_v21 = vpop.permute.xlu2 %5817 }
 0x1bc   : > { %9762 = vst [vmem:[#allocation72_spill] sm:$0xff] %v7975_v21 }
 0x1bf   : > { %1868 = vmax.xlane.f32.xlu0 %v1867_v52  ;;  %v7957_v22 = vpop.f32.mrf.mxu3 }
 0x1c0   : > { %5842 = vrot.lane.b32.xlu1 %v7687_v47, %s6503_s13  ;;  %v7979_v56 = vpop.permute.xlu0 %3104 }
 0x1c1   : > { %9763 = vst [vmem:[#allocation73_spill] sm:$0xff] %v7979_v56  ;;  %v8000_v56 = vpack.i.bf16 %v7756_v9, %v7776_v30 }
 0x1c2   : > { %v7961_v12 = vpop.permute.xlu1 %2281 }
 0x1c3   : > { %v7993_v59 = vpop.permute.xlu2 %2476  ;;  %9765 = vst [vmem:[#allocation75_spill] sm:$0xff] %v8000_v56 }
 0x1c7   : > { %1871 = vmax.xlane.f32.xlu0 %v1870_v11  ;;  %v7969_v8 = vpop.f32.mrf.mxu3  ;;  %v5856_v11 = vpack.i.bf16 %v7740_v5, %v7637_v6 }
 0x1c8   : > { %2554 = vrot.lane.b32.xlu1 %v7834_v61, %s6502_s11  ;;  %v8002_v7 = vpop.permute.xlu0 %3143 }
 0x1c9   : > { %9766 = vst [vmem:[#allocation76_spill] sm:$0xff] %v8002_v7 }
 0x1ca   : > { %v7973_v52 = vpop.permute.xlu1 %2357 }
 0x1cb   : > { %9761 = vst [vmem:[#allocation71_spill] sm:$0xff] %v7973_v52  ;;  %v8012_v58 = vpop.permute.xlu2 %5832 }
 0x1cc   : > { %9768 = vst [vmem:[#allocation78_spill] sm:$0xff] %v8012_v58 }
 0x1cf   : > { %v7981_v1 = vpop.f32.mrf.mxu3 }
 0x1d0   : > { %5852 = vrot.lane.b32.xlu1 %v7977_v10, %s6502_s11  ;;  %v1891_v0 = vsel %vm1866_vm3, %v7981_v1, -inf }
 0x1d2   : > { %1883 = vmax.xlane.f32.xlu2 %v1882_v57  ;;  %v7989_v37 = vpop.permute.xlu1 %3141 }
 0x1d3   : > { %9764 = vst [vmem:[#allocation74_spill] sm:$0xff] %v7989_v37  ;;  %v8022_v7 = vpop.permute.xlu2 %3297 }
 0x1d4   : > { %9771 = vst [vmem:[#allocation81_spill] sm:$0xff] %v8022_v7 }
 0x1d7   : > { %v7991_v52 = vpop.f32.mrf.mxu3 }
 0x1d8   : > { %5857 = vrot.lane.b32.xlu1 %v5856_v11, %s6503_s13  ;;  %v1894_v37 = vsel %vm1866_vm3, %v7991_v52, -inf  ;;  %v8014_v11 = vpop.permute.xlu0 %2396 }
 0x1d9   : > { %9769 = vst [vmem:[#allocation79_spill] sm:$0xff] %v8014_v11 }
 0x1da   : > { %1892 = vmax.xlane.f32.xlu2 %v1891_v0  ;;  %v8010_v5 = vpop.permute.xlu1 %2359 }
 0x1db   : > { %5872 = vrot.lane.b32.xlu0 %v8000_v56, %s6503_s13  ;;  %9767 = vst [vmem:[#allocation77_spill] sm:$0xff] %v8010_v5  ;;  %v8032_v11 = vpop.permute.xlu2 %2515 }
 0x1dc   : > { %9773 = vst [vmem:[#allocation83_spill] sm:$0xff] %v8032_v11 }
 0x1e0   : > { %v8006_v57 = vpop.f32.mrf.mxu3  ;;  %v8024_v56 = vpop.permute.xlu0 %5822 }
 0x1e1   : > { %v1897_v30 = vsel %vm1866_vm3, %v8006_v57, -inf }
 0x1e2   : > { %1895 = vmax.xlane.f32.xlu2 %v1894_v37  ;;  %v8020_v0 = vpop.permute.xlu1 %3180 }
 0x1e3   : > { %9770 = vst [vmem:[#allocation80_spill] sm:$0xff] %v8020_v0  ;;  %v8042_v7 = vpop.permute.xlu2 %3299 }
 0x1e4   : > { %9776 = vst [vmem:[#allocation86_spill] sm:$0xff] %v8042_v7 }
 0x1e8   : > { %v8016_v9 = vpop.f32.mrf.mxu3  ;;  %v8034_v58 = vpop.permute.xlu0 %2474 }
 0x1e9   : > { %v1900_v37 = vsel %vm1866_vm3, %v8016_v9, -inf  ;;  %9774 = vst [vmem:[#allocation84_spill] sm:$0xff] %v8034_v58 }
 0x1ea   : > { %1898 = vmax.xlane.f32.xlu2 %v1897_v30  ;;  %v8030_v5 = vpop.permute.xlu1 %2398 }
 0x1eb   : > { %9772 = vst [vmem:[#allocation82_spill] sm:$0xff] %v8030_v5  ;;  %v8056_v24 = vpop.permute.xlu2 %2552 }
 0x1ec   : > { %9779 = vst [vmem:[#allocation89_spill] sm:$0xff] %v8056_v24 }
 0x1f0   : > { %v8026_v34 = vpop.f32.mrf.mxu3  ;;  %v8044_v60 = vpop.permute.xlu0 %3258 }
 0x1f1   : > { %9777 = vst [vmem:[#allocation87_spill] sm:$0xff] %v8044_v60  ;;  %v1903_v60 = vsel %vm1866_vm3, %v8026_v34, -inf }
 0x1f2   : > { %1901 = vmax.xlane.f32.xlu2 %v1900_v37  ;;  %v8038_v30 = vpop.permute.xlu1 %3182  ;;  %v1876_v37 = vsel %vm1866_vm3, %v7928_v19, -inf }
 0x1f3   : > { %9775 = vst [vmem:[#allocation85_spill] sm:$0xff] %v8038_v30  ;;  %v8066_v58 = vpop.permute.xlu2 %3336 }
 0x1f4   : > { %9782 = vst [vmem:[#allocation92_spill] sm:$0xff] %v8066_v58 }
 0x1f8   : > { %v8036_v21 = vpop.f32.mrf.mxu3  ;;  %v8058_v7 = vpop.permute.xlu0 %3260 }
 0x1f9   : > { %9780 = vst [vmem:[#allocation90_spill] sm:$0xff] %v8058_v7 }
 0x1fa   : > { %v8054_v30 = vpop.permute.xlu1 %2435 }
 0x1fb   : > { %v8074_v24 = vpop.permute.xlu2 %5862 }
 0x1fc   : > { %9784 = vst [vmem:[#allocation94_spill] sm:$0xff] %v8074_v24 }
 0x200   : > { %v8040_v0 = vpop.f32.mrf.mxu3 }
 0x202   : > { %1874 = vmax.xlane.f32.xlu1 %v1873_v63  ;;  %v8062_v63 = vpop.permute.xlu1 %3219 }
 0x203   : > { %9781 = vst [vmem:[#allocation91_spill] sm:$0xff] %v8062_v63  ;;  %v5881_v63 = vpack.i.bf16 %v7800_v26, %v7695_v25  ;;  %v8083_v58 = vpop.permute.xlu2 %3831 }
 0x204   : > { %9786 = vst [vmem:[#allocation96_spill] sm:$0xff] %v8083_v58 }
 0x205   : > { %1877 = vmax.xlane.f32.xlu0 %v1876_v37  ;;  %v1906_v37 = vsel %vm1866_vm3, %v8036_v21, -inf }
 0x208   : > { %v8050_v11 = vpop.f32.mrf.mxu3 }
 0x209   : > { %9778 = vst [vmem:[#allocation88_spill] sm:$0xff] %v8050_v11  ;;  %v1912_v5 = vsel %vm1866_vm3, %v8050_v11, -inf  ;;  %v8068_v11 = vpop.permute.xlu0 %5847 }
 0x20a   : > { %1913 = vmax.xlane.f32.xlu2 %v1912_v5  ;;  %9783 = vst [vmem:[#allocation93_spill] sm:$0xff] %v8068_v11  ;;  %v1909_v5 = vsel %vm1866_vm3, %v8040_v0, -inf  ;;  %v2438_v7 = vpop.permute.xlu1 %2437 }
 0x20d   : > { %1904 = vmax.xlane.f32.xlu0 %v1903_v60 }
 0x211   : > { %v8076_v60 = vpop.permute.xlu0 %3338 }
 0x212   : > { %9785 = vst [vmem:[#allocation95_spill] sm:$0xff] %v8076_v60  ;;  %v8095_v60 = vpop.permute.xlu2 %3827 }
 0x213   : > { %9788 = vst [vmem:[#allocation98_spill] sm:$0xff] %v8095_v60 }
 0x215   : > { %1907 = vmax.xlane.f32.xlu0 %v1906_v37  ;;  %v8081_v37 = vpop.permute.xlu1 %3221 }
 0x219   : > { %v8085_v11 = vpop.permute.xlu0 %5867 }
 0x21a   : > { %9787 = vst [vmem:[#allocation97_spill] sm:$0xff] %v8085_v11 }
 0x21b   : > { %3833 = vrot.lane.b32.xlu1 %v7581_v54, %s6504_s15 }
 0x21d   : > { %1910 = vmax.xlane.f32.xlu0 %v1909_v5  ;;  %v8091_v54 = vpop.permute.xlu1 %5827 }
 0x222   : > { %5882 = vrot.lane.b32.xlu2 %v5881_v63, %s6503_s13 }
 0x225   : > { %v8103_v58 = vpop.permute.xlu1 %2513 }
 0x22a   : > { %3909 = vrot.lane.b32.xlu2 %v7631_v62, %s6504_s15 }
 0x231   : > { %3872 = vrot.lane.b32.xlu0 %v7607_v17, %s6504_s15 }
 0x232   : > { %3946 = vrot.lane.b32.xlu2 %v7652_v23, %s6504_s15  ;;  %v1869_v5 = vpop.xlane.xlu0 %1868  ;;  %v8107_v23 = vpop.permute.xlu2 %5877 }
 0x233   : > { %v1915_v63 = vsub.f32 %v7885_v13, %v1869_v5 }
 0x235   : > { %v1931_v24 = vmul.f32 1.442695, %v1915_v63 }
 0x237   : > { %5932 = vpow2.f32 %v1931_v24  ;;  %v1879_v24 = vsel %vm1866_vm3, %v7934_v20, -inf }
 0x239   : > { %3870 = vrot.lane.b32.xlu0 %v7597_v46, %s6504_s15  ;;  %v8125_v46 = vpop.permute.xlu1 %5837 }
 0x23a   : > { %3983 = vrot.lane.b32.xlu2 %v7540_v28, %s6504_s15  ;;  %v1872_v62 = vpop.xlane.xlu0 %1871 }
 0x23b   : > { %v1916_v17 = vsub.f32 %v7902_v36, %v1872_v62  ;;  %v9798_v62 = vld [vmem:[#allocation53_spill] sm:$0xff] }
 0x23d   : > { %v8105_v11 = vpop.eup %5932  ;;  %v1933_v60 = vmul.f32 1.442695, %v1916_v17  ;;  %v5824_v17 = vunpack.i.l.bf16 %v8024_v56 }
 0x23e   : > { %5490 = vmatmul.msk.f32.vlgmr.msrb.gmra.mxu0 %vm1866_vm3, %v8105_v11 }
 0x23f   : > { %5934 = vpow2.f32 %v1933_v60  ;;  %5506 = vmatpush.xpose.msk.msrb.mxu0 %vm1585_vm2, %v7961_v12 }
 0x241   : > { %3866 = vrot.lane.b32.xlu0 %v7595_v48, %s6504_s15 }
 0x242   : > { %4026 = vrot.lane.b32.xlu2 %v7734_v43, %s6504_s15  ;;  %v1885_v43 = vsel %vm1866_vm3, %v7957_v22, -inf }
 0x243   : > { %5507 = vmatpush.xpose.msk.msrb.mxu0 %vm1585_vm2, %v7890_v32  ;;  %v8136_v32 = vpop.permute.xlu1 %5842 }
 0x245   : > { %v8119_v13 = vpop.eup %5934  ;;  %v8121_v28 = vpop.xlane.xlu2 %1883  ;;  %1880 = vmax.xlane.f32.xlu1 %v1879_v24  ;;  %v9800_v24 = vld [vmem:[#allocation63_spill] sm:$0xff] }
 0x246   : > { %5491 = vmatmul.msk.f32.gmra.mxu0 %vm1866_vm3, %v8119_v13 }
 0x249   : > { %3905 = vrot.lane.b32.xlu0 %v7519_v41, %s6504_s15 }
 0x24a   : > { %4065 = vrot.lane.b32.xlu2 %v7770_v50, %s6504_s15  ;;  %v1888_v50 = vsel %vm1866_vm3, %v7969_v8, -inf }
 0x24d   : > { %v1893_v48 = vpop.xlane.xlu2 %1892  ;;  %1886 = vmax.xlane.f32.xlu1 %v1885_v43  ;;  %v9802_v43 = vld [vmem:[#allocation78_spill] sm:$0xff] }
 0x24e   : > { %v1923_v36 = vsub.f32 %v7981_v1, %v1893_v48  ;;  %v9801_v48 = vld [vmem:[#allocation28_spill] sm:$0xff] }
 0x250   : > { %v1947_v12 = vmul.f32 1.442695, %v1923_v36  ;;  %v5835_v36 = vunpack.i.h.bf16 %v9802_v43 }
 0x251   : > { %3907 = vrot.lane.b32.xlu0 %v7552_v31, %s6504_s15  ;;  %v8151_v31 = vpop.permute.xlu1 %2554 }
 0x252   : > { %5936 = vpow2.f32 %v1947_v12  ;;  %4063 = vrot.lane.b32.xlu2 %v7577_v53, %s6504_s15 }
 0x255   : > { %v1896_v41 = vpop.xlane.xlu2 %1895  ;;  %1889 = vmax.xlane.f32.xlu1 %v1888_v50 }
 0x256   : > { %v1924_v60 = vsub.f32 %v7991_v52, %v1896_v41  ;;  %v5896_v52 = vpack.i.bf16 %v7613_v40, %v7637_v6  ;;  %v5815_v40 = vunpack.i.h.bf16 %v7949_v35  ;;  %v9803_v41 = vld [vmem:[#allocation52_spill] sm:$0xff] }
 0x258   : > { %v8145_v5 = vpop.eup %5936  ;;  %v1949_v1 = vmul.f32 1.442695, %v1924_v60  ;;  %v9804_v60 = vld [vmem:[#allocation33_spill] sm:$0xff] }
 0x259   : > { %9789 = vst [vmem:[#allocation99_spill] sm:$0xff] %v8145_v5  ;;  %5498 = vmatmul.msk.f32.vlgmr.msra.gmra.mxu0 %vm1866_vm3, %v8145_v5  ;;  %3948 = vrot.lane.b32.xlu0 %v7670_v15, %s6504_s15  ;;  %v8167_v15 = vpop.permute.xlu1 %5852 }
 0x25a   : > { %5938 = vpow2.f32 %v1949_v1  ;;  %5522 = vmatpush.xpose.msk.msra.mxu0 %vm1585_vm2, %v2438_v7  ;;  %4100 = vrot.lane.b32.xlu2 %v7629_v33, %s6504_s15  ;;  %v5814_v33 = vunpack.i.l.bf16 %v7949_v35  ;;  %v5830_v7 = vunpack.i.h.bf16 %v8091_v54 }
 0x25e   : > { %5523 = vmatpush.xpose.msk.msra.mxu0 %vm1585_vm2, %v8054_v30 }
 0x260   : > { %v8158_v53 = vpop.eup %5938 }
 0x261   : > { %9790 = vst [vmem:[#allocation100_spill] sm:$0xff] %v8158_v53  ;;  %5499 = vmatmul.msk.f32.gmra.mxu0 %vm1866_vm3, %v8158_v53  ;;  %3989 = vrot.lane.b32.xlu0 %v7719_v55, %s6504_s15  ;;  %v8175_v6 = vpop.permute.xlu1 %5857  ;;  %v8179_v55 = vpop.permute.xlu0 %5872 }
 0x262   : > { %5897 = vrot.lane.b32.xlu2 %v5896_v52, %s6504_s15 }
 0x269   : > { %5508 = vmatmul.msk.f32.vlgmr.msrb.gmra.mxu0 %vm1585_vm2, %v7744_v27  ;;  %3985 = vrot.lane.b32.xlu0 %v7565_v51, %s6504_s15 }
 0x26a   : > { %2775 = vmatpush.msrb.mxu0 %v5814_v33  ;;  %v9805_v33 = vld [vmem:[#allocation66_spill] sm:$0xff] }
 0x26c   : > { %2776 = vmatpush.msrb.mxu0 %v5815_v40 }
 0x26e   : > { %3829 = vrot.lane.b32.xlu1 %v7563_v38, %s6504_s15  ;;  %v5825_v38 = vunpack.i.h.bf16 %v8024_v56  ;;  %v5840_v56 = vunpack.i.h.bf16 %v8125_v46 }
 0x271   : > { %5509 = vmatmul.msk.f32.gmra.mxu0 %vm1585_vm2, %v7822_v42  ;;  %4067 = vrot.lane.b32.xlu0 %v7793_v18, %s6504_s15 }
 0x275   : > { %v1875_v27 = vpop.xlane.xlu1 %1874 }
 0x276   : > { %v1917_v51 = vsub.f32 %v7914_v4, %v1875_v27  ;;  %3911 = vrot.lane.b32.xlu1 %v7654_v39, %s6504_s15  ;;  %v1899_v4 = vpop.xlane.xlu2 %1898  ;;  %v9806_v27 = vld [vmem:[#allocation68_spill] sm:$0xff] }
 0x278   : > { %v1878_v35 = vpop.xlane.xlu0 %1877  ;;  %v1935_v30 = vmul.f32 1.442695, %v1917_v51  ;;  %v1920_v51 = vsub.f32 %v9806_v27, %v8121_v28  ;;  %v9809_v28 = vld [vmem:[#allocation77_spill] sm:$0xff] }
 0x279   : > { %5524 = vmatmul.msk.f32.vlgmr.msra.gmra.mxu0 %vm1585_vm2, %v7780_v29  ;;  %4061 = vrot.lane.b32.xlu0 %v7545_v49, %s6504_s15  ;;  %v1918_v18 = vsub.f32 %v7928_v19, %v1878_v35  ;;  %v1925_v49 = vsub.f32 %v8006_v57, %v1899_v4  ;;  %v9794_v57 = vld [vmem:[#allocation31_spill] sm:$0xff]  ;;  %v9807_v35 = vld [vmem:[#allocation44_spill] sm:$0xff]  ;;  %v9823_v27 = vld [vmem:[#allocation89_spill] sm:$0xff] }
 0x27a   : > { %2923 = vmatpush.msra.mxu0 %v5830_v7  ;;  %5940 = vpow2.f32 %v1935_v30  ;;  %v1941_v30 = vmul.f32 1.442695, %v1920_v51 }
 0x27b   : > { %v1937_v42 = vmul.f32 1.442695, %v1918_v18  ;;  %v1951_v29 = vmul.f32 1.442695, %v1925_v49 }
 0x27c   : > { %2924 = vmatpush.msra.mxu0 %v5825_v38 }
 0x27d   : > { %5942 = vpow2.f32 %v1937_v42 }
 0x27e   : > { %5887 = vrot.lane.b32.xlu1 %v7977_v10, %s6503_s13  ;;  %5944 = vpow2.f32 %v1951_v29  ;;  %v9810_v29 = vld [vmem:[#allocation56_spill] sm:$0xff] }
 0x280   : > { %v8197_v39 = vpop.eup %5940  ;;  %v1905_v50 = vpop.xlane.xlu0 %1904 }
 0x281   : > { %5525 = vmatmul.msk.f32.gmra.mxu0 %vm1585_vm2, %v7842_v14  ;;  %4106 = vrot.lane.b32.xlu0 %v7834_v61, %s6504_s15  ;;  %v1902_v14 = vpop.xlane.xlu2 %1901  ;;  %v1927_v49 = vsub.f32 %v8026_v34, %v1905_v50  ;;  %v9819_v50 = vld [vmem:[#allocation83_spill] sm:$0xff] }
 0x282   : > { %5492 = vmatmul.msk.f32.vlgmr.msra.gmra.mxu1 %vm1866_vm3, %v8197_v39  ;;  %v1926_v61 = vsub.f32 %v8016_v9, %v1902_v14 }
 0x283   : > { %5510 = vmatpush.xpose.msk.msra.mxu1 %vm1585_vm2, %v7965_v3  ;;  %v8212_v19 = vpop.eup %5942  ;;  %v1955_v14 = vmul.f32 1.442695, %v1927_v49  ;;  %v9828_v49 = vld [vmem:[#allocation48_spill] sm:$0xff] }
 0x284   : > { %v1953_v3 = vmul.f32 1.442695, %v1926_v61 }
 0x286   : > { %3868 = vrot.lane.b32.xlu1 %v7647_v16, %s6504_s15  ;;  %5946 = vpow2.f32 %v1953_v3  ;;  %v9793_v16 = vld [vmem:[#allocation29_spill] sm:$0xff]  ;;  %v9811_v3 = vld [vmem:[#allocation71_spill] sm:$0xff] }
 0x287   : > { %5511 = vmatpush.xpose.msk.msra.mxu1 %vm1585_vm2, %v7953_v2  ;;  %v8221_v2 = vpop.eup %5944 }
 0x288   : > { %9791 = vst [vmem:[#allocation101_spill] sm:$0xff] %v8221_v2  ;;  %v1908_v7 = vpop.xlane.xlu0 %1907 }
 0x289   : > { %4102 = vrot.lane.b32.xlu0 %v7627_v45, %s6504_s15  ;;  %v9792_v45 = vld [vmem:[#allocation84_spill] sm:$0xff] }
 0x28a   : > { %5493 = vmatmul.msk.f32.gmra.mxu1 %vm1866_vm3, %v8212_v19 }
 0x28c   : > { %v8235_v9 = vpop.eup %5946 }
 0x28d   : > { %9795 = vst [vmem:[#allocation84_spill] sm:$0xff] %v8235_v9  ;;  %v8253_v12 = vpop.permute.xlu1 %3833 }
 0x28e   : > { %3950 = vrot.lane.b32.xlu1 %v7689_v44, %s6504_s15  ;;  %v5906_v44 = vpack.i.bf16 %v7695_v25, %v9794_v57  ;;  %v9799_v25 = vld [vmem:[#allocation35_spill] sm:$0xff] }
 0x291   : > { %5892 = vrot.lane.b32.xlu0 %v7687_v47, %s6504_s15  ;;  %v9796_v47 = vld [vmem:[#allocation37_spill] sm:$0xff] }
 0x292   : > { %5500 = vmatmul.msk.f32.vlgmr.msrb.gmra.mxu1 %vm1866_vm3, %v8221_v2 }
 0x293   : > { %5526 = vmatpush.xpose.msk.msrb.mxu1 %vm1585_vm2, %v7993_v59  ;;  %v9797_v59 = vld [vmem:[#allocation72_spill] sm:$0xff] }
 0x294   : > { %v5820_v63 = vunpack.i.h.bf16 %v9797_v59  ;;  %v5819_v51 = vunpack.i.l.bf16 %v9797_v59 }
 0x296   : > { %3944 = vrot.lane.b32.xlu1 %v9793_v16, %s6504_s15 }
 0x297   : > { %5527 = vmatpush.xpose.msk.msrb.mxu1 %vm1585_vm2, %v9792_v45 }
 0x299   : > { %5907 = vrot.lane.b32.xlu0 %v5906_v44, %s6504_s15  ;;  %v1928_v44 = vsub.f32 %v8036_v21, %v1908_v7 }
 0x29a   : > { %5501 = vmatmul.msk.f32.gmra.mxu1 %vm1866_vm3, %v8235_v9 }
 0x29e   : > { %3987 = vrot.lane.b32.xlu1 %v9796_v47, %s6504_s15 }
 0x2a2   : > { %5512 = vmatmul.msk.f32.vlgmr.msra.gmra.mxu1 %vm1585_vm2, %v9798_v62  ;;  %v1957_v62 = vmul.f32 1.442695, %v1928_v44 }
 0x2a3   : > { %2812 = vmatpush.msra.mxu1 %v5820_v63 }
 0x2a5   : > { %2813 = vmatpush.msra.mxu1 %v5824_v17 }
 0x2a6   : > { %4028 = vrot.lane.b32.xlu1 %v9799_v25, %s6504_s15 }
 0x2aa   : > { %5513 = vmatmul.msk.f32.gmra.mxu1 %vm1585_vm2, %v9800_v24  ;;  %v9814_v24 = vld [vmem:[#allocation79_spill] sm:$0xff] }
 0x2ae   : > { %4022 = vrot.lane.b32.xlu1 %v9801_v48, %s6504_s15  ;;  %v1914_v48 = vpop.xlane.xlu2 %1913 }
 0x2b2   : > { %5528 = vmatmul.msk.f32.vlgmr.msrb.gmra.mxu1 %vm1585_vm2, %v9803_v41 }
 0x2b3   : > { %2960 = vmatpush.msrb.mxu1 %v5835_v36 }
 0x2b5   : > { %2961 = vmatpush.msrb.mxu1 %v5840_v56 }
 0x2b6   : > { %4024 = vrot.lane.b32.xlu1 %v9804_v60, %s6504_s15 }
 0x2b8   : > { %v1881_v1 = vpop.xlane.xlu1 %1880 }
 0x2b9   : > { %v1919_v52 = vsub.f32 %v7934_v20, %v1881_v1 }
 0x2ba   : > { %5529 = vmatmul.msk.f32.gmra.mxu1 %vm1585_vm2, %v9805_v33 }
 0x2bb   : > { %v1939_v40 = vmul.f32 1.442695, %v1919_v52  ;;  %v8270_v42 = vpop.f32.mrf.mxu0 }
 0x2bc   : > { %9808 = vst [vmem:[#allocation29_spill] sm:$0xff] %v8270_v42 }
 0x2bd   : > { %5948 = vpow2.f32 %v1939_v40 }
 0x2be   : > { %4104 = vrot.lane.b32.xlu1 %v9807_v35, %s6504_s15  ;;  %5950 = vpow2.f32 %v1941_v30  ;;  %v9825_v35 = vld [vmem:[#allocation34_spill] sm:$0xff]  ;;  %v5829_v30 = vunpack.i.l.bf16 %v8091_v54 }
 0x2c0   : > { %v1887_v38 = vpop.xlane.xlu1 %1886 }
 0x2c1   : > { %v1921_v18 = vsub.f32 %v7957_v22, %v1887_v38  ;;  %v1911_v22 = vpop.xlane.xlu0 %1910 }
 0x2c2   : > { %v1929_v47 = vsub.f32 %v8040_v0, %v1911_v22  ;;  %v9817_v0 = vld [vmem:[#allocation88_spill] sm:$0xff] }
 0x2c3   : > { %v8268_v4 = vpop.eup %5948  ;;  %v1943_v20 = vmul.f32 1.442695, %v1921_v18  ;;  %v8292_v63 = vpop.f32.mrf.mxu0  ;;  %v1930_v41 = vsub.f32 %v9817_v0, %v1914_v48  ;;  %v9826_v18 = vld [vmem:[#allocation93_spill] sm:$0xff] }
 0x2c4   : > { %5494 = vmatmul.msk.f32.vlgmr.msra.gmra.mxu2 %vm1866_vm3, %v8268_v4  ;;  %v8282_v16 = vpop.eup %5950  ;;  %v1959_v25 = vmul.f32 1.442695, %v1929_v47  ;;  %v5849_v59 = vunpack.i.l.bf16 %v9826_v18 }
 0x2c5   : > { %5952 = vpow2.f32 %v1943_v20  ;;  %5514 = vmatpush.xpose.msk.msra.mxu2 %vm1585_vm2, %v9809_v28  ;;  %v1961_v60 = vmul.f32 1.442695, %v1930_v41  ;;  %v9827_v20 = vld [vmem:[#allocation42_spill] sm:$0xff]  ;;  %v5834_v28 = vunpack.i.l.bf16 %v9802_v43  ;;  %v5839_v43 = vunpack.i.l.bf16 %v8125_v46 }
 0x2c6   : > { %5902 = vrot.lane.b32.xlu1 %v9810_v29, %s6504_s15  ;;  %5954 = vpow2.f32 %v1955_v14  ;;  %v5855_v46 = vunpack.i.h.bf16 %v8167_v15 }
 0x2c8   : > { %v1890_v61 = vpop.xlane.xlu1 %1889 }
 0x2c9   : > { %5515 = vmatpush.xpose.msk.msra.mxu2 %vm1585_vm2, %v9811_v3  ;;  %v1922_v45 = vsub.f32 %v7969_v8, %v1890_v61  ;;  %v9813_v8 = vld [vmem:[#allocation82_spill] sm:$0xff]  ;;  %v8296_v17 = vpop.permute.xlu0 %3872  ;;  %v5850_v61 = vunpack.i.h.bf16 %v9826_v18 }
 0x2ca   : > { %v9829_v3 = vld [vmem:[#allocation58_spill] sm:$0xff] }
 0x2cb   : > { %v8284_v34 = vpop.eup %5952  ;;  %v1945_v57 = vmul.f32 1.442695, %v1922_v45  ;;  %v9830_v45 = vld [vmem:[#allocation40_spill] sm:$0xff] }
 0x2cc   : > { %9812 = vst [vmem:[#allocation31_spill] sm:$0xff] %v8284_v34  ;;  %5495 = vmatmul.msk.f32.gmra.mxu2 %vm1866_vm3, %v8282_v16  ;;  %5496 = vmatmul.msk.f32.vlgmr.msrb.gmra.mxu3 %vm1866_vm3, %v8284_v34  ;;  %v8300_v21 = vpop.eup %5954 }
 0x2cd   : > { %5956 = vpow2.f32 %v1945_v57  ;;  %5518 = vmatpush.xpose.msk.msrb.mxu3 %vm1585_vm2, %v9813_v8  ;;  %9815 = vst [vmem:[#allocation37_spill] sm:$0xff] %v8300_v21 }
 0x2ce   : > { %5958 = vpow2.f32 %v1957_v62  ;;  %v5854_v62 = vunpack.i.l.bf16 %v8167_v15 }
 0x2cf   : > { %5960 = vpow2.f32 %v1959_v25  ;;  %v9831_v25 = vld [vmem:[#allocation50_spill] sm:$0xff] }
 0x2d0   : > { %5962 = vpow2.f32 %v1961_v60 }
 0x2d1   : > { %5519 = vmatpush.xpose.msk.msrb.mxu3 %vm1585_vm2, %v9814_v24  ;;  %v8317_v52 = vpop.permute.xlu0 %3870  ;;  %v9832_v24 = vld [vmem:[#allocation55_spill] sm:$0xff] }
 0x2d3   : > { %v8302_v36 = vpop.eup %5956 }
 0x2d4   : > { %9816 = vst [vmem:[#allocation72_spill] sm:$0xff] %v8302_v36  ;;  %5497 = vmatmul.msk.f32.gmra.mxu3 %vm1866_vm3, %v8302_v36  ;;  %5502 = vmatmul.msk.f32.vlgmr.msrb.gmra.mxu2 %vm1866_vm3, %v8300_v21  ;;  %v8315_v1 = vpop.eup %5958 }
 0x2d5   : > { %5530 = vmatpush.xpose.msk.msrb.mxu2 %vm1585_vm2, %v9819_v50  ;;  %9820 = vst [vmem:[#allocation35_spill] sm:$0xff] %v8315_v1  ;;  %v8319_v33 = vpop.eup %5960  ;;  %v9834_v50 = vld [vmem:[#allocation59_spill] sm:$0xff] }
 0x2d6   : > { %v8309_v56 = vpop.f32.mrf.mxu0  ;;  %9821 = vst [vmem:[#allocation63_spill] sm:$0xff] %v8319_v33 }
 0x2d7   : > { %9818 = vst [vmem:[#allocation53_spill] sm:$0xff] %v8309_v56 }
 0x2d9   : > { %5531 = vmatpush.xpose.msk.msrb.mxu2 %vm1585_vm2, %v8103_v58  ;;  %v8331_v58 = vpop.eup %5962  ;;  %v8334_v7 = vpop.permute.xlu0 %3866 }
 0x2da   : > { %9824 = vst [vmem:[#allocation78_spill] sm:$0xff] %v8331_v58 }
 0x2dc   : > { %5503 = vmatmul.msk.f32.gmra.mxu2 %vm1866_vm3, %v8315_v1  ;;  %5504 = vmatmul.msk.f32.vlgmr.msra.gmra.mxu3 %vm1866_vm3, %v8319_v33 }
 0x2dd   : > { %5534 = vmatpush.xpose.msk.msra.mxu3 %vm1585_vm2, %v8151_v31 }
 0x2de   : > { %v8325_v40 = vpop.f32.mrf.mxu0 }
 0x2df   : > { %9822 = vst [vmem:[#allocation28_spill] sm:$0xff] %v8325_v40 }
 0x2e0   : > { %v8351_v29 = vpop.permute.xlu1 %3829 }
 0x2e1   : > { %5535 = vmatpush.xpose.msk.msra.mxu3 %vm1585_vm2, %v9823_v27  ;;  %v8355_v14 = vpop.permute.xlu0 %3905 }
 0x2e4   : > { %5505 = vmatmul.msk.f32.gmra.mxu3 %vm1866_vm3, %v8331_v58  ;;  %5516 = vmatmul.msk.f32.vlgmr.msra.gmra.mxu2 %vm1585_vm2, %v9825_v35 }
 0x2e5   : > { %2849 = vmatpush.msra.mxu2 %v5819_v51 }
 0x2e6   : > { %v8341_v38 = vpop.f32.mrf.mxu0 }
 0x2e7   : > { %v2587_v31 = vsel %vm1866_vm3, %v8341_v38, -inf  ;;  %2850 = vmatpush.msra.mxu2 %v5829_v30 }
 0x2e8   : > { %2588 = vmax.xlane.f32.xlu0 %v2587_v31  ;;  %v8367_v44 = vpop.permute.xlu1 %3911 }
 0x2e9   : > { %v8371_v8 = vpop.permute.xlu0 %3907 }
 0x2ec   : > { %5517 = vmatmul.msk.f32.gmra.mxu2 %vm1585_vm2, %v9827_v20  ;;  %5520 = vmatmul.msk.f32.vlgmr.msrb.gmra.mxu3 %vm1585_vm2, %v9828_v49 }
 0x2ed   : > { %2886 = vmatpush.msrb.mxu3 %v5849_v59 }
 0x2ee   : > { %v8353_v54 = vpop.f32.mrf.mxu0 }
 0x2ef   : > { %2887 = vmatpush.msrb.mxu3 %v5834_v28  ;;  %v2590_v22 = vsel %vm1866_vm3, %v8353_v54, -inf }
 0x2f0   : > { %2591 = vmax.xlane.f32.xlu1 %v2590_v22  ;;  %v8381_v0 = vpop.permute.xlu1 %5887 }
 0x2f1   : > { %v8383_v41 = vpop.permute.xlu0 %3948 }
 0x2f4   : > { %5521 = vmatmul.msk.f32.gmra.mxu3 %vm1585_vm2, %v9829_v3  ;;  %5532 = vmatmul.msk.f32.vlgmr.msrb.gmra.mxu2 %vm1585_vm2, %v9830_v45 }
 0x2f5   : > { %2997 = vmatpush.msrb.mxu2 %v5850_v61 }
 0x2f6   : > { %v8365_v57 = vpop.f32.mrf.mxu0 }
 0x2f7   : > { %2998 = vmatpush.msrb.mxu2 %v5839_v43  ;;  %v2611_v47 = vsel %vm1866_vm3, %v8365_v57, -inf }
 0x2f8   : > { %2612 = vmax.xlane.f32.xlu1 %v2611_v47  ;;  %v8389_v27 = vpop.permute.xlu1 %3868 }
 0x2f9   : > { %v8391_v51 = vpop.permute.xlu0 %3989 }
 0x2fc   : > { %5533 = vmatmul.msk.f32.gmra.mxu2 %vm1585_vm2, %v9831_v25  ;;  %5536 = vmatmul.msk.f32.vlgmr.msra.gmra.mxu3 %vm1585_vm2, %v9832_v24 }
 0x2fd   : > { %3034 = vmatpush.msra.mxu3 %v5854_v62 }
 0x2fe   : > { %v8409_v28 = vpop.f32.mrf.mxu0 }
 0x2ff   : > { %v8379_v48 = vpop.f32.mrf.mxu1  ;;  %3035 = vmatpush.msra.mxu3 %v5855_v46  ;;  %v2614_v3 = vsel %vm1866_vm3, %v8409_v28, -inf  ;;  %v9838_v46 = vld [vmem:[#allocation75_spill] sm:$0xff] }
 0x300   : > { %9833 = vst [vmem:[#allocation52_spill] sm:$0xff] %v8379_v48  ;;  %v8395_v15 = vpop.permute.xlu1 %3950 }
 0x301   : > { %v8397_v30 = vpop.permute.xlu0 %3985 }
 0x304   : > { %5537 = vmatmul.msk.f32.gmra.mxu3 %vm1585_vm2, %v9834_v50 }
 0x307   : > { %v8387_v60 = vpop.f32.mrf.mxu1 }
 0x308   : > { %v8403_v59 = vpop.permute.xlu1 %3944 }
 0x309   : > { %9837 = vst [vmem:[#allocation68_spill] sm:$0xff] %v8403_v59  ;;  %v8407_v49 = vpop.permute.xlu0 %4067 }
 0x30f   : > { %v8393_v35 = vpop.f32.mrf.mxu1 }
 0x310   : > { %9835 = vst [vmem:[#allocation33_spill] sm:$0xff] %v8393_v35  ;;  %v8417_v45 = vpop.permute.xlu1 %3987 }
 0x311   : > { %v8419_v43 = vpop.permute.xlu0 %4061 }
 0x317   : > { %v8399_v31 = vpop.f32.mrf.mxu1 }
 0x318   : > { %9836 = vst [vmem:[#allocation66_spill] sm:$0xff] %v8399_v31  ;;  %v8425_v25 = vpop.permute.xlu1 %4028  ;;  %v9841_v31 = vld [vmem:[#allocation45_spill] sm:$0xff] }
 0x319   : > { %v8427_v24 = vpop.permute.xlu0 %4106  ;;  %v5921_v35 = vpack.i.bf16 %v7800_v26, %v9841_v31 }
 0x31f   : > { %v8401_v18 = vpop.f32.mrf.mxu1 }
 0x320   : > { %v2593_v20 = vsel %vm1866_vm3, %v8401_v18, -inf  ;;  %v8431_v50 = vpop.permute.xlu1 %4022 }
 0x321   : > { %2594 = vmax.xlane.f32.xlu0 %v2593_v20  ;;  %v8433_v20 = vpop.permute.xlu0 %4102 }
 0x322   : > { %9839 = vst [vmem:[#allocation44_spill] sm:$0xff] %v8433_v20 }
 0x327   : > { %v8411_v22 = vpop.f32.mrf.mxu1 }
 0x328   : > { %v2596_v61 = vsel %vm1866_vm3, %v8411_v22, -inf }
 0x329   : > { %2597 = vmax.xlane.f32.xlu1 %v2596_v61  ;;  %2615 = vmax.xlane.f32.xlu0 %v2614_v3  ;;  %v8435_v61 = vpop.permute.xlu1 %4024  ;;  %v8441_v40 = vpop.permute.xlu0 %5892 }
 0x32f   : > { %v8421_v47 = vpop.f32.mrf.mxu1 }
 0x330   : > { %v2617_v62 = vsel %vm1866_vm3, %v8421_v47, -inf }
 0x331   : > { %2618 = vmax.xlane.f32.xlu1 %v2617_v62  ;;  %v8450_v33 = vpop.permute.xlu0 %5907 }
 0x332   : > { %9844 = vst [vmem:[#allocation82_spill] sm:$0xff] %v8450_v33 }
 0x33d   : > { %5917 = vrot.lane.b32.xlu0 %v9838_v46, %s6504_s15  ;;  %v8448_v46 = vpop.permute.xlu1 %4104 }
 0x345   : > { %v8456_v9 = vpop.permute.xlu1 %5902 }
 0x347   : > { %v8437_v3 = vpop.f32.mrf.mxu2 }
 0x348   : > { %9840 = vst [vmem:[#allocation77_spill] sm:$0xff] %v8437_v3 }
 0x34a   : > { %5922 = vrot.lane.b32.xlu1 %v5921_v35, %s6504_s15 }
 0x34f   : > { %v8444_v62 = vpop.f32.mrf.mxu2  ;;  %v8446_v58 = vpop.f32.mrf.mxu3 }
 0x350   : > { %9842 = vst [vmem:[#allocation56_spill] sm:$0xff] %v8444_v62 }
 0x351   : > { %9843 = vst [vmem:[#allocation71_spill] sm:$0xff] %v8446_v58 }
 0x357   : > { %v8452_v56 = vpop.f32.mrf.mxu3  ;;  %v8454_v21 = vpop.f32.mrf.mxu2 }
 0x358   : > { %9845 = vst [vmem:[#allocation79_spill] sm:$0xff] %v8452_v56  ;;  %v9849_v56 = vld [vmem:[#allocation65_spill] sm:$0xff] }
 0x359   : > { %9846 = vst [vmem:[#allocation88_spill] sm:$0xff] %v8454_v21 }
 0x35b   : > { %v2589_v1 = vpop.xlane.xlu0 %2588 }
 0x35c   : > { %v2635_v26 = vsub.f32 %v8341_v38, %v2589_v1  ;;  %v9851_v38 = vld [vmem:[#allocation62_spill] sm:$0xff] }
 0x35e   : > { %v2651_v31 = vmul.f32 1.442695, %v2635_v26 }
 0x35f   : > { %v8459_v35 = vpop.f32.mrf.mxu2  ;;  %v8461_v48 = vpop.f32.mrf.mxu3 }
 0x360   : > { %5964 = vpow2.f32 %v2651_v31  ;;  %9847 = vst [vmem:[#allocation83_spill] sm:$0xff] %v8459_v35  ;;  %v8476_v31 = vpop.f32.mrf.mxu1 }
 0x361   : > { %9848 = vst [vmem:[#allocation89_spill] sm:$0xff] %v8461_v48  ;;  %v9854_v48 = vld [vmem:[#allocation30_spill] sm:$0xff] }
 0x363   : > { %v2592_v2 = vpop.xlane.xlu1 %2591 }
 0x364   : > { %v2636_v58 = vsub.f32 %v8353_v54, %v2592_v2 }
 0x366   : > { %v5965_v53 = vpop.eup %5964  ;;  %v2653_v5 = vmul.f32 1.442695, %v2636_v58 }
 0x367   : > { %5538 = vmatmul.msk.f32.vlgmr.msrb.gmra.mxu0 %vm1866_vm3, %v5965_v53  ;;  %v8467_v21 = vpop.f32.mrf.mxu3  ;;  %v8469_v62 = vpop.f32.mrf.mxu2 }
 0x368   : > { %5554 = vmatpush.xpose.msk.msrb.mxu0 %vm1585_vm2, %v9849_v56  ;;  %9850 = vst [vmem:[#allocation34_spill] sm:$0xff] %v8467_v21  ;;  %5966 = vpow2.f32 %v2653_v5  ;;  %v2599_v1 = vsel %vm1866_vm3, %v8469_v62, -inf  ;;  %v9853_v21 = vld [vmem:[#allocation32_spill] sm:$0xff] }
 0x369   : > { %2600 = vmax.xlane.f32.xlu2 %v2599_v1  ;;  %v5911_v35 = vpack.i.bf16 %v9854_v48, %v9853_v21  ;;  %v1963_v21 = vsel %vm1866_vm3, %v8105_v11, 0.0  ;;  %v1972_v11 = vsel %vm1866_vm3, %v8212_v19, 0.0  ;;  %v1975_v19 = vsel %vm1866_vm3, %v8268_v4, 0.0 }
 0x36b   : > { %v2613_v2 = vpop.xlane.xlu1 %2612 }
 0x36c   : > { %5555 = vmatpush.xpose.msk.msrb.mxu0 %vm1585_vm2, %v9851_v38  ;;  %v2643_v58 = vsub.f32 %v8365_v57, %v2613_v2  ;;  %v2620_v38 = vsel %vm1866_vm3, %v8476_v31, -inf }
 0x36e   : > { %v5967_v54 = vpop.eup %5966  ;;  %v2667_v26 = vmul.f32 1.442695, %v2643_v58 }
 0x36f   : > { %v8478_v56 = vpop.f32.mrf.mxu2  ;;  %5539 = vmatmul.msk.f32.gmra.mxu0 %vm1866_vm3, %v5967_v54  ;;  %v8481_v5 = vpop.f32.mrf.mxu3 }
 0x370   : > { %5968 = vpow2.f32 %v2667_v26  ;;  %v2602_v1 = vsel %vm1866_vm3, %v8478_v56, -inf }
 0x371   : > { %2603 = vmax.xlane.f32.xlu0 %v2602_v1  ;;  %v9852_v1 = vld [vmem:[#allocation91_spill] sm:$0xff] }
 0x374   : > { %2621 = vmax.xlane.f32.xlu1 %v2620_v38 }
 0x376   : > { %v8487_v57 = vpop.eup %5968 }
 0x377   : > { %v8489_v2 = vpop.f32.mrf.mxu2  ;;  %5546 = vmatmul.msk.f32.vlgmr.msra.gmra.mxu0 %vm1866_vm3, %v8487_v57  ;;  %v8497_v26 = vpop.f32.mrf.mxu3 }
 0x378   : > { %5570 = vmatpush.xpose.msk.msra.mxu0 %vm1585_vm2, %v8081_v37  ;;  %v2623_v58 = vsel %vm1866_vm3, %v8489_v2, -inf  ;;  %v2608_v37 = vsel %vm1866_vm3, %v8497_v26, -inf }
 0x379   : > { %2624 = vmax.xlane.f32.xlu0 %v2623_v58  ;;  %v8510_v58 = vpop.permute.xlu2 %5882 }
 0x37c   : > { %5571 = vmatpush.xpose.msk.msra.mxu0 %vm1585_vm2, %v9852_v1  ;;  %v1966_v1 = vsel %vm1866_vm3, %v8119_v13, 0.0 }
 0x37f   : > { %v8501_v38 = vpop.f32.mrf.mxu2  ;;  %v8512_v42 = vpop.f32.mrf.mxu3 }
 0x380   : > { %v2626_v36 = vsel %vm1866_vm3, %v8501_v38, -inf }
 0x381   : > { %2627 = vmax.xlane.f32.xlu1 %v2626_v36  ;;  %5912 = vrot.lane.b32.xlu2 %v5911_v35, %s6504_s15  ;;  %v8518_v48 = vpop.permute.xlu2 %3909  ;;  %v1969_v35 = vsel %vm1866_vm3, %v8197_v39, 0.0 }
 0x382   : > { %2609 = vmax.xlane.f32.xlu0 %v2608_v37 }
 0x387   : > { %v8520_v36 = vpop.f32.mrf.mxu3 }
 0x388   : > { %v2632_v37 = vsel %vm1866_vm3, %v8520_v36, -inf }
 0x389   : > { %1967 = vadd.xlane.f32.xlu1 %v1966_v1  ;;  %v8527_v20 = vpop.permute.xlu2 %3946 }
 0x38a   : > { %1964 = vadd.xlane.f32.xlu0 %v1963_v21  ;;  %v2683_v21 = vsel %vm1866_vm3, %v5965_v53, 0.0  ;;  %v2686_v53 = vsel %vm1866_vm3, %v5967_v54, 0.0  ;;  %v2707_v54 = vsel %vm1866_vm3, %v8487_v57, 0.0  ;;  %v5845_v57 = vunpack.i.h.bf16 %v8136_v32 }
 0x391   : > { %1970 = vadd.xlane.f32.xlu1 %v1969_v35 }
 0x392   : > { %2633 = vmax.xlane.f32.xlu0 %v2632_v37 }
 0x394   : > { %v2595_v3 = vpop.xlane.xlu0 %2594 }
 0x395   : > { %v2637_v13 = vsub.f32 %v8401_v18, %v2595_v3  ;;  %v9855_v3 = vld [vmem:[#allocation73_spill] sm:$0xff] }
 0x397   : > { %v2655_v1 = vmul.f32 1.442695, %v2637_v13  ;;  %v8540_v13 = vpop.permute.xlu2 %3983 }
 0x399   : > { %5970 = vpow2.f32 %v2655_v1  ;;  %1973 = vadd.xlane.f32.xlu1 %v1972_v11 }
 0x39a   : > { %2684 = vadd.xlane.f32.xlu0 %v2683_v21 }
 0x39c   : > { %v2598_v39 = vpop.xlane.xlu1 %2597  ;;  %v2616_v35 = vpop.xlane.xlu0 %2615 }
 0x39d   : > { %v2638_v34 = vsub.f32 %v8411_v22, %v2598_v39  ;;  %v2644_v37 = vsub.f32 %v8409_v28, %v2616_v35  ;;  %v9856_v22 = vld [vmem:[#allocation70_spill] sm:$0xff]  ;;  %v5844_v35 = vunpack.i.l.bf16 %v8136_v32 }
 0x39f   : > { %v5971_v59 = vpop.eup %5970  ;;  %v2657_v33 = vmul.f32 1.442695, %v2638_v34  ;;  %v2669_v18 = vmul.f32 1.442695, %v2644_v37  ;;  %v8555_v21 = vpop.permute.xlu2 %4026  ;;  %v9857_v37 = vld [vmem:[#allocation36_spill] sm:$0xff] }
 0x3a0   : > { %5540 = vmatmul.msk.f32.vlgmr.msra.gmra.mxu1 %vm1866_vm3, %v5971_v59  ;;  %v2689_v4 = vsel %vm1866_vm3, %v5971_v59, 0.0  ;;  %v9858_v59 = vld [vmem:[#allocation90_spill] sm:$0xff] }
 0x3a1   : > { %5972 = vpow2.f32 %v2657_v33  ;;  %5558 = vmatpush.xpose.msk.msra.mxu1 %vm1585_vm2, %v9855_v3  ;;  %1976 = vadd.xlane.f32.xlu1 %v1975_v19  ;;  %v2629_v3 = vsel %vm1866_vm3, %v8512_v42, -inf  ;;  %v9859_v19 = vld [vmem:[#allocation87_spill] sm:$0xff] }
 0x3a2   : > { %5974 = vpow2.f32 %v2669_v18  ;;  %2687 = vadd.xlane.f32.xlu0 %v2686_v53 }
 0x3a4   : > { %v2619_v28 = vpop.xlane.xlu1 %2618 }
 0x3a5   : > { %v2645_v34 = vsub.f32 %v8421_v47, %v2619_v28  ;;  %5559 = vmatpush.xpose.msk.msra.mxu1 %vm1585_vm2, %v9856_v22  ;;  %v2605_v47 = vsel %vm1866_vm3, %v8481_v5, -inf  ;;  %v9860_v28 = vld [vmem:[#allocation46_spill] sm:$0xff]  ;;  %v9861_v22 = vld [vmem:[#allocation41_spill] sm:$0xff] }
 0x3a7   : > { %v5973_v33 = vpop.eup %5972  ;;  %v2671_v1 = vmul.f32 1.442695, %v2645_v34  ;;  %v8572_v53 = vpop.permute.xlu2 %4065  ;;  %v5860_v34 = vunpack.i.h.bf16 %v8175_v6 }
 0x3a8   : > { %v8545_v11 = vpop.eup %5974  ;;  %5541 = vmatmul.msk.f32.gmra.mxu1 %vm1866_vm3, %v5973_v33  ;;  %v2692_v18 = vsel %vm1866_vm3, %v5973_v33, 0.0  ;;  %v9862_v33 = vld [vmem:[#allocation94_spill] sm:$0xff] }
 0x3a9   : > { %5976 = vpow2.f32 %v2671_v1  ;;  %5547 = vmatmul.msk.f32.gmra.mxu0 %vm1866_vm3, %v8545_v11  ;;  %2690 = vadd.xlane.f32.xlu1 %v2689_v4  ;;  %v5865_v1 = vunpack.i.h.bf16 %v9862_v33  ;;  %v9863_v4 = vld [vmem:[#allocation47_spill] sm:$0xff] }
 0x3aa   : > { %2708 = vadd.xlane.f32.xlu0 %v2707_v54  ;;  %2606 = vmax.xlane.f32.xlu2 %v2605_v47 }
 0x3af   : > { %v8557_v39 = vpop.eup %5976  ;;  %v8577_v32 = vpop.permute.xlu2 %4063 }
 0x3b0   : > { %5548 = vmatmul.msk.f32.vlgmr.msrb.gmra.mxu1 %vm1866_vm3, %v8557_v39 }
 0x3b1   : > { %5556 = vmatmul.msk.f32.vlgmr.msrb.gmra.mxu0 %vm1585_vm2, %v9857_v37  ;;  %5574 = vmatpush.xpose.msk.msrb.mxu1 %vm1585_vm2, %v9858_v59 }
 0x3b2   : > { %3557 = vmatpush.msrb.mxu0 %v5844_v35  ;;  %2693 = vadd.xlane.f32.xlu0 %v2692_v18  ;;  %v8590_v35 = vpop.permute.xlu0 %5917 }
 0x3b3   : > { %2630 = vmax.xlane.f32.xlu2 %v2629_v3 }
 0x3b4   : > { %3558 = vmatpush.msrb.mxu0 %v5845_v57 }
 0x3b5   : > { %5575 = vmatpush.xpose.msk.msrb.mxu1 %vm1585_vm2, %v9859_v19 }
 0x3b7   : > { %v8584_v54 = vpop.permute.xlu2 %4100 }
 0x3b8   : > { %9864 = vst [vmem:[#allocation93_spill] sm:$0xff] %v8584_v54  ;;  %v9865_v54 = vld [vmem:[#allocation76_spill] sm:$0xff] }
 0x3b9   : > { %5557 = vmatmul.msk.f32.gmra.mxu0 %vm1585_vm2, %v9860_v28 }
 0x3bc   : > { %v8593_v57 = vpop.permute.xlu1 %5922 }
 0x3bf   : > { %v8588_v47 = vpop.permute.xlu2 %5897 }
 0x3c1   : > { %5572 = vmatmul.msk.f32.vlgmr.msra.gmra.mxu0 %vm1585_vm2, %v9861_v22 }
 0x3c2   : > { %3697 = vmatpush.msra.mxu0 %v5860_v34 }
 0x3c4   : > { %3698 = vmatpush.msra.mxu0 %v5865_v1 }
 0x3c9   : > { %5573 = vmatmul.msk.f32.gmra.mxu0 %vm1585_vm2, %v9863_v4 }
 0x3cb   : > { %5927 = vrot.lane.b32.xlu2 %v7977_v10, %s6504_s15 }
 0x3dc   : > { %v2601_v37 = vpop.xlane.xlu2 %2600 }
 0x3dd   : > { %v2639_v59 = vsub.f32 %v8469_v62, %v2601_v37 }
 0x3df   : > { %v2659_v18 = vmul.f32 1.442695, %v2639_v59 }
 0x3e1   : > { %5978 = vpow2.f32 %v2659_v18 }
 0x3e4   : > { %v2604_v3 = vpop.xlane.xlu0 %2603 }
 0x3e5   : > { %v2640_v19 = vsub.f32 %v8478_v56, %v2604_v3  ;;  %v9866_v56 = vld [vmem:[#allocation74_spill] sm:$0xff] }
 0x3e7   : > { %v2622_v28 = vpop.xlane.xlu1 %2621  ;;  %v5979_v34 = vpop.eup %5978  ;;  %v2661_v22 = vmul.f32 1.442695, %v2640_v19 }
 0x3e8   : > { %v2646_v1 = vsub.f32 %v8476_v31, %v2622_v28  ;;  %5542 = vmatmul.msk.f32.vlgmr.msra.gmra.mxu2 %vm1866_vm3, %v5979_v34  ;;  %v2695_v10 = vsel %vm1866_vm3, %v5979_v34, 0.0 }
 0x3e9   : > { %5980 = vpow2.f32 %v2661_v22  ;;  %5562 = vmatpush.xpose.msk.msra.mxu2 %vm1585_vm2, %v9865_v54  ;;  %2696 = vadd.xlane.f32.xlu0 %v2695_v10  ;;  %v2710_v54 = vsel %vm1866_vm3, %v8545_v11, 0.0  ;;  %v9869_v11 = vld [vmem:[#allocation51_spill] sm:$0xff] }
 0x3ea   : > { %v2673_v4 = vmul.f32 1.442695, %v2646_v1 }
 0x3ec   : > { %5982 = vpow2.f32 %v2673_v4  ;;  %v2625_v62 = vpop.xlane.xlu0 %2624  ;;  %v5859_v4 = vunpack.i.l.bf16 %v8175_v6 }
 0x3ed   : > { %v2647_v37 = vsub.f32 %v8489_v2, %v2625_v62  ;;  %5563 = vmatpush.xpose.msk.msra.mxu2 %vm1585_vm2, %v9866_v56  ;;  %v9868_v62 = vld [vmem:[#allocation86_spill] sm:$0xff]  ;;  %v9871_v56 = vld [vmem:[#allocation81_spill] sm:$0xff] }
 0x3ef   : > { %v5981_v59 = vpop.eup %5980  ;;  %v2675_v18 = vmul.f32 1.442695, %v2647_v37 }
 0x3f0   : > { %5543 = vmatmul.msk.f32.gmra.mxu2 %vm1866_vm3, %v5981_v59  ;;  %v2698_v31 = vsel %vm1866_vm3, %v5981_v59, 0.0 }
 0x3f1   : > { %5984 = vpow2.f32 %v2675_v18  ;;  %2699 = vadd.xlane.f32.xlu1 %v2698_v31 }
 0x3f2   : > { %v8606_v3 = vpop.eup %5982 }
 0x3f3   : > { %5549 = vmatmul.msk.f32.gmra.mxu1 %vm1866_vm3, %v8606_v3 }
 0x3f4   : > { %2711 = vadd.xlane.f32.xlu2 %v2710_v54  ;;  %v2628_v2 = vpop.xlane.xlu1 %2627 }
 0x3f5   : > { %v2648_v19 = vsub.f32 %v8501_v38, %v2628_v2  ;;  %v2610_v28 = vpop.xlane.xlu0 %2609  ;;  %v5864_v38 = vunpack.i.l.bf16 %v9862_v33  ;;  %v9873_v33 = vld [vmem:[#allocation61_spill] sm:$0xff] }
 0x3f6   : > { %v2642_v34 = vsub.f32 %v8497_v26, %v2610_v28  ;;  %v9875_v2 = vld [vmem:[#allocation97_spill] sm:$0xff]  ;;  %v9876_v28 = vld [vmem:[#allocation38_spill] sm:$0xff] }
 0x3f7   : > { %v8614_v22 = vpop.eup %5984  ;;  %v2677_v1 = vmul.f32 1.442695, %v2648_v19  ;;  %v5869_v19 = vunpack.i.l.bf16 %v9875_v2 }
 0x3f8   : > { %9867 = vst [vmem:[#allocation42_spill] sm:$0xff] %v8614_v22  ;;  %v2665_v10 = vmul.f32 1.442695, %v2642_v34  ;;  %5550 = vmatmul.msk.f32.vlgmr.msrb.gmra.mxu2 %vm1866_vm3, %v8614_v22  ;;  %v5870_v34 = vunpack.i.h.bf16 %v9875_v2 }
 0x3f9   : > { %5986 = vpow2.f32 %v2677_v1  ;;  %5578 = vmatpush.xpose.msk.msrb.mxu2 %vm1585_vm2, %v9868_v62  ;;  %v5874_v1 = vunpack.i.l.bf16 %v8179_v55  ;;  %v5875_v62 = vunpack.i.h.bf16 %v8179_v55 }
 0x3fa   : > { %5988 = vpow2.f32 %v2665_v10  ;;  %v2778_v10 = vpop.f32.mrf.mxu0 }
 0x3fb   : > { %5560 = vmatmul.msk.f32.vlgmr.msra.gmra.mxu1 %vm1585_vm2, %v9869_v11 }
 0x3fc   : > { %3592 = vmatpush.msra.mxu1 %v5859_v4  ;;  %v8624_v26 = vpop.xlane.xlu1 %1967  ;;  %v9877_v4 = vld [vmem:[#allocation57_spill] sm:$0xff] }
 0x3fd   : > { %v8626_v37 = vpop.xlane.xlu0 %1964  ;;  %5579 = vmatpush.xpose.msk.msrb.mxu2 %vm1585_vm2, %v9871_v56  ;;  %v9878_v56 = vld [vmem:[#allocation43_spill] sm:$0xff] }
 0x3fe   : > { %3593 = vmatpush.msra.mxu1 %v5864_v38  ;;  %9870 = vst [vmem:[#allocation48_spill] sm:$0xff] %v8626_v37 }
 0x3ff   : > { %v8630_v6 = vpop.eup %5986 }
 0x400   : > { %9872 = vst [vmem:[#allocation58_spill] sm:$0xff] %v8630_v6  ;;  %v8632_v59 = vpop.eup %5988  ;;  %5551 = vmatmul.msk.f32.gmra.mxu2 %vm1866_vm3, %v8630_v6  ;;  %v9884_v6 = vld [vmem:[#allocation49_spill] sm:$0xff] }
 0x401   : > { %v2704_v18 = vsel %vm1866_vm3, %v8632_v59, 0.0 }
 0x402   : > { %2705 = vadd.xlane.f32.xlu0 %v2704_v18  ;;  %v2781_v18 = vpop.f32.mrf.mxu0 }
 0x403   : > { %5561 = vmatmul.msk.f32.gmra.mxu1 %vm1585_vm2, %v9873_v33  ;;  %v9879_v33 = vld [vmem:[#allocation67_spill] sm:$0xff] }
 0x404   : > { %v8640_v31 = vpop.xlane.xlu1 %1970 }
 0x405   : > { %9874 = vst [vmem:[#allocation40_spill] sm:$0xff] %v8640_v31  ;;  %v8642_v54 = vpop.xlane.xlu0 %2633 }
 0x408   : > { %5564 = vmatmul.msk.f32.vlgmr.msra.gmra.mxu2 %vm1585_vm2, %v9876_v28  ;;  %v8660_v28 = vpop.permute.xlu2 %5912 }
 0x409   : > { %3627 = vmatpush.msra.mxu2 %v5869_v19 }
 0x40b   : > { %5576 = vmatmul.msk.f32.vlgmr.msrb.gmra.mxu1 %vm1585_vm2, %v9877_v4  ;;  %3628 = vmatpush.msra.mxu2 %v5870_v34  ;;  %v9881_v4 = vld [vmem:[#allocation39_spill] sm:$0xff] }
 0x40c   : > { %3732 = vmatpush.msrb.mxu1 %v5874_v1  ;;  %v8652_v11 = vpop.xlane.xlu1 %1973  ;;  %v5880_v1 = vunpack.i.h.bf16 %v8107_v23 }
 0x40d   : > { %v2685_v38 = vpop.xlane.xlu0 %2684 }
 0x40e   : > { %3733 = vmatpush.msrb.mxu1 %v5875_v62  ;;  %5990 = vrcp.f32 %v2685_v38  ;;  %v5885_v62 = vunpack.i.h.bf16 %v8510_v58 }
 0x410   : > { %5565 = vmatmul.msk.f32.gmra.mxu2 %vm1585_vm2, %v9878_v56  ;;  %v8667_v56 = vpop.f32.mrf.mxu0 }
 0x411   : > { %9882 = vst [vmem:[#allocation55_spill] sm:$0xff] %v8667_v56 }
 0x413   : > { %5577 = vmatmul.msk.f32.gmra.mxu1 %vm1585_vm2, %v9879_v33 }
 0x414   : > { %v5991_v2 = vpop.eup %5990  ;;  %v8658_v19 = vpop.xlane.xlu1 %1976 }
 0x415   : > { %9880 = vst [vmem:[#allocation50_spill] sm:$0xff] %v8658_v19  ;;  %v2688_v55 = vpop.xlane.xlu0 %2687  ;;  %v3043_v34 = vmul.f32 %v5991_v2, %v2778_v10 }
 0x416   : > { %5992 = vrcp.f32 %v2688_v55 }
 0x417   : > { %4611 = vrot.lane.b32.xlu1 %v3043_v34, %s6505_s19 }
 0x418   : > { %5580 = vmatmul.msk.f32.vlgmr.msrb.gmra.mxu2 %vm1585_vm2, %v9881_v4 }
 0x419   : > { %3767 = vmatpush.msrb.mxu2 %v5880_v1 }
 0x41b   : > { %3768 = vmatpush.msrb.mxu2 %v5885_v62 }
 0x41c   : > { %v5993_v38 = vpop.eup %5992  ;;  %v2691_v33 = vpop.xlane.xlu1 %2690 }
 0x41d   : > { %5994 = vrcp.f32 %v2691_v33  ;;  %v8669_v31 = vpop.xlane.xlu0 %2708  ;;  %v2607_v10 = vpop.xlane.xlu2 %2606  ;;  %v3044_v2 = vmul.f32 %v5993_v38, %v2781_v18 }
 0x41e   : > { %9883 = vst [vmem:[#allocation59_spill] sm:$0xff] %v8669_v31  ;;  %v2641_v55 = vsub.f32 %v8481_v5, %v2607_v10  ;;  %v2815_v4 = vpop.f32.mrf.mxu1  ;;  %v9886_v10 = vld [vmem:[#allocation85_spill] sm:$0xff] }
 0x41f   : > { %4613 = vrot.lane.b32.xlu1 %v3044_v2, %s6505_s19 }
 0x420   : > { %v2663_v34 = vmul.f32 1.442695, %v2641_v55  ;;  %5581 = vmatmul.msk.f32.gmra.mxu2 %vm1585_vm2, %v9884_v6 }
 0x422   : > { %5996 = vpow2.f32 %v2663_v34 }
 0x423   : > { %v5995_v1 = vpop.eup %5994 }
 0x424   : > { %v3045_v62 = vmul.f32 %v5995_v1, %v2815_v4  ;;  %v9887_v4 = vld [vmem:[#allocation80_spill] sm:$0xff]  ;;  %v2650_v1 = vsub.f32 %v8520_v36, %v8642_v54 }
 0x425   : > { %v2694_v56 = vpop.xlane.xlu0 %2693  ;;  %v9890_v36 = vld [vmem:[#allocation92_spill] sm:$0xff] }
 0x426   : > { %v8675_v22 = vpop.f32.mrf.mxu0  ;;  %5998 = vrcp.f32 %v2694_v56  ;;  %v2631_v33 = vpop.xlane.xlu2 %2630 }
 0x427   : > { %9885 = vst [vmem:[#allocation75_spill] sm:$0xff] %v8675_v22  ;;  %4615 = vrot.lane.b32.xlu1 %v3045_v62, %s6505_s19  ;;  %v2649_v38 = vsub.f32 %v8512_v42, %v2631_v33  ;;  %v2818_v2 = vpop.f32.mrf.mxu1  ;;  %v2681_v33 = vmul.f32 1.442695, %v2650_v1  ;;  %v9893_v1 = vld [vmem:[#allocation64_spill] sm:$0xff] }
 0x428   : > { %v5997_v18 = vpop.eup %5996 }
 0x429   : > { %5544 = vmatmul.msk.f32.vlgmr.msrb.gmra.mxu3 %vm1866_vm3, %v5997_v18  ;;  %v2701_v5 = vsel %vm1866_vm3, %v5997_v18, 0.0  ;;  %v2679_v56 = vmul.f32 1.442695, %v2649_v38 }
 0x42a   : > { %5566 = vmatpush.xpose.msk.msrb.mxu3 %vm1585_vm2, %v9886_v10  ;;  %2702 = vadd.xlane.f32.xlu2 %v2701_v5 }
 0x42b   : > { %6000 = vpow2.f32 %v2679_v56  ;;  %v5879_v56 = vunpack.i.l.bf16 %v8107_v23  ;;  %v9895_v23 = vld [vmem:[#allocation69_spill] sm:$0xff] }
 0x42c   : > { %v5999_v6 = vpop.eup %5998  ;;  %6002 = vpow2.f32 %v2681_v33  ;;  %v5889_v33 = vunpack.i.l.bf16 %v8381_v0 }
 0x42d   : > { %v8685_v34 = vmul.f32 %v5999_v6, %v2818_v2 }
 0x42e   : > { %v8683_v55 = vpop.f32.mrf.mxu0  ;;  %5567 = vmatpush.xpose.msk.msrb.mxu3 %vm1585_vm2, %v9887_v4  ;;  %v9892_v4 = vld [vmem:[#allocation54_spill] sm:$0xff] }
 0x42f   : > { %v3371_v42 = vsel %vm1866_vm3, %v8683_v55, -inf }
 0x431   : > { %5545 = vmatmul.msk.f32.gmra.mxu3 %vm1866_vm3, %v8632_v59  ;;  %v8699_v5 = vpop.eup %6000  ;;  %v9889_v59 = vld [vmem:[#allocation95_spill] sm:$0xff] }
 0x432   : > { %3372 = vmax.xlane.f32.xlu2 %v3371_v42  ;;  %9888 = vst [vmem:[#allocation45_spill] sm:$0xff] %v8699_v5  ;;  %v8711_v10 = vpop.eup %6002  ;;  %v5884_v42 = vunpack.i.l.bf16 %v8510_v58  ;;  %v8731_v58 = vpop.f32.mrf.mxu1 }
 0x433   : > { %9891 = vst [vmem:[#allocation65_spill] sm:$0xff] %v8711_v10 }
 0x434   : > { %9896 = vst [vmem:[#allocation62_spill] sm:$0xff] %v8731_v58  ;;  %v8762_v58 = vpop.permute.xlu2 %5927 }
 0x435   : > { %9902 = vst [vmem:[#allocation36_spill] sm:$0xff] %v8762_v58 }
 0x436   : > { %v8695_v62 = vpop.f32.mrf.mxu0 }
 0x437   : > { %v3374_v18 = vsel %vm1866_vm3, %v8695_v62, -inf }
 0x438   : > { %3375 = vmax.xlane.f32.xlu0 %v3374_v18  ;;  %v9894_v18 = vld [vmem:[#allocation60_spill] sm:$0xff] }
 0x439   : > { %5552 = vmatmul.msk.f32.vlgmr.msra.gmra.mxu3 %vm1866_vm3, %v8699_v5 }
 0x43a   : > { %5582 = vmatpush.xpose.msk.msra.mxu3 %vm1585_vm2, %v9889_v59  ;;  %v5890_v59 = vunpack.i.h.bf16 %v8381_v0 }
 0x43e   : > { %v8705_v38 = vpop.f32.mrf.mxu0  ;;  %5583 = vmatpush.xpose.msk.msra.mxu3 %vm1585_vm2, %v9890_v36 }
 0x43f   : > { %v3395_v54 = vsel %vm1866_vm3, %v8705_v38, -inf }
 0x440   : > { %3396 = vmax.xlane.f32.xlu2 %v3395_v54 }
 0x441   : > { %5553 = vmatmul.msk.f32.gmra.mxu3 %vm1866_vm3, %v8711_v10 }
 0x446   : > { %v8715_v6 = vpop.f32.mrf.mxu0 }
 0x447   : > { %v3398_v2 = vsel %vm1866_vm3, %v8715_v6, -inf }
 0x448   : > { %3399 = vmax.xlane.f32.xlu0 %v3398_v2 }
 0x449   : > { %5568 = vmatmul.msk.f32.vlgmr.msrb.gmra.mxu3 %vm1585_vm2, %v9892_v4 }
 0x44a   : > { %3662 = vmatpush.msrb.mxu3 %v5879_v56 }
 0x44c   : > { %3663 = vmatpush.msrb.mxu3 %v5884_v42 }
 0x451   : > { %5569 = vmatmul.msk.f32.gmra.mxu3 %vm1585_vm2, %v9893_v1 }
 0x459   : > { %5584 = vmatmul.msk.f32.vlgmr.msra.gmra.mxu3 %vm1585_vm2, %v9894_v18 }
 0x45a   : > { %3802 = vmatpush.msra.mxu3 %v5889_v33 }
 0x45c   : > { %3803 = vmatpush.msra.mxu3 %v5890_v59  ;;  %v2697_v36 = vpop.xlane.xlu0 %2696 }
 0x45d   : > { %6004 = vrcp.f32 %v2697_v36 }
 0x461   : > { %5585 = vmatmul.msk.f32.gmra.mxu3 %vm1585_vm2, %v9895_v23 }
 0x463   : > { %v6005_v2 = vpop.eup %6004 }
 0x464   : > { %v2700_v54 = vpop.xlane.xlu1 %2699 }
 0x465   : > { %6006 = vrcp.f32 %v2700_v54 }
 0x466   : > { %6008 = vrcp.f32 %v8624_v26 }
 0x467   : > { %v8776_v31 = vpop.xlane.xlu2 %2711 }
 0x468   : > { %9904 = vst [vmem:[#allocation87_spill] sm:$0xff] %v8776_v31 }
 0x46b   : > { %v2852_v56 = vpop.f32.mrf.mxu2  ;;  %v6007_v1 = vpop.eup %6006 }
 0x46c   : > { %v8733_v4 = vmul.f32 %v6005_v2, %v2852_v56 }
 0x470   : > { %v8735_v42 = vpop.f32.mrf.mxu1 }
 0x471   : > { %9897 = vst [vmem:[#allocation91_spill] sm:$0xff] %v8735_v42  ;;  %v6009_v42 = vpop.eup %6008 }
 0x472   : > { %v2260_v26 = vmul.f32 %v6009_v42, %v8292_v63 }
 0x473   : > { %v2855_v18 = vpop.f32.mrf.mxu2 }
 0x474   : > { %v8737_v0 = vmul.f32 %v6007_v1, %v2855_v18 }
 0x476   : > { %9898 = vst [vmem:[#allocation32_spill] sm:$0xff] %v8737_v0  ;;  %v2706_v0 = vpop.xlane.xlu0 %2705 }
 0x478   : > { %v8739_v33 = vpop.f32.mrf.mxu1 }
 0x479   : > { %v3377_v59 = vsel %vm1866_vm3, %v8739_v33, -inf }
 0x47a   : > { %3378 = vmax.xlane.f32.xlu1 %v3377_v59 }
 0x47b   : > { %v8743_v23 = vpop.f32.mrf.mxu2 }
 0x47c   : > { %9899 = vst [vmem:[#allocation30_spill] sm:$0xff] %v8743_v23 }
 0x480   : > { %v8745_v36 = vpop.f32.mrf.mxu1 }
 0x481   : > { %v3380_v2 = vsel %vm1866_vm3, %v8745_v36, -inf }
 0x482   : > { %3381 = vmax.xlane.f32.xlu2 %v3380_v2 }
 0x483   : > { %v8749_v54 = vpop.f32.mrf.mxu2 }
 0x484   : > { %9900 = vst [vmem:[#allocation73_spill] sm:$0xff] %v8749_v54 }
 0x488   : > { %v8752_v56 = vpop.f32.mrf.mxu1 }
 0x489   : > { %v3401_v1 = vsel %vm1866_vm3, %v8752_v56, -inf  ;;  %v8756_v18 = vpop.permute.xlu1 %4611 }
 0x48a   : > { %9901 = vst [vmem:[#allocation70_spill] sm:$0xff] %v8756_v18  ;;  %3402 = vmax.xlane.f32.xlu1 %v3401_v1 }
 0x48b   : > { %v8758_v59 = vpop.f32.mrf.mxu2 }
 0x48c   : > { %v3383_v23 = vsel %vm1866_vm3, %v8758_v59, -inf }
 0x48d   : > { %3384 = vmax.xlane.f32.xlu0 %v3383_v23 }
 0x490   : > { %v8764_v2 = vpop.f32.mrf.mxu1 }
 0x491   : > { %v3404_v54 = vsel %vm1866_vm3, %v8764_v2, -inf  ;;  %v4614_v10 = vpop.permute.xlu1 %4613 }
 0x492   : > { %3405 = vmax.xlane.f32.xlu2 %v3404_v54  ;;  %v8770_v1 = vsel %vm1585_vm2, %v2260_v26, %v4614_v10  ;;  %v2713_v10 = vsel %vm1866_vm3, %v8557_v39, 0.0 }
 0x493   : > { %9903 = vst [vmem:[#allocation90_spill] sm:$0xff] %v8770_v1  ;;  %v8772_v22 = vpop.f32.mrf.mxu2 }
 0x494   : > { %v3386_v5 = vsel %vm1866_vm3, %v8772_v22, -inf }
 0x495   : > { %3387 = vmax.xlane.f32.xlu0 %v3386_v5 }
 0x49b   : > { %v8778_v23 = vpop.f32.mrf.mxu2 }
 0x49c   : > { %v3407_v63 = vsel %vm1866_vm3, %v8778_v23, -inf }
 0x49d   : > { %3408 = vmax.xlane.f32.xlu0 %v3407_v63  ;;  %v2703_v42 = vpop.xlane.xlu2 %2702 }
 0x49e   : > { %6010 = vrcp.f32 %v2703_v42 }
 0x4a3   : > { %v8785_v18 = vpop.f32.mrf.mxu2 }
 0x4a4   : > { %v6011_v37 = vpop.eup %6010  ;;  %v3410_v63 = vsel %vm1866_vm3, %v8785_v18, -inf }
 0x4a5   : > { %2714 = vadd.xlane.f32.xlu0 %v2713_v10  ;;  %v3373_v54 = vpop.xlane.xlu2 %3372 }
 0x4a6   : > { %v3419_v26 = vsub.f32 %v8683_v55, %v3373_v54 }
 0x4a8   : > { %v3435_v1 = vmul.f32 1.442695, %v3419_v26 }
 0x4aa   : > { %6012 = vpow2.f32 %v3435_v1 }
 0x4ab   : > { %v3376_v5 = vpop.xlane.xlu0 %3375  ;;  %6014 = vrcp.f32 %v2706_v0 }
 0x4ac   : > { %v3420_v31 = vsub.f32 %v8695_v62, %v3376_v5  ;;  %v2889_v19 = vpop.f32.mrf.mxu3 }
 0x4ad   : > { %v8790_v58 = vmul.f32 %v6011_v37, %v2889_v19  ;;  %3411 = vmax.xlane.f32.xlu0 %v3410_v63  ;;  %v9905_v37 = vld [vmem:[#allocation96_spill] sm:$0xff] }
 0x4ae   : > { %v3437_v39 = vmul.f32 1.442695, %v3420_v31 }
 0x4b0   : > { %v6013_v42 = vpop.eup %6012  ;;  %6016 = vpow2.f32 %v3437_v39 }
 0x4b1   : > { %5586 = vmatmul.msk.f32.vlgmr.msrb.gmra.mxu0 %vm1866_vm3, %v6013_v42  ;;  %v6015_v1 = vpop.eup %6014 }
 0x4b2   : > { %5602 = vmatpush.xpose.msk.msrb.mxu0 %vm1585_vm2, %v8253_v12 }
 0x4b3   : > { %v3397_v55 = vpop.xlane.xlu2 %3396 }
 0x4b4   : > { %v3427_v62 = vsub.f32 %v8705_v38, %v3397_v55  ;;  %v2892_v10 = vpop.f32.mrf.mxu3 }
 0x4b5   : > { %v8796_v54 = vmul.f32 %v6015_v1, %v2892_v10  ;;  %v9906_v1 = vld [vmem:[#allocation98_spill] sm:$0xff] }
 0x4b6   : > { %v3451_v26 = vmul.f32 1.442695, %v3427_v62  ;;  %5603 = vmatpush.xpose.msk.msrb.mxu0 %vm1585_vm2, %v9905_v37  ;;  %v8800_v19 = vpop.eup %6016  ;;  %v5894_v62 = vunpack.i.l.bf16 %v8441_v40 }
 0x4b8   : > { %6018 = vpow2.f32 %v3451_v26 }
 0x4b9   : > { %5587 = vmatmul.msk.f32.gmra.mxu0 %vm1866_vm3, %v8800_v19 }
 0x4bb   : > { %v3400_v31 = vpop.xlane.xlu0 %3399 }
 0x4bc   : > { %v3428_v12 = vsub.f32 %v8715_v6, %v3400_v31  ;;  %v8805_v0 = vpop.f32.mrf.mxu3  ;;  %v5914_v31 = vunpack.i.l.bf16 %v8660_v28 }
 0x4be   : > { %v3453_v38 = vmul.f32 1.442695, %v3428_v12  ;;  %v6019_v5 = vpop.eup %6018  ;;  %v8837_v12 = vpop.permute.xlu1 %4615 }
 0x4c0   : > { %6020 = vpow2.f32 %v3453_v38 }
 0x4c1   : > { %5594 = vmatmul.msk.f32.vlgmr.msra.gmra.mxu0 %vm1866_vm3, %v6019_v5 }
 0x4c2   : > { %5618 = vmatpush.xpose.msk.msra.mxu0 %vm1585_vm2, %v8391_v51  ;;  %v5895_v51 = vunpack.i.h.bf16 %v8441_v40  ;;  %v5915_v40 = vunpack.i.h.bf16 %v8660_v28 }
 0x4c4   : > { %v8810_v63 = vpop.f32.mrf.mxu3 }
 0x4c6   : > { %5619 = vmatpush.xpose.msk.msra.mxu0 %vm1585_vm2, %v8417_v45  ;;  %v6021_v39 = vpop.eup %6020 }
 0x4c9   : > { %5595 = vmatmul.msk.f32.gmra.mxu0 %vm1866_vm3, %v6021_v39 }
 0x4cc   : > { %v8815_v55 = vpop.f32.mrf.mxu3 }
 0x4cd   : > { %v3389_v6 = vsel %vm1866_vm3, %v8815_v55, -inf }
 0x4ce   : > { %3390 = vmax.xlane.f32.xlu2 %v3389_v6 }
 0x4d1   : > { %5604 = vmatmul.msk.f32.vlgmr.msrb.gmra.mxu0 %vm1585_vm2, %v9906_v1 }
 0x4d2   : > { %4325 = vmatpush.msrb.mxu0 %v5894_v62 }
 0x4d4   : > { %4326 = vmatpush.msrb.mxu0 %v5895_v51  ;;  %v8823_v10 = vpop.f32.mrf.mxu3 }
 0x4d5   : > { %v3392_v45 = vsel %vm1866_vm3, %v8823_v10, -inf }
 0x4d6   : > { %3393 = vmax.xlane.f32.xlu1 %v3392_v45  ;;  %v3491_v45 = vsel %vm1866_vm3, %v6019_v5, 0.0 }
 0x4d9   : > { %5605 = vmatmul.msk.f32.gmra.mxu0 %vm1585_vm2, %v8351_v29 }
 0x4dc   : > { %v8829_v26 = vpop.f32.mrf.mxu3 }
 0x4dd   : > { %v3413_v37 = vsel %vm1866_vm3, %v8829_v26, -inf }
 0x4de   : > { %3414 = vmax.xlane.f32.xlu2 %v3413_v37 }
 0x4e1   : > { %5620 = vmatmul.msk.f32.vlgmr.msra.gmra.mxu0 %vm1585_vm2, %v8540_v13  ;;  %v3467_v13 = vsel %vm1866_vm3, %v6013_v42, 0.0 }
 0x4e2   : > { %4465 = vmatpush.msra.mxu0 %v5914_v31 }
 0x4e4   : > { %4466 = vmatpush.msra.mxu0 %v5915_v40  ;;  %v8839_v38 = vpop.f32.mrf.mxu3  ;;  %v3494_v40 = vsel %vm1866_vm3, %v6021_v39, 0.0 }
 0x4e5   : > { %v3416_v29 = vsel %vm1866_vm3, %v8839_v38, -inf }
 0x4e6   : > { %3417 = vmax.xlane.f32.xlu2 %v3416_v29 }
 0x4e9   : > { %5621 = vmatmul.msk.f32.gmra.mxu0 %vm1585_vm2, %v8397_v30 }
 0x4ed   : > { %v3379_v6 = vpop.xlane.xlu1 %3378 }
 0x4ee   : > { %v3421_v62 = vsub.f32 %v8739_v33, %v3379_v6  ;;  %3468 = vadd.xlane.f32.xlu2 %v3467_v13 }
 0x4ef   : > { %4617 = vrot.lane.b32.xlu1 %v8685_v34, %s6505_s19 }
 0x4f0   : > { %v3439_v28 = vmul.f32 1.442695, %v3421_v62 }
 0x4f2   : > { %6022 = vpow2.f32 %v3439_v28  ;;  %v2716_v28 = vsel %vm1866_vm3, %v8606_v3, 0.0 }
 0x4f5   : > { %v3382_v1 = vpop.xlane.xlu2 %3381 }
 0x4f6   : > { %v3422_v51 = vsub.f32 %v8745_v36, %v3382_v1  ;;  %3492 = vadd.xlane.f32.xlu2 %v3491_v45 }
 0x4f8   : > { %v6023_v37 = vpop.eup %6022  ;;  %v3441_v31 = vmul.f32 1.442695, %v3422_v51 }
 0x4f9   : > { %5588 = vmatmul.msk.f32.vlgmr.msra.gmra.mxu1 %vm1866_vm3, %v6023_v37  ;;  %v3473_v30 = vsel %vm1866_vm3, %v6023_v37, 0.0 }
 0x4fa   : > { %6024 = vpow2.f32 %v3441_v31  ;;  %5606 = vmatpush.xpose.msk.msra.mxu1 %vm1585_vm2, %v8296_v17  ;;  %3474 = vadd.xlane.f32.xlu0 %v3473_v30  ;;  %v1978_v31 = vsel %vm1866_vm3, %v8282_v16, 0.0  ;;  %v3470_v16 = vsel %vm1866_vm3, %v8800_v19, 0.0 }
 0x4fd   : > { %v3403_v33 = vpop.xlane.xlu1 %3402 }
 0x4fe   : > { %5607 = vmatpush.xpose.msk.msra.mxu1 %vm1585_vm2, %v8317_v52  ;;  %v3429_v34 = vsub.f32 %v8752_v56, %v3403_v33 }
 0x500   : > { %v8858_v36 = vpop.eup %6024  ;;  %v3455_v42 = vmul.f32 1.442695, %v3429_v34  ;;  %v3385_v5 = vpop.xlane.xlu0 %3384  ;;  %v5919_v34 = vunpack.i.l.bf16 %v8590_v35 }
 0x501   : > { %5589 = vmatmul.msk.f32.gmra.mxu1 %vm1866_vm3, %v8858_v36  ;;  %v3423_v29 = vsub.f32 %v8758_v59, %v3385_v5 }
 0x502   : > { %6026 = vpow2.f32 %v3455_v42  ;;  %3495 = vadd.xlane.f32.xlu0 %v3494_v40 }
 0x503   : > { %v3443_v17 = vmul.f32 1.442695, %v3423_v29 }
 0x505   : > { %v3406_v6 = vpop.xlane.xlu2 %3405  ;;  %6028 = vpow2.f32 %v3443_v17 }
 0x506   : > { %v3430_v52 = vsub.f32 %v8764_v2, %v3406_v6 }
 0x508   : > { %v6027_v62 = vpop.eup %6026  ;;  %v3457_v56 = vmul.f32 1.442695, %v3430_v52  ;;  %v3388_v13 = vpop.xlane.xlu0 %3387 }
 0x509   : > { %5596 = vmatmul.msk.f32.vlgmr.msrb.gmra.mxu1 %vm1866_vm3, %v6027_v62  ;;  %v3497_v1 = vsel %vm1866_vm3, %v6027_v62, 0.0  ;;  %v3424_v39 = vsub.f32 %v8772_v22, %v3388_v13 }
 0x50a   : > { %6030 = vpow2.f32 %v3457_v56  ;;  %5622 = vmatpush.xpose.msk.msrb.mxu1 %vm1585_vm2, %v8425_v25  ;;  %2717 = vadd.xlane.f32.xlu0 %v2716_v28 }
 0x50b   : > { %3498 = vadd.xlane.f32.xlu2 %v3497_v1  ;;  %v8872_v59 = vpop.eup %6028  ;;  %v3445_v2 = vmul.f32 1.442695, %v3424_v39  ;;  %v9907_v39 = vld [vmem:[#allocation82_spill] sm:$0xff] }
 0x50c   : > { %5590 = vmatmul.msk.f32.vlgmr.msra.gmra.mxu2 %vm1866_vm3, %v8872_v59 }
 0x50d   : > { %6032 = vpow2.f32 %v3445_v2  ;;  %5610 = vmatpush.xpose.msk.msra.mxu2 %vm1585_vm2, %v8367_v44  ;;  %v5899_v44 = vunpack.i.l.bf16 %v8588_v47  ;;  %v5909_v2 = vunpack.i.l.bf16 %v9907_v39 }
 0x50e   : > { %5623 = vmatpush.xpose.msk.msrb.mxu1 %vm1585_vm2, %v8555_v21 }
 0x510   : > { %v6031_v3 = vpop.eup %6030  ;;  %v3409_v22 = vpop.xlane.xlu0 %3408 }
 0x511   : > { %5597 = vmatmul.msk.f32.gmra.mxu1 %vm1866_vm3, %v6031_v3  ;;  %v3500_v25 = vsel %vm1866_vm3, %v6031_v3, 0.0  ;;  %v3431_v51 = vsub.f32 %v8778_v23, %v3409_v22  ;;  %5611 = vmatpush.xpose.msk.msra.mxu2 %vm1585_vm2, %v8518_v48  ;;  %v5900_v23 = vunpack.i.h.bf16 %v8588_v47 }
 0x513   : > { %3501 = vadd.xlane.f32.xlu2 %v3500_v25  ;;  %v6033_v45 = vpop.eup %6032  ;;  %v3459_v37 = vmul.f32 1.442695, %v3431_v51  ;;  %v5910_v25 = vunpack.i.h.bf16 %v9907_v39  ;;  %v9909_v51 = vld [vmem:[#allocation31_spill] sm:$0xff]  ;;  %v9914_v39 = vld [vmem:[#allocation77_spill] sm:$0xff] }
 0x514   : > { %5591 = vmatmul.msk.f32.gmra.mxu2 %vm1866_vm3, %v6033_v45  ;;  %v3482_v48 = vsel %vm1866_vm3, %v6033_v45, 0.0  ;;  %v1981_v45 = vsel %vm1866_vm3, %v9909_v51, 0.0 }
 0x515   : > { %6034 = vpow2.f32 %v3459_v37 }
 0x518   : > { %v8887_v21 = vpop.xlane.xlu0 %2714 }
 0x519   : > { %5608 = vmatmul.msk.f32.vlgmr.msra.gmra.mxu1 %vm1585_vm2, %v8334_v7  ;;  %1979 = vadd.xlane.f32.xlu1 %v1978_v31 }
 0x51a   : > { %4360 = vmatpush.msra.mxu1 %v5899_v44 }
 0x51b   : > { %3483 = vadd.xlane.f32.xlu2 %v3482_v48  ;;  %v8895_v30 = vpop.eup %6034 }
 0x51c   : > { %4361 = vmatpush.msra.mxu1 %v5900_v23  ;;  %5598 = vmatmul.msk.f32.vlgmr.msrb.gmra.mxu2 %vm1866_vm3, %v8895_v30 }
 0x51d   : > { %5626 = vmatpush.xpose.msk.msrb.mxu2 %vm1585_vm2, %v8407_v49  ;;  %v3476_v49 = vsel %vm1866_vm3, %v8858_v36, 0.0 }
 0x520   : > { %v3412_v7 = vpop.xlane.xlu0 %3411 }
 0x521   : > { %5609 = vmatmul.msk.f32.gmra.mxu1 %vm1585_vm2, %v8389_v27  ;;  %v3432_v47 = vsub.f32 %v8785_v18, %v3412_v7  ;;  %5627 = vmatpush.xpose.msk.msrb.mxu2 %vm1585_vm2, %v8572_v53  ;;  %v5920_v27 = vunpack.i.h.bf16 %v8590_v35  ;;  %v5904_v53 = vunpack.i.l.bf16 %v8456_v9  ;;  %v9910_v7 = vld [vmem:[#allocation36_spill] sm:$0xff] }
 0x522   : > { %3471 = vadd.xlane.f32.xlu1 %v3470_v16  ;;  %v5929_v16 = vunpack.i.l.bf16 %v9910_v7 }
 0x523   : > { %v3461_v33 = vmul.f32 1.442695, %v3432_v47 }
 0x525   : > { %6036 = vpow2.f32 %v3461_v33 }
 0x529   : > { %5624 = vmatmul.msk.f32.vlgmr.msrb.gmra.mxu1 %vm1585_vm2, %v8431_v50  ;;  %v5905_v50 = vunpack.i.h.bf16 %v8456_v9  ;;  %v5925_v9 = vunpack.i.h.bf16 %v8593_v57 }
 0x52a   : > { %4500 = vmatpush.msrb.mxu1 %v5919_v34  ;;  %3477 = vadd.xlane.f32.xlu1 %v3476_v49  ;;  %v9911_v34 = vld [vmem:[#allocation93_spill] sm:$0xff]  ;;  %v5930_v49 = vunpack.i.h.bf16 %v9910_v7 }
 0x52b   : > { %v8914_v19 = vpop.eup %6036 }
 0x52c   : > { %4501 = vmatpush.msrb.mxu1 %v5920_v27  ;;  %5599 = vmatmul.msk.f32.gmra.mxu2 %vm1866_vm3, %v8914_v19 }
 0x52e   : > { %v3560_v36 = vpop.f32.mrf.mxu0 }
 0x531   : > { %5625 = vmatmul.msk.f32.gmra.mxu1 %vm1585_vm2, %v8435_v61  ;;  %v5924_v61 = vunpack.i.l.bf16 %v8593_v57 }
 0x534   : > { %5612 = vmatmul.msk.f32.vlgmr.msra.gmra.mxu2 %vm1585_vm2, %v8355_v14 }
 0x535   : > { %4395 = vmatpush.msra.mxu2 %v5904_v53 }
 0x536   : > { %v8938_v40 = vpop.f32.mrf.mxu0 }
 0x537   : > { %4396 = vmatpush.msra.mxu2 %v5905_v50 }
 0x53c   : > { %5613 = vmatmul.msk.f32.gmra.mxu2 %vm1585_vm2, %v8371_v8 }
 0x53e   : > { %v8948_v17 = vpop.f32.mrf.mxu0 }
 0x541   : > { %v3391_v35 = vpop.xlane.xlu2 %3390 }
 0x542   : > { %v3425_v18 = vsub.f32 %v8815_v55, %v3391_v35 }
 0x543   : > { %4619 = vrot.lane.b32.xlu1 %v8733_v4, %s6505_s19 }
 0x544   : > { %v3447_v42 = vmul.f32 1.442695, %v3425_v18  ;;  %5628 = vmatmul.msk.f32.vlgmr.msrb.gmra.mxu2 %vm1585_vm2, %v8419_v43  ;;  %v9912_v18 = vld [vmem:[#allocation44_spill] sm:$0xff] }
 0x545   : > { %4535 = vmatpush.msrb.mxu2 %v5924_v61 }
 0x546   : > { %6038 = vpow2.f32 %v3447_v42  ;;  %v8958_v13 = vpop.f32.mrf.mxu0 }
 0x547   : > { %4536 = vmatpush.msrb.mxu2 %v5925_v9 }
 0x549   : > { %v3394_v14 = vpop.xlane.xlu1 %3393 }
 0x54a   : > { %v3426_v8 = vsub.f32 %v8823_v10, %v3394_v14 }
 0x54c   : > { %v6039_v5 = vpop.eup %6038  ;;  %v3449_v55 = vmul.f32 1.442695, %v3426_v8  ;;  %5629 = vmatmul.msk.f32.gmra.mxu2 %vm1585_vm2, %v8577_v32 }
 0x54d   : > { %5592 = vmatmul.msk.f32.vlgmr.msrb.gmra.mxu3 %vm1866_vm3, %v6039_v5  ;;  %v3485_v4 = vsel %vm1866_vm3, %v6039_v5, 0.0 }
 0x54e   : > { %6040 = vpow2.f32 %v3449_v55  ;;  %5614 = vmatpush.xpose.msk.msrb.mxu3 %vm1585_vm2, %v8395_v15  ;;  %3486 = vadd.xlane.f32.xlu0 %v3485_v4  ;;  %v8973_v3 = vpop.f32.mrf.mxu0 }
 0x54f   : > { %v4139_v48 = vsel %vm1866_vm3, %v8973_v3, -inf }
 0x551   : > { %v3415_v43 = vpop.xlane.xlu2 %3414 }
 0x552   : > { %v3433_v57 = vsub.f32 %v8829_v26, %v3415_v43  ;;  %5615 = vmatpush.xpose.msk.msrb.mxu3 %vm1585_vm2, %v8383_v41 }
 0x554   : > { %v6041_v10 = vpop.eup %6040  ;;  %v3463_v29 = vmul.f32 1.442695, %v3433_v57 }
 0x555   : > { %5593 = vmatmul.msk.f32.gmra.mxu3 %vm1866_vm3, %v6041_v10  ;;  %v3488_v32 = vsel %vm1866_vm3, %v6041_v10, 0.0 }
 0x556   : > { %6042 = vpow2.f32 %v3463_v29  ;;  %3489 = vadd.xlane.f32.xlu2 %v3488_v32  ;;  %v8984_v31 = vpop.f32.mrf.mxu0 }
 0x557   : > { %6044 = vrcp.f32 %v8652_v11 }
 0x559   : > { %v3418_v15 = vpop.xlane.xlu2 %3417 }
 0x55a   : > { %v3434_v6 = vsub.f32 %v8839_v38, %v3418_v15  ;;  %v4142_v15 = vsel %vm1866_vm3, %v8984_v31, -inf }
 0x55c   : > { %v8951_v52 = vpop.eup %6042  ;;  %v3465_v26 = vmul.f32 1.442695, %v3434_v6 }
 0x55d   : > { %v6045_v62 = vpop.eup %6044  ;;  %5600 = vmatmul.msk.f32.vlgmr.msra.gmra.mxu3 %vm1866_vm3, %v8951_v52 }
 0x55e   : > { %6046 = vpow2.f32 %v3465_v26  ;;  %5630 = vmatpush.xpose.msk.msra.mxu3 %vm1585_vm2, %v8427_v24  ;;  %v2262_v41 = vmul.f32 %v6045_v62, %v8387_v60  ;;  %v3479_v60 = vsel %vm1866_vm3, %v8872_v59, 0.0 }
 0x561   : > { %v4618_v56 = vpop.permute.xlu1 %4617  ;;  %v3469_v11 = vpop.xlane.xlu2 %3468 }
 0x562   : > { %v8961_v28 = vsel %vm1585_vm2, %v2262_v41, %v4618_v56  ;;  %6048 = vrcp.f32 %v3469_v11  ;;  %5631 = vmatpush.xpose.msk.msra.mxu3 %vm1585_vm2, %v8448_v46  ;;  %v9908_v46 = vld [vmem:[#allocation68_spill] sm:$0xff]  ;;  %v9913_v56 = vld [vmem:[#allocation50_spill] sm:$0xff] }
 0x564   : > { %v8965_v38 = vpop.eup %6046 }
 0x565   : > { %5601 = vmatmul.msk.f32.gmra.mxu3 %vm1866_vm3, %v8965_v38 }
 0x568   : > { %v6049_v1 = vpop.eup %6048 }
 0x569   : > { %v3811_v24 = vmul.f32 %v6049_v1, %v3560_v36  ;;  %v8980_v59 = vpop.xlane.xlu2 %3492 }
 0x56b   : > { %4675 = vrot.lane.b32.xlu0 %v3811_v24, %s6506_s14 }
 0x56d   : > { %v3475_v22 = vpop.xlane.xlu0 %3474  ;;  %3480 = vadd.xlane.f32.xlu1 %v3479_v60  ;;  %5616 = vmatmul.msk.f32.vlgmr.msrb.gmra.mxu3 %vm1585_vm2, %v9908_v46 }
 0x56e   : > { %4430 = vmatpush.msrb.mxu3 %v5909_v2  ;;  %6050 = vrcp.f32 %v3475_v22 }
 0x570   : > { %4431 = vmatpush.msrb.mxu3 %v5910_v25 }
 0x574   : > { %v6051_v37 = vpop.eup %6050 }
 0x575   : > { %1982 = vadd.xlane.f32.xlu1 %v1981_v45  ;;  %5617 = vmatmul.msk.f32.gmra.mxu3 %vm1585_vm2, %v8527_v20  ;;  %v8993_v20 = vpop.f32.mrf.mxu0 }
 0x576   : > { %v3595_v44 = vpop.f32.mrf.mxu1  ;;  %v4163_v27 = vsel %vm1866_vm3, %v8993_v20, -inf }
 0x577   : > { %v3813_v23 = vmul.f32 %v6051_v37, %v3595_v44  ;;  %v9043_v37 = vpop.xlane.xlu0 %3495 }
 0x579   : > { %4679 = vrot.lane.b32.xlu2 %v3813_v23, %s6506_s14 }
 0x57d   : > { %4140 = vmax.xlane.f32.xlu1 %v4139_v48  ;;  %5632 = vmatmul.msk.f32.vlgmr.msra.gmra.mxu3 %vm1585_vm2, %v9911_v34 }
 0x57e   : > { %v3499_v47 = vpop.xlane.xlu2 %3498  ;;  %v3598_v33 = vpop.f32.mrf.mxu1  ;;  %4570 = vmatpush.msra.mxu3 %v5929_v16 }
 0x57f   : > { %6052 = vrcp.f32 %v3499_v47  ;;  %v9049_v7 = vpop.xlane.xlu0 %2717 }
 0x580   : > { %4571 = vmatpush.msra.mxu3 %v5930_v49 }
 0x585   : > { %4164 = vmax.xlane.f32.xlu1 %v4163_v27  ;;  %v6053_v53 = vpop.eup %6052  ;;  %5633 = vmatmul.msk.f32.gmra.mxu3 %vm1585_vm2, %v9912_v18  ;;  %v9915_v27 = vld [vmem:[#allocation48_spill] sm:$0xff] }
 0x586   : > { %v3502_v50 = vpop.xlane.xlu2 %3501  ;;  %v3735_v35 = vpop.f32.mrf.mxu1 }
 0x587   : > { %v8999_v61 = vmul.f32 %v6053_v53, %v3735_v35  ;;  %6054 = vrcp.f32 %v3502_v50 }
 0x58c   : > { %v9001_v36 = vpop.xlane.xlu1 %1979 }
 0x58d   : > { %v6055_v42 = vpop.eup %6054 }
 0x58e   : > { %v3738_v9 = vpop.f32.mrf.mxu1  ;;  %v3484_v44 = vpop.xlane.xlu2 %3483 }
 0x58f   : > { %v9003_v14 = vmul.f32 %v6055_v42, %v3738_v9  ;;  %v9005_v8 = vpop.f32.mrf.mxu2  ;;  %v9916_v9 = vld [vmem:[#allocation29_spill] sm:$0xff] }
 0x595   : > { %v3472_v5 = vpop.xlane.xlu1 %3471 }
 0x596   : > { %6056 = vrcp.f32 %v3472_v5  ;;  %v9007_v55 = vpop.f32.mrf.mxu1 }
 0x597   : > { %v9010_v10 = vpop.f32.mrf.mxu2 }
 0x59c   : > { %v6057_v4 = vpop.eup %6056 }
 0x59d   : > { %v3478_v43 = vpop.xlane.xlu1 %3477  ;;  %v3812_v57 = vmul.f32 %v6057_v4, %v8938_v40  ;;  %v9917_v4 = vld [vmem:[#allocation70_spill] sm:$0xff] }
 0x59e   : > { %6058 = vrcp.f32 %v3478_v43  ;;  %v9012_v29 = vpop.f32.mrf.mxu1 }
 0x59f   : > { %4677 = vrot.lane.b32.xlu0 %v3812_v57, %s6506_s14  ;;  %v4148_v32 = vsel %vm1866_vm3, %v9012_v29, -inf  ;;  %v9024_v41 = vpop.f32.mrf.mxu2  ;;  %6060 = vrcp.f32 %v9913_v56 }
 0x5a0   : > { %4149 = vmax.xlane.f32.xlu1 %v4148_v32  ;;  %6062 = vrcp.f32 %v9915_v27 }
 0x5a2   : > { %4143 = vmax.xlane.f32.xlu2 %v4142_v15 }
 0x5a4   : > { %v6059_v6 = vpop.eup %6058 }
 0x5a5   : > { %v3814_v26 = vmul.f32 %v6059_v6, %v3598_v33  ;;  %v6061_v60 = vpop.eup %6060  ;;  %v4145_v33 = vsel %vm1866_vm3, %v9007_v55, -inf }
 0x5a6   : > { %v9019_v62 = vpop.f32.mrf.mxu1  ;;  %v2263_v2 = vmul.f32 %v6061_v60, %v9914_v39  ;;  %v6063_v50 = vpop.eup %6062 }
 0x5a7   : > { %4681 = vrot.lane.b32.xlu0 %v3814_v26, %s6506_s14  ;;  %v4169_v40 = vsel %vm1866_vm3, %v9019_v62, -inf  ;;  %v2259_v5 = vmul.f32 %v6063_v50, %v9916_v9 }
 0x5a8   : > { %4170 = vmax.xlane.f32.xlu1 %v4169_v40 }
 0x5a9   : > { %v4787_v43 = vsel %vm1585_vm2, %v2259_v5, %v9917_v4  ;;  %v9918_v5 = vld [vmem:[#allocation90_spill] sm:$0xff] }
 0x5ae   : > { %v9027_v11 = vpop.f32.mrf.mxu1 }
 0x5af   : > { %v4172_v1 = vsel %vm1866_vm3, %v9027_v11, -inf  ;;  %v9031_v24 = vpop.f32.mrf.mxu2 }
 0x5b0   : > { %4173 = vmax.xlane.f32.xlu1 %v4172_v1 }
 0x5b5   : > { %v4620_v22 = vpop.permute.xlu1 %4619 }
 0x5b6   : > { %v9035_v46 = vsel %vm1585_vm2, %v2263_v2, %v4620_v22 }
 0x5b7   : > { %v9037_v25 = vpop.f32.mrf.mxu2 }
 0x5b8   : > { %v4151_v51 = vsel %vm1866_vm3, %v9037_v25, -inf }
 0x5b9   : > { %4152 = vmax.xlane.f32.xlu1 %v4151_v51 }
 0x5bf   : > { %v9041_v45 = vpop.f32.mrf.mxu2 }
 0x5c1   : > { %v9060_v53 = vpop.xlane.xlu0 %3486 }
 0x5c7   : > { %v9045_v23 = vpop.f32.mrf.mxu2 }
 0x5c8   : > { %v4175_v48 = vsel %vm1866_vm3, %v9045_v23, -inf }
 0x5c9   : > { %4176 = vmax.xlane.f32.xlu2 %v4175_v48  ;;  %v3490_v16 = vpop.xlane.xlu2 %3489 }
 0x5ca   : > { %6064 = vrcp.f32 %v3490_v16 }
 0x5cf   : > { %v9051_v47 = vpop.f32.mrf.mxu2 }
 0x5d0   : > { %v9055_v34 = vpop.f32.mrf.mxu3  ;;  %v4178_v49 = vsel %vm1866_vm3, %v9051_v47, -inf  ;;  %v6065_v35 = vpop.eup %6064 }
 0x5d1   : > { %4146 = vmax.xlane.f32.xlu0 %v4145_v33  ;;  %4179 = vmax.xlane.f32.xlu1 %v4178_v49 }
 0x5d3   : > { %v9092_v27 = vpop.permute.xlu2 %4679 }
 0x5d8   : > { %v3668_v18 = vpop.f32.mrf.mxu3 }
 0x5d9   : > { %v9062_v42 = vmul.f32 %v6065_v35, %v3668_v18  ;;  %v9094_v35 = vpop.f32.mrf.mxu0 }
 0x5dd   : > { %v4676_v57 = vpop.permute.xlu0 %4675 }
 0x5de   : > { %v9068_v32 = vsel %vm1866_vm3, %v4787_v43, %v4676_v57 }
 0x5e0   : > { %v3481_v15 = vpop.xlane.xlu1 %3480  ;;  %v9070_v6 = vpop.f32.mrf.mxu3 }
 0x5e1   : > { %6066 = vrcp.f32 %v3481_v15 }
 0x5e7   : > { %v6067_v26 = vpop.eup %6066 }
 0x5e8   : > { %v9072_v40 = vpop.xlane.xlu1 %1982  ;;  %v3815_v56 = vmul.f32 %v6067_v26, %v9005_v8  ;;  %v9075_v1 = vpop.f32.mrf.mxu3 }
 0x5ea   : > { %4683 = vrot.lane.b32.xlu0 %v3815_v56, %s6506_s14 }
 0x5f0   : > { %v4141_v60 = vpop.xlane.xlu1 %4140  ;;  %v9079_v2 = vpop.f32.mrf.mxu3 }
 0x5f1   : > { %v4187_v39 = vsub.f32 %v8973_v3, %v4141_v60 }
 0x5f3   : > { %v4203_v22 = vmul.f32 1.442695, %v4187_v39 }
 0x5f5   : > { %6068 = vpow2.f32 %v4203_v22  ;;  %v4154_v22 = vsel %vm1866_vm3, %v9041_v45, -inf }
 0x5f6   : > { %6070 = vrcp.f32 %v3484_v44  ;;  %v4166_v44 = vsel %vm1866_vm3, %v9094_v35, -inf }
 0x5f8   : > { %v9081_v51 = vpop.f32.mrf.mxu3  ;;  %v4165_v49 = vpop.xlane.xlu1 %4164 }
 0x5f9   : > { %v4160_v48 = vsel %vm1866_vm3, %v9081_v51, -inf  ;;  %v4195_v60 = vsub.f32 %v8993_v20, %v4165_v49  ;;  %v9919_v20 = vld [vmem:[#allocation32_spill] sm:$0xff] }
 0x5fa   : > { %4161 = vmax.xlane.f32.xlu2 %v4160_v48 }
 0x5fb   : > { %v6069_v16 = vpop.eup %6068  ;;  %v4219_v48 = vmul.f32 1.442695, %v4195_v60 }
 0x5fc   : > { %5634 = vmatmul.msk.f32.vlgmr.msrb.gmra.mxu0 %vm1866_vm3, %v6069_v16  ;;  %v6071_v50 = vpop.eup %6070 }
 0x5fd   : > { %v3816_v18 = vmul.f32 %v6071_v50, %v9010_v10 }
 0x600   : > { %v9086_v8 = vpop.f32.mrf.mxu3 }
 0x601   : > { %v4181_v50 = vsel %vm1866_vm3, %v9086_v8, -inf }
 0x608   : > { %v9088_v33 = vpop.f32.mrf.mxu3 }
 0x609   : > { %v4184_v3 = vsel %vm1866_vm3, %v9088_v33, -inf }
 0x60a   : > { %4185 = vmax.xlane.f32.xlu1 %v4184_v3 }
 0x611   : > { %v4678_v9 = vpop.permute.xlu0 %4677 }
 0x612   : > { %v9099_v4 = vsel %vm1866_vm3, %v9918_v5, %v4678_v9  ;;  %4685 = vrot.lane.b32.xlu2 %v3816_v18, %s6506_s14 }
 0x613   : > { %v4150_v43 = vpop.xlane.xlu1 %4149 }
 0x614   : > { %4167 = vmax.xlane.f32.xlu0 %v4166_v44  ;;  %v4190_v44 = vsub.f32 %v9012_v29, %v4150_v43  ;;  %v9920_v43 = vld [vmem:[#allocation42_spill] sm:$0xff] }
 0x615   : > { %v4144_v57 = vpop.xlane.xlu2 %4143 }
 0x616   : > { %v4188_v15 = vsub.f32 %v8984_v31, %v4144_v57  ;;  %v4157_v31 = vsel %vm1866_vm3, %v9079_v2, -inf  ;;  %v4235_v57 = vsel %vm1866_vm3, %v6069_v16, 0.0  ;;  %v2719_v16 = vsel %vm1866_vm3, %v9920_v43, 0.0 }
 0x618   : > { %v4205_v26 = vmul.f32 1.442695, %v4188_v15  ;;  %v4209_v15 = vmul.f32 1.442695, %v4190_v44 }
 0x619   : > { %v4682_v56 = vpop.permute.xlu0 %4681 }
 0x61a   : > { %6072 = vpow2.f32 %v4205_v26  ;;  %v9108_v10 = vsel %vm1866_vm3, %v8961_v28, %v4682_v56  ;;  %v3503_v56 = vsel %vm1866_vm3, %v8895_v30, 0.0 }
 0x61b   : > { %v4171_v39 = vpop.xlane.xlu1 %4170  ;;  %6074 = vpow2.f32 %v4219_v48 }
 0x61c   : > { %4155 = vmax.xlane.f32.xlu0 %v4154_v22 }
 0x620   : > { %v6073_v3 = vpop.eup %6072 }
 0x621   : > { %5635 = vmatmul.msk.f32.gmra.mxu0 %vm1866_vm3, %v6073_v3  ;;  %v6075_v28 = vpop.eup %6074  ;;  %v4238_v60 = vsel %vm1866_vm3, %v6073_v3, 0.0  ;;  %v4197_v3 = vsub.f32 %v9019_v62, %v4171_v39 }
 0x623   : > { %4621 = vrot.lane.b32.xlu1 %v9919_v20, %s6505_s19  ;;  %v4174_v49 = vpop.xlane.xlu1 %4173 }
 0x624   : > { %4158 = vmax.xlane.f32.xlu0 %v4157_v31 }
 0x629   : > { %5642 = vmatmul.msk.f32.vlgmr.msra.gmra.mxu0 %vm1866_vm3, %v6075_v28 }
 0x62c   : > { %4182 = vmax.xlane.f32.xlu0 %v4181_v50  ;;  %v4153_v18 = vpop.xlane.xlu1 %4152 }
 0x62d   : > { %v4191_v9 = vsub.f32 %v9037_v25, %v4153_v18  ;;  %v4223_v18 = vmul.f32 1.442695, %v4197_v3 }
 0x62f   : > { %v4211_v5 = vmul.f32 1.442695, %v4191_v9 }
 0x631   : > { %6076 = vpow2.f32 %v4211_v5 }
 0x632   : > { %6078 = vpow2.f32 %v4209_v15  ;;  %v4259_v15 = vsel %vm1866_vm3, %v6075_v28, 0.0 }
 0x634   : > { %4236 = vadd.xlane.f32.xlu0 %v4235_v57 }
 0x637   : > { %v9123_v26 = vpop.eup %6076 }
 0x638   : > { %5638 = vmatmul.msk.f32.vlgmr.msra.gmra.mxu2 %vm1866_vm3, %v9123_v26  ;;  %v6079_v25 = vpop.eup %6078 }
 0x639   : > { %v4244_v29 = vsel %vm1866_vm3, %v6079_v25, 0.0 }
 0x63b   : > { %3504 = vadd.xlane.f32.xlu2 %v3503_v56 }
 0x63c   : > { %4239 = vadd.xlane.f32.xlu0 %v4238_v60 }
 0x643   : > { %4245 = vadd.xlane.f32.xlu2 %v4244_v29 }
 0x644   : > { %v4147_v22 = vpop.xlane.xlu0 %4146  ;;  %2720 = vadd.xlane.f32.xlu0 %v2719_v16 }
 0x645   : > { %v4189_v48 = vsub.f32 %v9007_v55, %v4147_v22  ;;  %v9921_v55 = vld [vmem:[#allocation72_spill] sm:$0xff] }
 0x646   : > { %v1984_v5 = vsel %vm1866_vm3, %v9921_v55, 0.0 }
 0x647   : > { %v4207_v31 = vmul.f32 1.442695, %v4189_v48 }
 0x649   : > { %6080 = vpow2.f32 %v4207_v31 }
 0x64a   : > { %6082 = vrcp.f32 %v9060_v53  ;;  %v4198_v53 = vsub.f32 %v9027_v11, %v4174_v49  ;;  %v4177_v11 = vpop.xlane.xlu2 %4176  ;;  %v4180_v49 = vpop.xlane.xlu1 %4179 }
 0x64b   : > { %6084 = vpow2.f32 %v4223_v18 }
 0x64c   : > { %v4225_v57 = vmul.f32 1.442695, %v4198_v53  ;;  %v9923_v53 = vld [vmem:[#allocation58_spill] sm:$0xff] }
 0x64e   : > { %6086 = vpow2.f32 %v4225_v57 }
 0x64f   : > { %v6081_v20 = vpop.eup %6080  ;;  %6088 = vrcp.f32 %v9001_v36  ;;  %v9922_v36 = vld [vmem:[#allocation56_spill] sm:$0xff] }
 0x650   : > { %5636 = vmatmul.msk.f32.vlgmr.msra.gmra.mxu1 %vm1866_vm3, %v6081_v20  ;;  %v4241_v30 = vsel %vm1866_vm3, %v6081_v20, 0.0  ;;  %v6083_v50 = vpop.eup %6082 }
 0x651   : > { %4242 = vadd.xlane.f32.xlu1 %v4241_v30  ;;  %v3817_v9 = vmul.f32 %v6083_v50, %v9055_v34  ;;  %v6085_v39 = vpop.eup %6084 }
 0x654   : > { %v6087_v34 = vpop.eup %6086 }
 0x655   : > { %v6089_v22 = vpop.eup %6088  ;;  %v4268_v28 = vsel %vm1866_vm3, %v6087_v34, 0.0 }
 0x656   : > { %v2264_v30 = vmul.f32 %v6089_v22, %v9922_v36 }
 0x658   : > { %5637 = vmatmul.msk.f32.gmra.mxu1 %vm1866_vm3, %v6079_v25  ;;  %4687 = vrot.lane.b32.xlu0 %v3817_v9, %s6506_s14 }
 0x659   : > { %1985 = vadd.xlane.f32.xlu1 %v1984_v5 }
 0x65c   : > { %v4684_v44 = vpop.permute.xlu0 %4683 }
 0x65d   : > { %v9146_v62 = vsel %vm1866_vm3, %v9035_v46, %v4684_v44  ;;  %v4265_v46 = vsel %vm1866_vm3, %v6085_v39, 0.0  ;;  %v2722_v44 = vsel %vm1866_vm3, %v9923_v53, 0.0 }
 0x660   : > { %5644 = vmatmul.msk.f32.vlgmr.msrb.gmra.mxu1 %vm1866_vm3, %v6085_v39 }
 0x668   : > { %5645 = vmatmul.msk.f32.gmra.mxu1 %vm1866_vm3, %v6087_v34  ;;  %v3506_v34 = vsel %vm1866_vm3, %v8914_v19, 0.0  ;;  %v4247_v19 = vsel %vm1866_vm3, %v9123_v26, 0.0 }
 0x66d   : > { %v4162_v29 = vpop.xlane.xlu2 %4161 }
 0x66e   : > { %v4194_v55 = vsub.f32 %v9081_v51, %v4162_v29 }
 0x672   : > { %4623 = vrot.lane.b32.xlu1 %v8790_v58, %s6505_s19 }
 0x675   : > { %v4686_v18 = vpop.permute.xlu2 %4685 }
 0x67d   : > { %v4186_v43 = vpop.xlane.xlu1 %4185 }
 0x682   : > { %4260 = vadd.xlane.f32.xlu0 %v4259_v15  ;;  %v9924_v15 = vld [vmem:[#allocation99_spill] sm:$0xff] }
 0x683   : > { %v1987_v51 = vsel %vm1866_vm3, %v9924_v15, 0.0 }
 0x687   : > { %v4168_v56 = vpop.xlane.xlu0 %4167 }
 0x688   : > { %v4196_v60 = vsub.f32 %v9094_v35, %v4168_v56  ;;  %v4199_v35 = vsub.f32 %v9045_v23, %v4177_v11  ;;  %v4217_v11 = vmul.f32 1.442695, %v4194_v55 }
 0x68a   : > { %v4221_v25 = vmul.f32 1.442695, %v4196_v60  ;;  %4266 = vadd.xlane.f32.xlu0 %v4265_v46  ;;  %v4227_v50 = vmul.f32 1.442695, %v4199_v35 }
 0x68c   : > { %6090 = vpow2.f32 %v4221_v25 }
 0x68f   : > { %v4156_v16 = vpop.xlane.xlu0 %4155 }
 0x690   : > { %v4192_v58 = vsub.f32 %v9041_v45, %v4156_v16 }
 0x692   : > { %v6091_v48 = vpop.eup %6090  ;;  %v4213_v31 = vmul.f32 1.442695, %v4192_v58  ;;  %4269 = vadd.xlane.f32.xlu0 %v4268_v28 }
 0x693   : > { %5643 = vmatmul.msk.f32.gmra.mxu0 %vm1866_vm3, %v6091_v48  ;;  %v4262_v20 = vsel %vm1866_vm3, %v6091_v48, 0.0  ;;  %v4202_v48 = vsub.f32 %v9088_v33, %v4186_v43 }
 0x694   : > { %6092 = vpow2.f32 %v4213_v31  ;;  %4263 = vadd.xlane.f32.xlu2 %v4262_v20 }
 0x695   : > { %v4622_v3 = vpop.permute.xlu1 %4621  ;;  %6094 = vpow2.f32 %v4227_v50  ;;  %v4233_v26 = vmul.f32 1.442695, %v4202_v48 }
 0x696   : > { %v4792_v45 = vsel %vm1585_vm2, %v2264_v30, %v4622_v3  ;;  %v4328_v3 = vpop.f32.mrf.mxu0 }
 0x697   : > { %v4159_v9 = vpop.xlane.xlu0 %4158  ;;  %v9166_v23 = vsel %vm1866_vm3, %v4792_v45, %v4686_v18 }
 0x698   : > { %v4193_v5 = vsub.f32 %v9079_v2, %v4159_v9  ;;  %v4200_v2 = vsub.f32 %v9051_v47, %v4180_v49 }
 0x69a   : > { %v6093_v57 = vpop.eup %6092  ;;  %v4215_v39 = vmul.f32 1.442695, %v4193_v5  ;;  %2723 = vadd.xlane.f32.xlu0 %v2722_v44  ;;  %v4229_v56 = vmul.f32 1.442695, %v4200_v2  ;;  %v9925_v44 = vld [vmem:[#allocation100_spill] sm:$0xff] }
 0x69b   : > { %5639 = vmatmul.msk.f32.gmra.mxu2 %vm1866_vm3, %v6093_v57  ;;  %v6095_v60 = vpop.eup %6094  ;;  %v4250_v25 = vsel %vm1866_vm3, %v6093_v57, 0.0  ;;  %v1990_v57 = vsel %vm1866_vm3, %v9925_v44, 0.0 }
 0x69c   : > { %6096 = vpow2.f32 %v4215_v39  ;;  %3507 = vadd.xlane.f32.xlu2 %v3506_v34  ;;  %1988 = vadd.xlane.f32.xlu1 %v1987_v51  ;;  %v4271_v35 = vsel %vm1866_vm3, %v6095_v60, 0.0  ;;  %v9926_v34 = vld [vmem:[#allocation71_spill] sm:$0xff] }
 0x69d   : > { %6098 = vpow2.f32 %v4217_v11 }
 0x69e   : > { %6100 = vpow2.f32 %v4229_v56  ;;  %v4331_v55 = vpop.f32.mrf.mxu0 }
 0x69f   : > { %v4183_v46 = vpop.xlane.xlu0 %4182 }
 0x6a0   : > { %v4201_v47 = vsub.f32 %v9086_v8, %v4183_v46 }
 0x6a2   : > { %v6097_v29 = vpop.eup %6096  ;;  %4251 = vadd.xlane.f32.xlu0 %v4250_v25  ;;  %v4231_v16 = vmul.f32 1.442695, %v4201_v47  ;;  %v9929_v47 = vld [vmem:[#allocation45_spill] sm:$0xff] }
 0x6a3   : > { %5640 = vmatmul.msk.f32.vlgmr.msrb.gmra.mxu3 %vm1866_vm3, %v6097_v29  ;;  %5646 = vmatmul.msk.f32.vlgmr.msrb.gmra.mxu2 %vm1866_vm3, %v6095_v60  ;;  %v6099_v49 = vpop.eup %6098  ;;  %v4253_v28 = vsel %vm1866_vm3, %v6097_v29, 0.0  ;;  %v9927_v60 = vld [vmem:[#allocation59_spill] sm:$0xff] }
 0x6a4   : > { %4248 = vadd.xlane.f32.xlu2 %v4247_v19  ;;  %v4256_v58 = vsel %vm1866_vm3, %v6099_v49, 0.0  ;;  %v6101_v22 = vpop.eup %6100  ;;  %6102 = vpow2.f32 %v4231_v16  ;;  %v9928_v29 = vld [vmem:[#allocation55_spill] sm:$0xff]  ;;  %v3509_v16 = vsel %vm1866_vm3, %v8951_v52, 0.0 }
 0x6a5   : > { %v4274_v8 = vsel %vm1866_vm3, %v6101_v22, 0.0  ;;  %6104 = vpow2.f32 %v4233_v26 }
 0x6a7   : > { %v4237_v33 = vpop.xlane.xlu0 %4236 }
 0x6a8   : > { %6106 = vrcp.f32 %v4237_v33 }
 0x6aa   : > { %4257 = vadd.xlane.f32.xlu0 %v4256_v58  ;;  %v6103_v31 = vpop.eup %6102 }
 0x6ab   : > { %5641 = vmatmul.msk.f32.gmra.mxu3 %vm1866_vm3, %v6099_v49  ;;  %5647 = vmatmul.msk.f32.gmra.mxu2 %vm1866_vm3, %v6101_v22  ;;  %v9192_v20 = vpop.eup %6104  ;;  %v2725_v49 = vsel %vm1866_vm3, %v9929_v47, 0.0  ;;  %v9931_v47 = vld [vmem:[#allocation87_spill] sm:$0xff] }
 0x6ac   : > { %4254 = vadd.xlane.f32.xlu2 %v4253_v28  ;;  %v4277_v28 = vsel %vm1866_vm3, %v6103_v31, 0.0 }
 0x6ae   : > { %v6107_v30 = vpop.eup %6106  ;;  %v9214_v46 = vpop.xlane.xlu2 %3504 }
 0x6af   : > { %v4240_v36 = vpop.xlane.xlu0 %4239  ;;  %v4579_v50 = vmul.f32 %v6107_v30, %v4328_v3  ;;  %v4836_v30 = vld [vmem:[#allocation13] sm:$0xff] }
 0x6b2   : > { %4275 = vadd.xlane.f32.xlu0 %v4274_v8  ;;  %v4839_v8 = vld [vmem:[#allocation13 + $0x18] sm:$0xff] }
 0x6b3   : > { %5648 = vmatmul.msk.f32.vlgmr.msra.gmra.mxu3 %vm1866_vm3, %v6103_v31  ;;  %4904 = vmatpush.msrb.mxu0 %v4839_v8 }
 0x6b4   : > { %4272 = vadd.xlane.f32.xlu2 %v4271_v35  ;;  %v4838_v35 = vld [vmem:[#allocation13 + $0x10] sm:$0xff] }
 0x6b5   : > { %4625 = vrot.lane.b32.xlu1 %v8796_v54, %s6505_s19  ;;  %4905 = vmatpush.msrb.mxu0 %v4838_v35 }
 0x6b6   : > { %v4246_v22 = vpop.xlane.xlu2 %4245 }
 0x6b7   : > { %v9204_v53 = vpop.xlane.xlu0 %2720 }
 0x6bb   : > { %5649 = vmatmul.msk.f32.gmra.mxu3 %vm1866_vm3, %v9192_v20 }
 0x6c4   : > { %v4243_v43 = vpop.xlane.xlu1 %4242 }
 0x6c5   : > { %6108 = vrcp.f32 %v4243_v43  ;;  %v4837_v43 = vld [vmem:[#allocation13 + $0x8] sm:$0xff] }
 0x6c6   : > { %4689 = vrot.lane.b32.xlu0 %v9062_v42, %s6506_s14  ;;  %6110 = vrcp.f32 %v4240_v36  ;;  %4906 = vmatpush.msrb.mxu0 %v4837_v43  ;;  %v9932_v43 = vld [vmem:[#allocation40_spill] sm:$0xff] }
 0x6c7   : > { %6112 = vrcp.f32 %v9072_v40 }
 0x6c8   : > { %6114 = vrcp.f32 %v9927_v60  ;;  %4907 = vmatpush.msrb.mxu0 %v4836_v30 }
 0x6c9   : > { %6116 = vrcp.f32 %v8980_v59 }
 0x6ca   : > { %v4688_v2 = vpop.permute.xlu0 %4687  ;;  %6118 = vrcp.f32 %v4246_v22 }
 0x6cb   : > { %v6109_v54 = vpop.eup %6108 }
 0x6cc   : > { %4739 = vrot.lane.b32.xlu2 %v4579_v50, %s6507_s22  ;;  %v6111_v9 = vpop.eup %6110  ;;  %v9202_v42 = vpop.xlane.xlu1 %1985 }
 0x6cd   : > { %v4363_v18 = vpop.f32.mrf.mxu1  ;;  %v4580_v5 = vmul.f32 %v6111_v9, %v4331_v55  ;;  %v6113_v39 = vpop.eup %6112 }
 0x6ce   : > { %v4581_v45 = vmul.f32 %v6109_v54, %v4363_v18  ;;  %v2265_v15 = vmul.f32 %v6113_v39, %v9926_v34  ;;  %v6115_v40 = vpop.eup %6114  ;;  %v4398_v50 = vpop.f32.mrf.mxu2 }
 0x6cf   : > { %v3051_v19 = vmul.f32 %v6115_v40, %v9928_v29  ;;  %v6117_v36 = vpop.eup %6116 }
 0x6d0   : > { %4743 = vrot.lane.b32.xlu0 %v4581_v45, %s6507_s22  ;;  %v3819_v31 = vmul.f32 %v6117_v36, %v8948_v17  ;;  %v6119_v18 = vpop.eup %6118  ;;  %v9930_v17 = vld [vmem:[#allocation101_spill] sm:$0xff] }
 0x6d1   : > { %v1993_v39 = vsel %vm1866_vm3, %v9930_v17, 0.0 }
 0x6d4   : > { %4741 = vrot.lane.b32.xlu2 %v4580_v5, %s6507_s22 }
 0x6d5   : > { %v4366_v59 = vpop.f32.mrf.mxu1 }
 0x6d6   : > { %v4582_v45 = vmul.f32 %v6119_v18, %v4366_v59 }
 0x6df   : > { %1991 = vadd.xlane.f32.xlu1 %v1990_v57 }
 0x6e4   : > { %v4624_v51 = vpop.permute.xlu1 %4623 }
 0x6e5   : > { %v4793_v11 = vsel %vm1585_vm2, %v2265_v15, %v4624_v51  ;;  %v4468_v51 = vpop.f32.mrf.mxu0 }
 0x6e6   : > { %v9211_v56 = vsel %vm1866_vm3, %v4793_v11, %v4688_v2 }
 0x6f5   : > { %v4261_v25 = vpop.xlane.xlu0 %4260 }
 0x6f8   : > { %4627 = vrot.lane.b32.xlu1 %v3051_v19, %s6505_s19 }
 0x6fa   : > { %2726 = vadd.xlane.f32.xlu0 %v2725_v49 }
 0x6fd   : > { %3510 = vadd.xlane.f32.xlu2 %v3509_v16  ;;  %v9222_v58 = vpop.xlane.xlu0 %4266 }
 0x702   : > { %4278 = vadd.xlane.f32.xlu0 %v4277_v28 }
 0x705   : > { %v9225_v48 = vpop.xlane.xlu0 %4269 }
 0x707   : > { %v9227_v26 = vpop.xlane.xlu2 %4263 }
 0x70d   : > { %v9230_v33 = vpop.xlane.xlu0 %2723 }
 0x70f   : > { %v9232_v52 = vpop.xlane.xlu2 %3507 }
 0x710   : > { %v4471_v17 = vpop.f32.mrf.mxu0 }
 0x715   : > { %4691 = vrot.lane.b32.xlu2 %v3819_v31, %s6506_s14  ;;  %v4252_v3 = vpop.xlane.xlu0 %4251  ;;  %v9933_v31 = vld [vmem:[#allocation75_spill] sm:$0xff] }
 0x716   : > { %6120 = vrcp.f32 %v4252_v3 }
 0x717   : > { %v4249_v54 = vpop.xlane.xlu2 %4248 }
 0x718   : > { %6122 = vrcp.f32 %v4249_v54  ;;  %v9934_v54 = vld [vmem:[#allocation52_spill] sm:$0xff] }
 0x719   : > { %6124 = vrcp.f32 %v4261_v25 }
 0x71c   : > { %v6121_v9 = vpop.eup %6120 }
 0x71d   : > { %4745 = vrot.lane.b32.xlu2 %v4582_v45, %s6507_s22  ;;  %v4258_v25 = vpop.xlane.xlu0 %4257 }
 0x71e   : > { %v4401_v55 = vpop.f32.mrf.mxu2  ;;  %v6123_v57 = vpop.eup %6122 }
 0x71f   : > { %v4584_v5 = vmul.f32 %v6121_v9, %v4401_v55  ;;  %v4255_v44 = vpop.xlane.xlu2 %4254  ;;  %v4583_v34 = vmul.f32 %v6123_v57, %v4398_v50  ;;  %v6125_v15 = vpop.eup %6124  ;;  %v9935_v55 = vld [vmem:[#allocation65_spill] sm:$0xff]  ;;  %v3512_v57 = vsel %vm1866_vm3, %v8965_v38, 0.0 }
 0x720   : > { %6126 = vrcp.f32 %v4255_v44  ;;  %v4587_v60 = vmul.f32 %v6125_v15, %v4468_v51  ;;  %v4280_v44 = vsel %vm1866_vm3, %v9192_v20, 0.0 }
 0x721   : > { %4749 = vrot.lane.b32.xlu0 %v4584_v5, %s6507_s22  ;;  %6128 = vrcp.f32 %v4258_v25  ;;  %v2728_v5 = vsel %vm1866_vm3, %v9935_v55, 0.0 }
 0x722   : > { %1994 = vadd.xlane.f32.xlu1 %v1993_v39  ;;  %6130 = vrcp.f32 %v9931_v47 }
 0x723   : > { %6132 = vrcp.f32 %v9932_v43 }
 0x724   : > { %6134 = vrcp.f32 %v9227_v26 }
 0x725   : > { %4747 = vrot.lane.b32.xlu2 %v4583_v34, %s6507_s22  ;;  %v9249_v28 = vpop.xlane.xlu0 %4275  ;;  %6136 = vrcp.f32 %v9043_v37  ;;  %v9937_v34 = vld [vmem:[#allocation35_spill] sm:$0xff] }
 0x726   : > { %v4433_v2 = vpop.f32.mrf.mxu3  ;;  %v6127_v40 = vpop.eup %6126  ;;  %v2002_v15 = vsel %vm1866_vm3, %v9937_v34, 0.0  ;;  %6138 = vrcp.f32 %v8887_v21 }
 0x727   : > { %v9241_v11 = vpop.xlane.xlu2 %4272  ;;  %v4585_v29 = vmul.f32 %v6127_v40, %v4433_v2  ;;  %v6129_v22 = vpop.eup %6128  ;;  %6140 = vrcp.f32 %v9214_v46 }
 0x728   : > { %v6131_v35 = vpop.eup %6130  ;;  %6142 = vrcp.f32 %v9222_v58 }
 0x729   : > { %4755 = vrot.lane.b32.xlu0 %v4587_v60, %s6507_s22  ;;  %v3052_v3 = vmul.f32 %v6131_v35, %v9933_v31  ;;  %v6133_v50 = vpop.eup %6132  ;;  %v9938_v60 = vld [vmem:[#allocation62_spill] sm:$0xff]  ;;  %6144 = vrcp.f32 %v9049_v7  ;;  %v1989_v7 = vpop.xlane.xlu1 %1988 }
 0x72a   : > { %v2261_v59 = vmul.f32 %v6133_v50, %v9934_v54  ;;  %v6135_v39 = vpop.eup %6134  ;;  %6146 = vrcp.f32 %v9225_v48  ;;  %v9941_v50 = vld [vmem:[#allocation37_spill] sm:$0xff] }
 0x72b   : > { %v4588_v51 = vmul.f32 %v6135_v39, %v4471_v17  ;;  %v6137_v38 = vpop.eup %6136  ;;  %6148 = vrcp.f32 %v9202_v42  ;;  %v1999_v54 = vsel %vm1866_vm3, %v9941_v50, 0.0  ;;  %v4538_v39 = vpop.f32.mrf.mxu2 }
 0x72c   : > { %v4789_v18 = vsel %vm1585_vm2, %v2261_v59, %v8837_v12  ;;  %v9936_v12 = vld [vmem:[#allocation84_spill] sm:$0xff]  ;;  %v3820_v2 = vmul.f32 %v6137_v38, %v8958_v13  ;;  %v6139_v26 = vpop.eup %6138  ;;  %6150 = vrcp.f32 %v9204_v53  ;;  %v9945_v38 = vld [vmem:[#allocation78_spill] sm:$0xff] }
 0x72d   : > { %4751 = vrot.lane.b32.xlu2 %v4585_v29, %s6507_s22  ;;  %v4805_v45 = vsel %vm1866_vm3, %v4789_v18, %v9092_v27  ;;  %v1996_v27 = vsel %vm1866_vm3, %v9936_v12, 0.0  ;;  %v3053_v40 = vmul.f32 %v6139_v26, %v9938_v60  ;;  %v6141_v25 = vpop.eup %6140  ;;  %6152 = vrcp.f32 %v1989_v7  ;;  %v9944_v12 = vld [vmem:[#allocation63_spill] sm:$0xff]  ;;  %v9946_v60 = vld [vmem:[#allocation73_spill] sm:$0xff] }
 0x72e   : > { %v4436_v49 = vpop.f32.mrf.mxu3  ;;  %v6143_v29 = vpop.eup %6142  ;;  %v3823_v58 = vmul.f32 %v6141_v25, %v9024_v41  ;;  %6154 = vrcp.f32 %v9241_v11 }
 0x72f   : > { %v4740_v19 = vpop.permute.xlu2 %4739  ;;  %v4586_v8 = vmul.f32 %v6129_v22, %v4436_v49  ;;  %v6145_v49 = vpop.eup %6144  ;;  %v9939_v22 = vld [vmem:[#allocation91_spill] sm:$0xff]  ;;  %6156 = vrcp.f32 %v9230_v33 }
 0x730   : > { %v4820_v16 = vsel %vm4819_vm4, %v9068_v32, %v4740_v19  ;;  %6158 = vrcp.f32 %v9232_v52 }
 0x731   : > { %5650 = vmatmul.msk.f32.vlgmr.msrb.gmra.mxu0 %vm1221_vm1, %v4820_v16  ;;  %6160 = vrcp.f32 %v9249_v28 }
 0x735   : > { %4753 = vrot.lane.b32.xlu2 %v4586_v8, %s6507_s22  ;;  %v3054_v8 = vmul.f32 %v6145_v49, %v9939_v22 }
 0x737   : > { %v4742_v36 = vpop.permute.xlu2 %4741 }
 0x738   : > { %v4821_v30 = vsel %vm4819_vm4, %v9099_v4, %v4742_v36  ;;  %v9257_v32 = vpop.permute.xlu0 %4689  ;;  %v6147_v36 = vpop.eup %6146 }
 0x739   : > { %5651 = vmatmul.msk.f32.gmra.mxu0 %vm1221_vm1, %v4821_v30 }
 0x73b   : > { %4629 = vrot.lane.b32.xlu1 %v3052_v3, %s6505_s19  ;;  %v6149_v3 = vpop.eup %6148 }
 0x73c   : > { %v6151_v59 = vpop.eup %6150 }
 0x73d   : > { %v6153_v55 = vpop.eup %6152 }
 0x73e   : > { %v6155_v17 = vpop.eup %6154 }
 0x73f   : > { %v6157_v26 = vpop.eup %6156 }
 0x740   : > { %v3056_v33 = vmul.f32 %v6157_v26, %v9946_v60 }
 0x742   : > { %v4744_v9 = vpop.permute.xlu0 %4743 }
 0x743   : > { %v4822_v4 = vsel %vm4819_vm4, %v4805_v45, %v4744_v9  ;;  %v9942_v9 = vld [vmem:[#allocation30_spill] sm:$0xff] }
 0x744   : > { %5652 = vmatmul.msk.f32.gmra.mxu0 %vm1221_vm1, %v4822_v4  ;;  %v3055_v4 = vmul.f32 %v6151_v59, %v9942_v9 }
 0x753   : > { %2729 = vadd.xlane.f32.xlu0 %v2728_v5 }
 0x75b   : > { %4281 = vadd.xlane.f32.xlu0 %v4280_v44  ;;  %v9943_v44 = vld [vmem:[#allocation53_spill] sm:$0xff] }
 0x75e   : > { %3513 = vadd.xlane.f32.xlu2 %v3512_v57  ;;  %v2267_v57 = vmul.f32 %v6153_v55, %v9943_v44  ;;  %v9949_v44 = vld [vmem:[#allocation66_spill] sm:$0xff] }
 0x765   : > { %1997 = vadd.xlane.f32.xlu1 %v1996_v27  ;;  %v2005_v27 = vsel %vm1866_vm3, %v9944_v12, 0.0 }
 0x76d   : > { %2003 = vadd.xlane.f32.xlu1 %v2002_v15  ;;  %v9293_v13 = vpop.xlane.xlu0 %2726 }
 0x76f   : > { %4757 = vrot.lane.b32.xlu0 %v4588_v51, %s6507_s22  ;;  %v4591_v51 = vmul.f32 %v6155_v17, %v4538_v39 }
 0x770   : > { %v9280_v20 = vpop.xlane.xlu2 %3510 }
 0x776   : > { %4693 = vrot.lane.b32.xlu2 %v3820_v2, %s6506_s14  ;;  %v2008_v2 = vsel %vm1866_vm3, %v9945_v38, 0.0 }
 0x777   : > { %4695 = vrot.lane.b32.xlu0 %v8999_v61, %s6506_s14  ;;  %v4503_v61 = vpop.f32.mrf.mxu1 }
 0x778   : > { %v9287_v37 = vpop.permute.xlu2 %4691  ;;  %v4589_v46 = vmul.f32 %v6143_v29, %v4503_v61  ;;  %v4573_v61 = vpop.f32.mrf.mxu3 }
 0x77e   : > { %4631 = vrot.lane.b32.xlu2 %v3053_v40, %s6505_s19  ;;  %v4541_v40 = vpop.f32.mrf.mxu2 }
 0x77f   : > { %v4506_v30 = vpop.f32.mrf.mxu1 }
 0x780   : > { %v4746_v21 = vpop.permute.xlu2 %4745  ;;  %v4590_v31 = vmul.f32 %v6147_v36, %v4506_v30 }
 0x781   : > { %v4823_v19 = vsel %vm4819_vm4, %v9108_v10, %v4746_v21  ;;  %v4279_v10 = vpop.xlane.xlu0 %4278 }
 0x782   : > { %5653 = vmatmul.msk.f32.gmra.mxu0 %vm1221_vm1, %v4823_v19  ;;  %6162 = vrcp.f32 %v4279_v10 }
 0x783   : > { %6164 = vrcp.f32 %v9293_v13 }
 0x784   : > { %6166 = vrcp.f32 %v9280_v20 }
 0x786   : > { %4759 = vrot.lane.b32.xlu2 %v4589_v46, %s6507_s22  ;;  %4699 = vrot.lane.b32.xlu1 %v3823_v58, %s6506_s14 }
 0x788   : > { %v4748_v47 = vpop.permute.xlu2 %4747 }
 0x789   : > { %v4824_v16 = vsel %vm4819_vm4, %v9146_v62, %v4748_v47  ;;  %v4626_v62 = vpop.permute.xlu1 %4625 }
 0x78a   : > { %5654 = vmatmul.msk.f32.gmra.mxu0 %vm1221_vm1, %v4824_v16 }
 0x78e   : > { %4633 = vrot.lane.b32.xlu2 %v3054_v8, %s6505_s19 }
 0x790   : > { %v4752_v43 = vpop.permute.xlu2 %4751 }
 0x791   : > { %v4826_v48 = vsel %vm4819_vm4, %v9211_v56, %v4752_v43  ;;  %v9947_v43 = vld [vmem:[#allocation28_spill] sm:$0xff] }
 0x793   : > { %v4750_v41 = vpop.permute.xlu0 %4749 }
 0x794   : > { %v4825_v35 = vsel %vm4819_vm4, %v9166_v23, %v4750_v41  ;;  %v9319_v23 = vpop.xlane.xlu1 %1991  ;;  %v4576_v41 = vpop.f32.mrf.mxu3 }
 0x795   : > { %5655 = vmatmul.msk.f32.gmra.mxu0 %vm1221_vm1, %v4825_v35 }
 0x796   : > { %4697 = vrot.lane.b32.xlu2 %v9003_v14, %s6506_s14  ;;  %v9940_v14 = vld [vmem:[#allocation79_spill] sm:$0xff] }
 0x797   : > { %v2266_v42 = vmul.f32 %v6149_v3, %v9940_v14  ;;  %v9948_v14 = vld [vmem:[#allocation33_spill] sm:$0xff] }
 0x798   : > { %v4754_v53 = vpop.permute.xlu2 %4753 }
 0x799   : > { %v4794_v18 = vsel %vm1585_vm2, %v2266_v42, %v4626_v62 }
 0x79a   : > { %v4810_v56 = vsel %vm1866_vm3, %v4794_v18, %v9257_v32 }
 0x79b   : > { %v4827_v45 = vsel %vm4819_vm4, %v4810_v56, %v4754_v53  ;;  %v4756_v11 = vpop.permute.xlu0 %4755 }
 0x79c   : > { %v4628_v5 = vpop.permute.xlu1 %4627 }
 0x79d   : > { %5656 = vmatmul.msk.f32.gmra.mxu0 %vm1221_vm1, %v4826_v48  ;;  %v4795_v32 = vsel %vm1585_vm2, %v2267_v57, %v4628_v5 }
 0x79e   : > { %4761 = vrot.lane.b32.xlu2 %v4590_v31, %s6507_s22  ;;  %v4811_v34 = vsel %vm1866_vm3, %v4795_v32, %v9287_v37  ;;  %v6159_v37 = vpop.eup %6158 }
 0x79f   : > { %v4828_v15 = vsel %vm4819_vm4, %v4811_v34, %v4756_v11  ;;  %v6161_v25 = vpop.eup %6160  ;;  %v3824_v21 = vmul.f32 %v6159_v37, %v9031_v24 }
 0x7a0   : > { %v4592_v29 = vmul.f32 %v6161_v25, %v4541_v40  ;;  %v6163_v52 = vpop.eup %6162 }
 0x7a1   : > { %2000 = vadd.xlane.f32.xlu0 %v1999_v54  ;;  %v6165_v19 = vpop.eup %6164  ;;  %v4593_v28 = vmul.f32 %v6163_v52, %v4573_v61 }
 0x7a2   : > { %v3057_v46 = vmul.f32 %v6165_v19, %v8805_v0  ;;  %v6167_v58 = vpop.eup %6166 }
 0x7a3   : > { %v3825_v24 = vmul.f32 %v6167_v58, %v9070_v6 }
 0x7a4   : > { %v1995_v0 = vpop.xlane.xlu1 %1994 }
 0x7a5   : > { %5657 = vmatmul.msk.f32.gmra.mxu0 %vm1221_vm1, %v4827_v45 }
 0x7a6   : > { %4635 = vrot.lane.b32.xlu2 %v3055_v4, %s6505_s19 }
 0x7a9   : > { %2006 = vadd.xlane.f32.xlu0 %v2005_v27  ;;  %v9378_v27 = vld [vmem:[%s9609_s7] ss:$0 sm:$0xff] }
 0x7ad   : > { %5658 = vmatmul.msk.f32.gmra.mxu0 %vm1221_vm1, %v4828_v15  ;;  %v4630_v62 = vpop.permute.xlu1 %4629 }
 0x7ae   : > { %4763 = vrot.lane.b32.xlu2 %v4591_v51, %s6507_s22 }
 0x7b0   : > { %2009 = vadd.xlane.f32.xlu1 %v2008_v2 }
 0x7b6   : > { %4637 = vrot.lane.b32.xlu2 %v3056_v33, %s6505_s19 }
 0x7bd   : > { %4701 = vrot.lane.b32.xlu0 %v3824_v21, %s6506_s14 }
 0x7be   : > { %4765 = vrot.lane.b32.xlu2 %v4592_v29, %s6507_s22 }
 0x7c5   : > { %4767 = vrot.lane.b32.xlu0 %v4593_v28, %s6507_s22 }
 0x7c6   : > { %4639 = vrot.lane.b32.xlu2 %v3057_v46, %s6505_s19  ;;  %v2730_v13 = vpop.xlane.xlu0 %2729 }
 0x7c7   : > { %6168 = vrcp.f32 %v2730_v13 }
 0x7cd   : > { %v6169_v49 = vpop.eup %6168 }
 0x7ce   : > { %4703 = vrot.lane.b32.xlu2 %v3825_v24, %s6506_s14  ;;  %v4282_v47 = vpop.xlane.xlu0 %4281  ;;  %v3058_v20 = vmul.f32 %v6169_v49, %v8810_v63  ;;  %v9950_v24 = vld [vmem:[#allocation26_spill] sm:$0xff] }
 0x7d1   : > { %v3514_v16 = vpop.xlane.xlu2 %3513 }
 0x7d2   : > { %6170 = vrcp.f32 %v3514_v16 }
 0x7d3   : > { %6172 = vrcp.f32 %v4282_v47 }
 0x7d4   : > { %6174 = vrcp.f32 %v9319_v23  ;;  %v4909_v23 = vpop.f32.mrf.mxu0 }
 0x7d5   : > { %6176 = vrcp.f32 %v1995_v0  ;;  %v4910_v34 = vadd.f32 %v9378_v27, %v4909_v23 }
 0x7d6   : > { %4641 = vrot.lane.b32.xlu2 %v3058_v20, %s6505_s19 }
 0x7d7   : > { %v4959_v51 = vrot.slane %v4910_v34, 4 }
 0x7d8   : > { %v6171_v10 = vpop.eup %6170  ;;  %v1998_v9 = vpop.xlane.xlu1 %1997 }
 0x7d9   : > { %v6173_v22 = vpop.eup %6172  ;;  %v4694_v8 = vpop.permute.xlu2 %4693  ;;  %v3826_v7 = vmul.f32 %v6171_v10, %v9075_v1  ;;  %6178 = vrcp.f32 %v1998_v9 }
 0x7da   : > { %v6175_v6 = vpop.eup %6174  ;;  %v4594_v35 = vmul.f32 %v6173_v22, %v4576_v41  ;;  %v9951_v22 = vld [vmem:[#allocation88_spill] sm:$0xff] }
 0x7db   : > { %4705 = vrot.lane.b32.xlu0 %v3826_v7, %s6506_s14  ;;  %v2268_v36 = vmul.f32 %v6175_v6, %v9947_v43  ;;  %v6177_v1 = vpop.eup %6176 }
 0x7dc   : > { %v2269_v42 = vmul.f32 %v6177_v1, %v9948_v14  ;;  %v4912_v56 = vpop.f32.mrf.mxu0 }
 0x7dd   : > { %v4796_v63 = vsel %vm1585_vm2, %v2268_v36, %v4630_v62  ;;  %v4913_v37 = vadd.f32 %v9378_v27, %v4912_v56 }
 0x7de   : > { %4769 = vrot.lane.b32.xlu2 %v4594_v35, %s6507_s22  ;;  %v4812_v30 = vsel %vm1866_vm3, %v4796_v63, %v4694_v8 }
 0x7df   : > { %v6179_v5 = vpop.eup %6178  ;;  %v5071_v21 = vrot.slane %v4913_v37, 4 }
 0x7e0   : > { %v2270_v57 = vmul.f32 %v6179_v5, %v9949_v44  ;;  %v2004_v28 = vpop.xlane.xlu1 %2003 }
 0x7e1   : > { %v4632_v48 = vpop.permute.xlu2 %4631  ;;  %v4758_v31 = vpop.permute.xlu0 %4757 }
 0x7e2   : > { %v4829_v3 = vsel %vm4819_vm4, %v4812_v30, %v4758_v31  ;;  %v4797_v50 = vsel %vm1585_vm2, %v2269_v42, %v4632_v48 }
 0x7e3   : > { %5659 = vmatmul.msk.f32.gmra.mxu0 %vm1221_vm1, %v4829_v3 }
 0x7e4   : > { %v4915_v4 = vpop.f32.mrf.mxu0 }
 0x7e5   : > { %v4916_v46 = vadd.f32 %v9378_v27, %v4915_v4 }
 0x7e7   : > { %v4971_v20 = vrot.slane %v4916_v46, 4 }
 0x7e9   : > { %v4760_v54 = vpop.permute.xlu2 %4759  ;;  %v4696_v59 = vpop.permute.xlu0 %4695 }
 0x7ea   : > { %v4813_v53 = vsel %vm1866_vm3, %v4797_v50, %v4696_v59 }
 0x7eb   : > { %v4830_v18 = vsel %vm4819_vm4, %v4813_v53, %v4760_v54 }
 0x7ec   : > { %5660 = vmatmul.msk.f32.gmra.mxu0 %vm1221_vm1, %v4830_v18 }
 0x7f1   : > { %v4634_v45 = vpop.permute.xlu2 %4633 }
 0x7f2   : > { %v4798_v17 = vsel %vm1585_vm2, %v2270_v57, %v4634_v45 }
 0x7f8   : > { %v4700_v41 = vpop.permute.xlu1 %4699 }
 0x7f9   : > { %v4698_v55 = vpop.permute.xlu2 %4697 }
 0x7fa   : > { %v4814_v11 = vsel %vm1866_vm3, %v4798_v17, %v4698_v55 }
 0x7ff   : > { %v4918_v12 = vpop.f32.mrf.mxu0 }
 0x800   : > { %v4919_v36 = vadd.f32 %v9378_v27, %v4918_v12 }
 0x801   : > { %v4762_v32 = vpop.permute.xlu2 %4761 }
 0x802   : > { %v4831_v39 = vsel %vm4819_vm4, %v4814_v11, %v4762_v32  ;;  %v5083_v56 = vrot.slane %v4919_v36, 4 }
 0x803   : > { %5661 = vmatmul.msk.f32.gmra.mxu0 %vm1221_vm1, %v4831_v39 }
 0x807   : > { %v4921_v15 = vpop.f32.mrf.mxu0 }
 0x808   : > { %v4922_v38 = vadd.f32 %v9378_v27, %v4921_v15 }
 0x809   : > { %v4636_v2 = vpop.permute.xlu2 %4635 }
 0x80a   : > { %v4957_v26 = vrot.slane %v4922_v38, 4  ;;  %v4960_v60 = vsel %vm513_vm0, %v4922_v38, %v4959_v51 }
 0x80b   : > { %v4968_v47 = vperm.slane %v4960_v60, %v9950_v24  ;;  %v9952_v60 = vld [vmem:[#allocation83_spill] sm:$0xff] }
 0x80c   : > { %v4958_v33 = vsel %vm513_vm0, %v4957_v26, %v4910_v34 }
 0x80d   : > { %v4964_v0 = vperm.slane %v4958_v33, %v9950_v24  ;;  %v5019_v35 = vrot.slane %v4968_v47, 4 }
 0x80f   : > { %v5007_v63 = vrot.slane %v4964_v0, 4 }
 0x811   : > { %v4764_v40 = vpop.permute.xlu2 %4763 }
 0x812   : > { %v4924_v25 = vpop.f32.mrf.mxu0 }
 0x813   : > { %v4925_v29 = vadd.f32 %v9378_v27, %v4924_v25 }
 0x814   : > { %v2001_v52 = vpop.xlane.xlu0 %2000 }
 0x815   : > { %v5069_v19 = vrot.slane %v4925_v29, 4  ;;  %v5072_v61 = vsel %vm513_vm0, %v4925_v29, %v5071_v21  ;;  %6180 = vrcp.f32 %v2001_v52  ;;  %v9953_v52 = vld [vmem:[#allocation89_spill] sm:$0xff] }
 0x816   : > { %v5080_v53 = vperm.slane %v5072_v61, %v9950_v24  ;;  %6182 = vrcp.f32 %v2004_v28 }
 0x817   : > { %v5070_v13 = vsel %vm513_vm0, %v5069_v19, %v4913_v37 }
 0x818   : > { %v5076_v45 = vperm.slane %v5070_v13, %v9950_v24  ;;  %v5131_v5 = vrot.slane %v5080_v53, 4 }
 0x819   : > { %v4638_v58 = vpop.permute.xlu2 %4637 }
 0x81a   : > { %v4927_v49 = vpop.f32.mrf.mxu0  ;;  %v5119_v17 = vrot.slane %v5076_v45, 4 }
 0x81b   : > { %v6181_v16 = vpop.eup %6180  ;;  %v4928_v10 = vadd.f32 %v9378_v27, %v4927_v49 }
 0x81c   : > { %v2271_v8 = vmul.f32 %v6181_v16, %v9951_v22  ;;  %v2007_v44 = vpop.xlane.xlu0 %2006  ;;  %v6183_v34 = vpop.eup %6182 }
 0x81d   : > { %v4969_v7 = vrot.slane %v4928_v10, 4  ;;  %v4972_v6 = vsel %vm513_vm0, %v4928_v10, %v4971_v20  ;;  %6184 = vrcp.f32 %v2007_v44  ;;  %v2272_v33 = vmul.f32 %v6183_v34, %v9952_v60  ;;  %v9954_v20 = vld [vmem:[#allocation34_spill] sm:$0xff] }
 0x81e   : > { %v4980_v62 = vperm.slane %v4972_v6, %v9950_v24  ;;  %v4799_v43 = vsel %vm1585_vm2, %v2271_v8, %v4636_v2 }
 0x81f   : > { %v4970_v30 = vsel %vm513_vm0, %v4969_v7, %v4916_v46  ;;  %v4815_v48 = vsel %vm1866_vm3, %v4799_v43, %v4700_v41  ;;  %v4800_v37 = vsel %vm1585_vm2, %v2272_v33, %v4638_v58 }
 0x820   : > { %v4976_v31 = vperm.slane %v4970_v30, %v9950_v24  ;;  %v5017_v3 = vrot.slane %v4980_v62, 4  ;;  %v9405_v1 = vsel %vm513_vm0, %v4980_v62, %v5019_v35  ;;  %v4832_v23 = vsel %vm4819_vm4, %v4815_v48, %v4764_v40 }
 0x821   : > { %v4766_v14 = vpop.permute.xlu2 %4765  ;;  %5662 = vmatmul.msk.f32.gmra.mxu0 %vm1221_vm1, %v4832_v23 }
 0x822   : > { %v5005_v42 = vrot.slane %v4976_v31, 4  ;;  %v9410_v50 = vsel %vm513_vm0, %v4976_v31, %v5007_v63  ;;  %v9413_v54 = vsel %vm513_vm0, %v5017_v3, %v4968_v47  ;;  %v4930_v59 = vpop.f32.mrf.mxu0 }
 0x823   : > { %v4931_v18 = vadd.f32 %v9378_v27, %v4930_v59  ;;  %v6185_v21 = vpop.eup %6184  ;;  %v2010_v58 = vpop.xlane.xlu1 %2009 }
 0x824   : > { %v9419_v9 = vsel %vm513_vm0, %v5005_v42, %v4964_v0  ;;  %v2273_v19 = vmul.f32 %v6185_v21, %v9953_v52  ;;  %6186 = vrcp.f32 %v2010_v58 }
 0x825   : > { %v5081_v4 = vrot.slane %v4931_v18, 4  ;;  %v5084_v55 = vsel %vm513_vm0, %v4931_v18, %v5083_v56 }
 0x826   : > { %v5092_v12 = vperm.slane %v5084_v55, %v9950_v24 }
 0x827   : > { %v5082_v57 = vsel %vm513_vm0, %v5081_v4, %v4919_v36  ;;  %v9955_v4 = vld [vmem:[#allocation27_spill] sm:$0xff] }
 0x828   : > { %v5088_v11 = vperm.slane %v5082_v57, %v9950_v24  ;;  %v5129_v32 = vrot.slane %v5092_v12, 4  ;;  %v9426_v39 = vsel %vm513_vm0, %v5092_v12, %v5131_v5  ;;  %v5028_v55 = vperm.slane %v9405_v1, %v9955_v4 }
 0x829   : > { %v4640_v38 = vpop.permute.xlu2 %4639 }
 0x82a   : > { %v5117_v15 = vrot.slane %v5088_v11, 4  ;;  %v9429_v51 = vsel %vm513_vm0, %v5088_v11, %v5119_v17  ;;  %v9432_v2 = vsel %vm513_vm0, %v5129_v32, %v5080_v53  ;;  %v4801_v28 = vsel %vm1585_vm2, %v2273_v19, %v4640_v38  ;;  %v6187_v16 = vpop.eup %6186  ;;  %v4933_v41 = vpop.f32.mrf.mxu0 }
 0x82b   : > { %v2274_v0 = vmul.f32 %v6187_v16, %v9954_v20  ;;  %v4934_v63 = vadd.f32 %v9378_v27, %v4933_v41  ;;  %v5012_v17 = vperm.slane %v9419_v9, %v9955_v4  ;;  %v5016_v11 = vperm.slane %v9410_v50, %v9955_v4 }
 0x82c   : > { %v9435_v26 = vsel %vm513_vm0, %v5117_v15, %v5076_v45  ;;  %v5024_v32 = vperm.slane %v9413_v54, %v9955_v4  ;;  %v5067_v33 = vrot.slane %v5028_v55, 4 }
 0x82d   : > { %v4983_v31 = vrot.slane %v4934_v63, 4  ;;  %v5055_v52 = vrot.slane %v5012_v17, 4 }
 0x82e   : > { %v5063_v19 = vrot.slane %v5024_v32, 4 }
 0x82f   : > { %v4702_v40 = vpop.permute.xlu0 %4701 }
 0x830   : > { %v4816_v25 = vsel %vm1866_vm3, %v4800_v37, %v4702_v40 }
 0x831   : > { %v4833_v29 = vsel %vm4819_vm4, %v4816_v25, %v4766_v14  ;;  %v4704_v61 = vpop.permute.xlu2 %4703  ;;  %v5059_v25 = vrot.slane %v5016_v11, 4 }
 0x832   : > { %5663 = vmatmul.msk.f32.gmra.mxu0 %vm1221_vm1, %v4833_v29  ;;  %v4817_v46 = vsel %vm1866_vm3, %v4801_v28, %v4704_v61 }
 0x837   : > { %v4768_v13 = vpop.permute.xlu0 %4767 }
 0x838   : > { %v4834_v47 = vsel %vm4819_vm4, %v4817_v46, %v4768_v13 }
 0x839   : > { %v4642_v49 = vpop.permute.xlu2 %4641 }
 0x83a   : > { %5664 = vmatmul.msk.f32.gmra.mxu0 %vm1221_vm1, %v4834_v47  ;;  %v4802_v10 = vsel %vm1585_vm2, %v2274_v0, %v4642_v49 }
 0x841   : > { %v4770_v8 = vpop.permute.xlu2 %4769 }
 0x84d   : > { %v4706_v22 = vpop.permute.xlu0 %4705 }
 0x84e   : > { %v4818_v7 = vsel %vm1866_vm3, %v4802_v10, %v4706_v22 }
 0x84f   : > { %v4835_v6 = vsel %vm4819_vm4, %v4818_v7, %v4770_v8 }
 0x850   : > { %5665 = vmatmul.msk.f32.gmra.mxu0 %vm1221_vm1, %v4835_v6 }
 0x860   : > { %v4936_v35 = vpop.f32.mrf.mxu0 }
 0x861   : > { %v4937_v49 = vadd.f32 %v9378_v27, %v4936_v35 }
 0x863   : > { %v5095_v41 = vrot.slane %v4937_v49, 4 }
 0x869   : > { %v4939_v62 = vpop.f32.mrf.mxu0 }
 0x86a   : > { %v4940_v23 = vadd.f32 %v9378_v27, %v4939_v62 }
 0x86c   : > { %v4995_v18 = vrot.slane %v4940_v23, 4 }
 0x880   : > { %v9452_v43 = vpop.f32.mrf.mxu0 }
 0x881   : > { %v4943_v62 = vadd.f32 %v9378_v27, %v9452_v43 }
 0x89e   : > { %v4945_v36 = vpop.f32.mrf.mxu0 }
 0x89f   : > { %v4946_v30 = vadd.f32 %v9378_v27, %v4945_v36 }
 0x8a1   : > { %v4981_v3 = vrot.slane %v4946_v30, 4  ;;  %v4984_v14 = vsel %vm513_vm0, %v4946_v30, %v4983_v31  ;;  %v5107_v31 = vrot.slane %v4943_v62, 4 }
 0x8a2   : > { %v4992_v59 = vperm.slane %v4984_v14, %v9950_v24  ;;  %v5140_v14 = vperm.slane %v9426_v39, %v9955_v4 }
 0x8a3   : > { %v4982_v42 = vsel %vm513_vm0, %v4981_v3, %v4934_v63 }
 0x8a4   : > { %v4988_v45 = vperm.slane %v4982_v42, %v9950_v24  ;;  %v5043_v57 = vrot.slane %v4992_v59, 4 }
 0x8a6   : > { %v5031_v15 = vrot.slane %v4988_v45, 4 }
 0x8af   : > { %v4948_v48 = vpop.f32.mrf.mxu0 }
 0x8b0   : > { %v4949_v20 = vadd.f32 %v9378_v27, %v4948_v48 }
 0x8b2   : > { %v5093_v35 = vrot.slane %v4949_v20, 4  ;;  %v5096_v36 = vsel %vm513_vm0, %v4949_v20, %v5095_v41 }
 0x8b3   : > { %v5104_v30 = vperm.slane %v5096_v36, %v9950_v24 }
 0x8b4   : > { %v5094_v63 = vsel %vm513_vm0, %v5093_v35, %v4937_v49 }
 0x8b5   : > { %v5155_v43 = vrot.slane %v5104_v30, 4 }
 0x8b7   : > { %v4951_v53 = vpop.f32.mrf.mxu0 }
 0x8b8   : > { %v4952_v56 = vadd.f32 %v9378_v27, %v4951_v53 }
 0x8ba   : > { %v4993_v5 = vrot.slane %v4952_v56, 4  ;;  %v4996_v44 = vsel %vm513_vm0, %v4952_v56, %v4995_v18  ;;  %v5124_v18 = vperm.slane %v9435_v26, %v9955_v4  ;;  %v5128_v56 = vperm.slane %v9429_v51, %v9955_v4 }
 0x8bb   : > { %v5004_v12 = vperm.slane %v4996_v44, %v9950_v24 }
 0x8bc   : > { %v4994_v34 = vsel %vm513_vm0, %v4993_v5, %v4940_v23  ;;  %v5100_v23 = vperm.slane %v5094_v63, %v9950_v24 }
 0x8bd   : > { %v5000_v1 = vperm.slane %v4994_v34, %v9950_v24  ;;  %v5041_v38 = vrot.slane %v5004_v12, 4  ;;  %v5044_v60 = vsel %vm513_vm0, %v5004_v12, %v5043_v57  ;;  %v5179_v57 = vrot.slane %v5140_v14, 4 }
 0x8be   : > { %v5052_v37 = vperm.slane %v5044_v60, %v9955_v4  ;;  %v5167_v34 = vrot.slane %v5124_v18, 4 }
 0x8bf   : > { %v5029_v40 = vrot.slane %v5000_v1, 4  ;;  %v5032_v9 = vsel %vm513_vm0, %v5000_v1, %v5031_v15  ;;  %v5042_v50 = vsel %vm513_vm0, %v5041_v38, %v4992_v59 }
 0x8c0   : > { %v5040_v54 = vperm.slane %v5032_v9, %v9955_v4  ;;  %v5048_v21 = vperm.slane %v5042_v50, %v9955_v4  ;;  %v5068_v29 = vsel %vm513_vm0, %v5052_v37, %v5067_v33  ;;  %v5065_v28 = vrot.slane %v5052_v37, 4 }
 0x8c1   : > { %v5030_v61 = vsel %vm513_vm0, %v5029_v40, %v4988_v45  ;;  %5188 = vst.msk [vmem:[%s9483_s20 + $0x38] sm:$0xff] %vm1221_vm1, %v5068_v29 }
 0x8c2   : > { %v5036_v46 = vperm.slane %v5030_v61, %v9955_v4  ;;  %v5057_v13 = vrot.slane %v5040_v54, 4  ;;  %v5060_v47 = vsel %vm513_vm0, %v5040_v54, %v5059_v25  ;;  %v5061_v58 = vrot.slane %v5048_v21, 4 }
 0x8c3   : > { %v5064_v16 = vsel %vm513_vm0, %v5048_v21, %v5063_v19  ;;  %5184 = vst.msk [vmem:[%s9483_s20 + $0x18] sm:$0xff] %vm1221_vm1, %v5060_v47  ;;  %v5066_v6 = vsel %vm513_vm0, %v5065_v28, %v5028_v55  ;;  %v5143_v55 = vrot.slane %v5100_v23, 4 }
 0x8c4   : > { %v5053_v0 = vrot.slane %v5036_v46, 4  ;;  %v5056_v10 = vsel %vm513_vm0, %v5036_v46, %v5055_v52  ;;  %v5058_v22 = vsel %vm513_vm0, %v5057_v13, %v5016_v11  ;;  %5186 = vst.msk [vmem:[%s9483_s20 + $0x28] sm:$0xff] %vm1221_vm1, %v5064_v16  ;;  %v5062_v8 = vsel %vm513_vm0, %v5061_v58, %v5024_v32 }
 0x8c5   : > { %5182 = vst.msk [vmem:[%s9483_s20 + $0x8] sm:$0xff] %vm1221_vm1, %v5056_v10 }
 0x8c6   : > { %v5054_v7 = vsel %vm513_vm0, %v5053_v0, %v5012_v17  ;;  %5183 = vst.msk [vmem:[%s9483_s20 + $0x10] sm:$0xff] %vm1221_vm1, %v5058_v22 }
 0x8c7   : > { %5181 = vst.msk [vmem:[%s9483_s20] sm:$0xff] %vm1221_vm1, %v5054_v7 }
 0x8c8   : > { %5185 = vst.msk [vmem:[%s9483_s20 + $0x20] sm:$0xff] %vm1221_vm1, %v5062_v8 }
 0x8c9   : > { %5187 = vst.msk [vmem:[%s9483_s20 + $0x30] sm:$0xff] %vm1221_vm1, %v5066_v6 }
 0x8cd   : > { %v4954_v48 = vpop.f32.mrf.mxu0 }
 0x8ce   : > { %v4955_v3 = vadd.f32 %v9378_v27, %v4954_v48  ;;  %v5136_v27 = vperm.slane %v9432_v2, %v9955_v4  ;;  %v5171_v2 = vrot.slane %v5128_v56, 4 }
 0x8d0   : > { %v5105_v42 = vrot.slane %v4955_v3, 4  ;;  %v5108_v59 = vsel %vm513_vm0, %v4955_v3, %v5107_v31  ;;  %v5175_v15 = vrot.slane %v5136_v27, 4 }
 0x8d1   : > { %v5116_v53 = vperm.slane %v5108_v59, %v9950_v24 }
 0x8d2   : > { %v5106_v45 = vsel %vm513_vm0, %v5105_v42, %v4943_v62 }
 0x8d3   : > { %v5112_v39 = vperm.slane %v5106_v45, %v9950_v24  ;;  %v5153_v5 = vrot.slane %v5116_v53, 4  ;;  %v5156_v44 = vsel %vm513_vm0, %v5116_v53, %v5155_v43 }
 0x8d4   : > { %v5164_v12 = vperm.slane %v5156_v44, %v9955_v4 }
 0x8d5   : > { %v5141_v26 = vrot.slane %v5112_v39, 4  ;;  %v5144_v17 = vsel %vm513_vm0, %v5112_v39, %v5143_v55  ;;  %v5154_v51 = vsel %vm513_vm0, %v5153_v5, %v5104_v30 }
 0x8d6   : > { %v5152_v11 = vperm.slane %v5144_v17, %v9955_v4  ;;  %v5160_v24 = vperm.slane %v5154_v51, %v9955_v4  ;;  %v5180_v32 = vsel %vm513_vm0, %v5164_v12, %v5179_v57  ;;  %v5177_v38 = vrot.slane %v5164_v12, 4 }
 0x8d7   : > { %v5142_v1 = vsel %vm513_vm0, %v5141_v26, %v5100_v23  ;;  %5196 = vst.msk [vmem:[%s9483_s20 + $0x78] sm:$0xff] %vm1221_vm1, %v5180_v32 }
 0x8d8   : > { %v5148_v60 = vperm.slane %v5142_v1, %v9955_v4  ;;  %v5169_v33 = vrot.slane %v5152_v11, 4  ;;  %v5172_v37 = vsel %vm513_vm0, %v5152_v11, %v5171_v2  ;;  %v5173_v40 = vrot.slane %v5160_v24, 4 }
 0x8d9   : > { %v5176_v9 = vsel %vm513_vm0, %v5160_v24, %v5175_v15  ;;  %5192 = vst.msk [vmem:[%s9483_s20 + $0x58] sm:$0xff] %vm1221_vm1, %v5172_v37  ;;  %v5178_v29 = vsel %vm513_vm0, %v5177_v38, %v5140_v14 }
 0x8da   : > { %v5165_v50 = vrot.slane %v5148_v60, 4  ;;  %v5168_v25 = vsel %vm513_vm0, %v5148_v60, %v5167_v34  ;;  %v5170_v54 = vsel %vm513_vm0, %v5169_v33, %v5128_v56  ;;  %5194 = vst.msk [vmem:[%s9483_s20 + $0x68] sm:$0xff] %vm1221_vm1, %v5176_v9  ;;  %v5174_v4 = vsel %vm513_vm0, %v5173_v40, %v5136_v27 }
 0x8db   : > { %5190 = vst.msk [vmem:[%s9483_s20 + $0x48] sm:$0xff] %vm1221_vm1, %v5168_v25 }
 0x8dc   : > { %v5166_v21 = vsel %vm513_vm0, %v5165_v50, %v5124_v18  ;;  %5191 = vst.msk [vmem:[%s9483_s20 + $0x50] sm:$0xff] %vm1221_vm1, %v5170_v54 }
 0x8dd   : > { %5189 = vst.msk [vmem:[%s9483_s20 + $0x40] sm:$0xff] %vm1221_vm1, %v5166_v21 }
 0x8de   : > { %5193 = vst.msk [vmem:[%s9483_s20 + $0x60] sm:$0xff] %vm1221_vm1, %v5174_v4 }
 0x8df   : > { %5195 = vst.msk [vmem:[%s9483_s20 + $0x70] sm:$0xff] %vm1221_vm1, %v5178_v29 }
 0x8e0   : > { %6425 = shalt.err (!%p6422_p12)
}
 0x8e1   : > { %s6508_s1 = smov 128  }
 0x8e2   : > { %5709 = dma.vmem_to_hbm [thread:$0]  (%p6643_p7), %s5212_s25, 2048, %s5214_s21, %s5198_s16, %s6508_s1, %s6508_s1, %s6505_s19  }
 0x8e3 PF: > { %s9956_s11 = sld [smem:[#allocation20_spill]] }
 0x8e4   : > { %s9958_s15 = sld [smem:[#allocation22_spill]] }
 0x8e9   : > { %s5228_s14 = sand.u32 1, %s9956_s11  }
 0x8ea   : > { %p9959_p13 = scmp.ge.s32.totalorder %s9958_s15, 2  ;;  %s5229_s22 = scalar_lea.sflag [#allocation4], %s5228_s14 }
 0x8ec   : > { %p5735_p0 = pnand %p9959_p13, %p6599_p6 }
 0x8ee   : > { %p5736_p3 = pneg %p5735_p0 }
 0x8f0   : > { %6467 = dma.done.wait (%p5736_p3), %s5229_s22, 2048  }
 0x8f1   : > { %6469 = vsyncadd (%p5736_p3), %s5229_s22, 4294965248  ;;  %s29_s10 = sadd.s32 1, %s9958_s15   ;;  %s9960_s17 = sld [smem:[#allocation25_spill]] }
 0x8f2   : > { %p26_p5 = scmp.ge.s32.totalorder %s29_s10, 4   ;;  %s9961_s30 = sld [smem:[#allocation21_spill]] }
 0x8f3   : > { %s9962_s9 = sld [smem:[#allocation24_spill]]  ;;  %s9963_s27 = smov %s6476_s28 }
 0x8f4   : > { %s9964_s28 = smov %s6480_s29  ;;  %28 = sbr.rel (!%p26_p5) target bundleno = 16 (0x10), region = 137 }
 0x8f7   : > { %s9965_s29 = smov %s9960_s17 }
 0x8f9   :  { %5235 = vsyncpa [#allocation3], 1 }
 0x8fa   :  { %5237 = vsyncpa [#allocation3 + $0x1], 1 }
 0x8fb   :  { %5238 = vsyncpa [#allocation6], 1 }
 0x8fc   :  { %5240 = vsyncpa [#allocation6 + $0x1], 1 }
 0x8fd   :  { %5241 = vsyncpa [#allocation9], 1 }
 0x8fe   :  { %5242 = vsyncpa [#allocation12], 1 }
 0x8ff   :  { %5243 = vsyncpa [#allocation4], 1 }
 0x900   :  { %5245 = vsyncpa [#allocation4 + $0x1], 1 }

</bundles_post_ra>
